<compile_context>
chip_gen: v6e
topology: v6e:2x2x1
jax: 0.10.0
libtpu: 0.0.40
codegen_flags: <defaults>
</compile_context>

<pallas_src>
import functools

import jax
import jax.numpy as jnp
import numpy as np
from jax.experimental import pallas as pl
from jax.experimental.pallas import tpu as pltpu


# ---------------------------------------------------------------------------
# In-kernel math helpers
# ---------------------------------------------------------------------------
_ERF_P = 0.3275911
_ERF_A1 = 0.254829592
_ERF_A2 = -0.284496736
_ERF_A3 = 1.421413741
_ERF_A4 = -1.453152027
_ERF_A5 = 1.061405429
_INV_SQRT2 = 0.7071067811865476


def _erf(x):
    # Abramowitz & Stegun 7.1.26 rational approximation, |err| <= 1.5e-7.
    # TODO(synk): switch to lax.erf if/when Mosaic guarantees an erf lowering.
    ax = jnp.abs(x)
    t = 1.0 / (1.0 + _ERF_P * ax)
    poly = ((((_ERF_A5 * t + _ERF_A4) * t + _ERF_A3) * t + _ERF_A2) * t
            + _ERF_A1) * t
    y = 1.0 - poly * jnp.exp(-(ax * ax))
    return jnp.where(x < 0.0, -y, y)


def _gelu_erf(x):
    # torch.nn.GELU() default (erf form)
    return 0.5 * x * (1.0 + _erf(x * _INV_SQRT2))


def _layernorm(x, g, b):
    # x: (M, C) f32, g/b: (1, C); eps matches torch.nn.LayerNorm default.
    mean = jnp.mean(x, axis=-1, keepdims=True)
    var = jnp.mean((x - mean) ** 2, axis=-1, keepdims=True)
    return (x - mean) * jax.lax.rsqrt(var + 1e-5) * g + b


# ---------------------------------------------------------------------------
# Fused block kernel: attention + MLP for one batch element
# ---------------------------------------------------------------------------
def fused_block_kernel(*refs, num_heads, head_dim, scale, has_bias):
    """out = x1 + MLP(LN2(x1)),  x1 = x_q + proj(attn(LN1(x_q), x_kv, bias))."""
    if has_bias:
        (x_q_ref, x_kv_ref, bias_ref,
         g1_ref, be1_ref, wq_ref, bq_ref, wk_ref, bk_ref, wv_ref, bv_ref,
         wp_ref, bp_ref, g2_ref, be2_ref, w1_ref, b1_ref, w2_ref, b2_ref,
         o_ref) = refs
    else:
        (x_q_ref, x_kv_ref,
         g1_ref, be1_ref, wq_ref, bq_ref, wk_ref, bk_ref, wv_ref, bv_ref,
         wp_ref, bp_ref, g2_ref, be2_ref, w1_ref, b1_ref, w2_ref, b2_ref,
         o_ref) = refs
        bias_ref = None

    H, D = num_heads, head_dim
    xq = x_q_ref[0].astype(jnp.float32)        # (Nq, Cq)
    xkv = x_kv_ref[0].astype(jnp.float32)      # (Nk, Ckv)
    nq = xq.shape[0]
    nk = xkv.shape[0]

    # ---- attention sub-block -------------------------------------------
    ln1 = _layernorm(xq, g1_ref[...], be1_ref[...])
    # Single MXU matmuls for all heads; softmax scale folded into q.
    q = (jnp.dot(ln1, wq_ref[...], preferred_element_type=jnp.float32)
         + bq_ref[...]) * scale                                     # (Nq, H*D)
    k = jnp.dot(xkv, wk_ref[...], preferred_element_type=jnp.float32) + bk_ref[...]
    v = jnp.dot(xkv, wv_ref[...], preferred_element_type=jnp.float32) + bv_ref[...]

    # Head split: (N, H*D) -> (H, N, D); leading head axis batches the MXU ops.
    qh = jnp.swapaxes(q.reshape(nq, H, D), 0, 1)                    # (H, Nq, D)
    kh = jnp.swapaxes(k.reshape(nk, H, D), 0, 1)                    # (H, Nk, D)
    vh = jnp.swapaxes(v.reshape(nk, H, D), 0, 1)                    # (H, Nk, D)

    s = jnp.einsum("hqd,hkd->hqk", qh, kh,
                   preferred_element_type=jnp.float32)              # (H, Nq, Nk)
    if has_bias:
        s = s + bias_ref[0].astype(jnp.float32)                     # (H, Nq, Nk)

    m = jnp.max(s, axis=-1, keepdims=True)
    p = jnp.exp(s - m)
    p = p / jnp.sum(p, axis=-1, keepdims=True)      # exact division (f32 parity)

    o = jnp.einsum("hqk,hkd->hqd", p, vh,
                   preferred_element_type=jnp.float32)              # (H, Nq, D)
    o_flat = jnp.swapaxes(o, 0, 1).reshape(nq, H * D)               # (Nq, H*D)
    x1 = xq + (jnp.dot(o_flat, wp_ref[...],
                       preferred_element_type=jnp.float32) + bp_ref[...])

    # ---- MLP sub-block ---------------------------------------------------
    ln2 = _layernorm(x1, g2_ref[...], be2_ref[...])
    h = jnp.dot(ln2, w1_ref[...], preferred_element_type=jnp.float32) + b1_ref[...]
    h = _gelu_erf(h)
    y = jnp.dot(h, w2_ref[...], preferred_element_type=jnp.float32) + b2_ref[...]

    o_ref[0] = (x1 + y).astype(o_ref.dtype)


# ---------------------------------------------------------------------------
# Wrapper
# ---------------------------------------------------------------------------
def fused_bias_attention_block(p, x_q, x_kv, z, num_heads, head_dim):
    """Full BiasAttentionBlock forward (attn + MLP) in one pallas_call."""
    B, Nq, Cq = x_q.shape
    _, Nk, Ckv = x_kv.shape
    hd = num_heads * head_dim
    scale = head_dim ** (-0.5)
    a = p["attn"]
    H4 = p["mlp"]["fc1"]["w"].shape[1]
    has_bias = z is not None

    # Split the fused kv Linear into K / V column blocks (wrapper-side slicing
    # only; avoids an in-kernel lane-subrange slice of the kv activation).
    w_kv, b_kv = a["kv"]["w"], a["kv"]["b"]
    w_k, w_v = w_kv[:, :hd], w_kv[:, hd:]
    b_k, b_v = b_kv[:hd], b_kv[hd:]

    weight_args = [
        p["norm1"]["g"].reshape(1, Cq), p["norm1"]["b"].reshape(1, Cq),
        a["q"]["w"], a["q"]["b"].reshape(1, hd),
        w_k, b_k.reshape(1, hd),
        w_v, b_v.reshape(1, hd),
        a["proj"]["w"], a["proj"]["b"].reshape(1, Cq),
        p["norm2"]["g"].reshape(1, Cq), p["norm2"]["b"].reshape(1, Cq),
        p["mlp"]["fc1"]["w"], p["mlp"]["fc1"]["b"].reshape(1, H4),
        p["mlp"]["fc2"]["w"], p["mlp"]["fc2"]["b"].reshape(1, Cq),
    ]

    def _w_spec(arr):
        return pl.BlockSpec(arr.shape, lambda b: (0,) * arr.ndim)

    weight_specs = [_w_spec(w) for w in weight_args]

    data_args = [x_q, x_kv]
    data_specs = [
        pl.BlockSpec((1, Nq, Cq), lambda b: (b, 0, 0)),
        pl.BlockSpec((1, Nk, Ckv), lambda b: (b, 0, 0)),
    ]
    if has_bias:
        # Pairwise bias as ONE matmul, precomputed outside the kernel:
        # (B, Nq, Nk, Cb) @ (Cb, H) + b -> (B, H, Nq, Nk).  Streams H (<Cb)
        # planes into the kernel and removes the per-channel FMA loop.
        bias = (jnp.einsum("bqkc,ch->bhqk", z, a["bias"]["w"])
                + a["bias"]["b"][None, :, None, None])
        data_args.append(bias)
        data_specs.append(
            pl.BlockSpec((1, num_heads, Nq, Nk), lambda b: (b, 0, 0, 0)))

    kernel = functools.partial(
        fused_block_kernel, num_heads=num_heads, head_dim=head_dim,
        scale=scale, has_bias=has_bias)

    return pl.pallas_call(
        kernel,
        grid=(B,),
        in_specs=data_specs + weight_specs,
        out_specs=pl.BlockSpec((1, Nq, Cq), lambda b: (b, 0, 0)),
        out_shape=jax.ShapeDtypeStruct((B, Nq, Cq), x_q.dtype),
        compiler_params=pltpu.CompilerParams(
            dimension_semantics=("parallel",),
            vmem_limit_bytes=32 * 1024 * 1024),
    )(*data_args, *weight_args)


# ---------------------------------------------------------------------------
# Parameter initialization (deterministic, synthetic)
# ---------------------------------------------------------------------------
def init_linear(key, fan_in, fan_out):
    kw, kb = jax.random.split(key)
    return {
        "w": jax.random.normal(kw, (fan_in, fan_out), jnp.float32) * 0.02,
        "b": jax.random.normal(kb, (fan_out,), jnp.float32) * 0.02,
    }


def init_layernorm(c):
    return {"g": jnp.ones((c,), jnp.float32), "b": jnp.zeros((c,), jnp.float32)}


def init_bias_attention(key, c_q, c_kv, head_dim, num_heads, bias_dim):
    k1, k2, k3, k4 = jax.random.split(key, 4)
    return {
        "kv": init_linear(k1, c_kv, 2 * num_heads * head_dim),
        "q": init_linear(k2, c_q, num_heads * head_dim),
        "bias": init_linear(k3, bias_dim, num_heads),
        "proj": init_linear(k4, num_heads * head_dim, c_q),
    }


def init_block(key, c_q, c_kv, head_dim, num_heads, bias_dim):
    k1, k2, k3 = jax.random.split(key, 3)
    return {
        "norm1": init_layernorm(c_q),
        "attn": init_bias_attention(k1, c_q, c_kv, head_dim, num_heads, bias_dim),
        "norm2": init_layernorm(c_q),
        "mlp": {
            "fc1": init_linear(k2, c_q, 4 * c_q),
            "fc2": init_linear(k3, 4 * c_q, c_q),
        },
    }


def init_module(key, c_q, c_kv, c_point, head_dim, num_heads, bias_dim):
    keys = jax.random.split(key, 6)
    return {
        "h_self": init_block(keys[0], c_q, c_kv, head_dim, num_heads, bias_dim),
        "l_self": init_block(keys[1], c_q, c_kv, head_dim, num_heads, bias_dim),
        "h_point_cross": init_block(keys[2], c_q, c_point, head_dim, num_heads, bias_dim),
        "l_point_cross": init_block(keys[3], c_q, c_point, head_dim, num_heads, bias_dim),
        "hl_cross": init_block(keys[4], c_q, c_kv, head_dim, num_heads, bias_dim),
        "lh_cross": init_block(keys[5], c_q, c_kv, head_dim, num_heads, bias_dim),
    }


# ---------------------------------------------------------------------------
# Forward passes (mirror the PyTorch modules exactly)
# ---------------------------------------------------------------------------
def block_fwd(p, x_q, x_kv, z, num_heads, head_dim):
    return fused_bias_attention_block(p, x_q, x_kv, z, num_heads, head_dim)


def bias_attention_module_fwd(params, h_feat, l_feat, z_hh, z_hl, z_ll, z_lh,
                              point_feat, num_heads, head_dim):
    h_feat = block_fwd(params["h_self"], h_feat, h_feat, z_hh, num_heads, head_dim)
    l_feat = block_fwd(params["l_self"], l_feat, l_feat, z_ll, num_heads, head_dim)
    h_feat = block_fwd(params["h_point_cross"], h_feat, point_feat, None, num_heads, head_dim)
    l_feat = block_fwd(params["l_point_cross"], l_feat, point_feat, None, num_heads, head_dim)
    l_feat = block_fwd(params["lh_cross"], l_feat, h_feat, z_lh, num_heads, head_dim)
    h_feat = block_fwd(params["hl_cross"], h_feat, l_feat, z_hl, num_heads, head_dim)
    return h_feat, l_feat


# ---------------------------------------------------------------------------
# Pure-JAX reference (for correctness checking only)
# ---------------------------------------------------------------------------
def _layernorm_ref(x, g, b):
    mu = x.mean(-1, keepdims=True)
    var = ((x - mu) ** 2).mean(-1, keepdims=True)
    return (x - mu) / jnp.sqrt(var + 1e-5) * g + b


def _attention_ref(a, x_q, x_kv, z, H, D):
    B, Nq, _ = x_q.shape
    Nk = x_kv.shape[1]
    q = (x_q @ a["q"]["w"] + a["q"]["b"]).reshape(B, Nq, H, D).transpose(0, 2, 1, 3)
    kv = (x_kv @ a["kv"]["w"] + a["kv"]["b"]).reshape(B, Nk, 2, H, D).transpose(2, 0, 3, 1, 4)
    k, v = kv[0], kv[1]
    attn = jnp.einsum("bhqd,bhkd->bhqk", q, k) * (D ** (-0.5))
    if z is not None:
        attn = attn + (jnp.einsum("bqkc,ch->bhqk", z, a["bias"]["w"])
                       + a["bias"]["b"][None, :, None, None])
    attn = jax.nn.softmax(attn, axis=-1)
    o = jnp.einsum("bhqk,bhkd->bhqd", attn, v).transpose(0, 2, 1, 3).reshape(B, Nq, H * D)
    return o @ a["proj"]["w"] + a["proj"]["b"]


def _block_ref(p, x_q, x_kv, z, H, D):
    x_q = x_q + _attention_ref(
        p["attn"], _layernorm_ref(x_q, p["norm1"]["g"], p["norm1"]["b"]), x_kv, z, H, D)
    h = _layernorm_ref(x_q, p["norm2"]["g"], p["norm2"]["b"])
    h = h @ p["mlp"]["fc1"]["w"] + p["mlp"]["fc1"]["b"]
    h = jax.nn.gelu(h, approximate=False)
    return x_q + (h @ p["mlp"]["fc2"]["w"] + p["mlp"]["fc2"]["b"])


def _module_ref(params, h_feat, l_feat, z_hh, z_hl, z_ll, z_lh, point_feat, H, D):
    h_feat = _block_ref(params["h_self"], h_feat, h_feat, z_hh, H, D)
    l_feat = _block_ref(params["l_self"], l_feat, l_feat, z_ll, H, D)
    h_feat = _block_ref(params["h_point_cross"], h_feat, point_feat, None, H, D)
    l_feat = _block_ref(params["l_point_cross"], l_feat, point_feat, None, H, D)
    l_feat = _block_ref(params["lh_cross"], l_feat, h_feat, z_lh, H, D)
    h_feat = _block_ref(params["hl_cross"], h_feat, l_feat, z_hl, H, D)
    return h_feat, l_feat


# ---------------------------------------------------------------------------
# Main
# ---------------------------------------------------------------------------
if __name__ == "__main__":
    B = 2
    N_H = 8       # heavy-chain sequence length
    N_L = 8       # light-chain sequence length
    N_P = 8       # point-feature sequence length
    C_Q = 32
    C_KV = 32
    C_POINT = 16
    HEAD_DIM = 8
    NUM_HEADS = 4
    BIAS_DIM = 8

    key = jax.random.PRNGKey(0)
    (k_h, k_l, k_zhh, k_zhl, k_zll, k_zlh, k_pt, k_params) = jax.random.split(key, 8)

    h_feat = jax.random.normal(k_h, (B, N_H, C_Q), jnp.float32)
    l_feat = jax.random.normal(k_l, (B, N_L, C_Q), jnp.float32)
    z_hh = jax.random.normal(k_zhh, (B, N_H, N_H, BIAS_DIM), jnp.float32)
    z_hl = jax.random.normal(k_zhl, (B, N_H, N_L, BIAS_DIM), jnp.float32)
    z_ll = jax.random.normal(k_zll, (B, N_L, N_L, BIAS_DIM), jnp.float32)
    z_lh = jax.random.normal(k_zlh, (B, N_L, N_H, BIAS_DIM), jnp.float32)
    point_feat = jax.random.normal(k_pt, (B, N_P, C_POINT), jnp.float32)

    params = init_module(k_params, C_Q, C_KV, C_POINT, HEAD_DIM, NUM_HEADS, BIAS_DIM)

    fwd = jax.jit(functools.partial(bias_attention_module_fwd,
                                    num_heads=NUM_HEADS, head_dim=HEAD_DIM))
    h_out, l_out = fwd(params, h_feat, l_feat, z_hh, z_hl, z_ll, z_lh, point_feat)
    jax.block_until_ready((h_out, l_out))

    assert h_out.shape == (B, N_H, C_Q) and l_out.shape == (B, N_L, C_Q)
    assert jnp.all(jnp.isfinite(h_out)) and jnp.all(jnp.isfinite(l_out))

    # Pure-JAX reference check (erf is a 1.5e-7-accurate polynomial in-kernel).
    h_ref, l_ref = _module_ref(params, h_feat, l_feat, z_hh, z_hl, z_ll, z_lh,
                               point_feat, NUM_HEADS, HEAD_DIM)
    np.testing.assert_allclose(np.asarray(h_out), np.asarray(h_ref), rtol=2e-3, atol=2e-3)
    np.testing.assert_allclose(np.asarray(l_out), np.asarray(l_ref), rtol=2e-3, atol=2e-3)

    print("KERNEL_OK")
</pallas_src>

<mosaic_0001>
module attributes {stable_mosaic.version = 11 : i64} {
  func.func @fused_block_kernel(%arg0: i32, %arg1: memref<1x8x32xf32, #tpu.memory_space<vmem>>, %arg2: memref<1x8x16xf32, #tpu.memory_space<vmem>>, %arg3: memref<1x32xf32, #tpu.memory_space<vmem>>, %arg4: memref<1x32xf32, #tpu.memory_space<vmem>>, %arg5: memref<32x32xf32, #tpu.memory_space<vmem>>, %arg6: memref<1x32xf32, #tpu.memory_space<vmem>>, %arg7: memref<16x32xf32, #tpu.memory_space<vmem>>, %arg8: memref<1x32xf32, #tpu.memory_space<vmem>>, %arg9: memref<16x32xf32, #tpu.memory_space<vmem>>, %arg10: memref<1x32xf32, #tpu.memory_space<vmem>>, %arg11: memref<32x32xf32, #tpu.memory_space<vmem>>, %arg12: memref<1x32xf32, #tpu.memory_space<vmem>>, %arg13: memref<1x32xf32, #tpu.memory_space<vmem>>, %arg14: memref<1x32xf32, #tpu.memory_space<vmem>>, %arg15: memref<32x128xf32, #tpu.memory_space<vmem>>, %arg16: memref<1x128xf32, #tpu.memory_space<vmem>>, %arg17: memref<128x32xf32, #tpu.memory_space<vmem>>, %arg18: memref<1x32xf32, #tpu.memory_space<vmem>>, %arg19: memref<1x8x32xf32, #tpu.memory_space<vmem>>) attributes {dimension_semantics = [#tpu.dimension_semantics<parallel>], iteration_bounds = array<i64: 2>, scalar_prefetch = 0 : i64, scratch_operands = 0 : i64, tpu.core_type = #tpu.core_type<tc>, window_params = [{transform_indices = @transform_0, window_bounds = array<i64: 1, 8, 32>}, {transform_indices = @transform_1, window_bounds = array<i64: 1, 8, 16>}, {pipeline_mode = #tpu.pipeline_mode<synchronous>, transform_indices = @transform_2, window_bounds = array<i64: 1, 32>}, {pipeline_mode = #tpu.pipeline_mode<synchronous>, transform_indices = @transform_3, window_bounds = array<i64: 1, 32>}, {pipeline_mode = #tpu.pipeline_mode<synchronous>, transform_indices = @transform_4, window_bounds = array<i64: 32, 32>}, {pipeline_mode = #tpu.pipeline_mode<synchronous>, transform_indices = @transform_5, window_bounds = array<i64: 1, 32>}, {pipeline_mode = #tpu.pipeline_mode<synchronous>, transform_indices = @transform_6, window_bounds = array<i64: 16, 32>}, {pipeline_mode = #tpu.pipeline_mode<synchronous>, transform_indices = @transform_7, window_bounds = array<i64: 1, 32>}, {pipeline_mode = #tpu.pipeline_mode<synchronous>, transform_indices = @transform_8, window_bounds = array<i64: 16, 32>}, {pipeline_mode = #tpu.pipeline_mode<synchronous>, transform_indices = @transform_9, window_bounds = array<i64: 1, 32>}, {pipeline_mode = #tpu.pipeline_mode<synchronous>, transform_indices = @transform_10, window_bounds = array<i64: 32, 32>}, {pipeline_mode = #tpu.pipeline_mode<synchronous>, transform_indices = @transform_11, window_bounds = array<i64: 1, 32>}, {pipeline_mode = #tpu.pipeline_mode<synchronous>, transform_indices = @transform_12, window_bounds = array<i64: 1, 32>}, {pipeline_mode = #tpu.pipeline_mode<synchronous>, transform_indices = @transform_13, window_bounds = array<i64: 1, 32>}, {pipeline_mode = #tpu.pipeline_mode<synchronous>, transform_indices = @transform_14, window_bounds = array<i64: 32, 128>}, {pipeline_mode = #tpu.pipeline_mode<synchronous>, transform_indices = @transform_15, window_bounds = array<i64: 1, 128>}, {pipeline_mode = #tpu.pipeline_mode<synchronous>, transform_indices = @transform_16, window_bounds = array<i64: 128, 32>}, {pipeline_mode = #tpu.pipeline_mode<synchronous>, transform_indices = @transform_17, window_bounds = array<i64: 1, 32>}, {transform_indices = @transform_18, window_bounds = array<i64: 1, 8, 32>}]} {
    %c0 = arith.constant 0 : index
    %c0_0 = arith.constant 0 : index
    %c0_1 = arith.constant 0 : index
    %0 = vector.load %arg1[%c0, %c0_0, %c0_1] : memref<1x8x32xf32, #tpu.memory_space<vmem>>, vector<1x8x32xf32>
    %1 = vector.shape_cast %0 : vector<1x8x32xf32> to vector<8x32xf32>
    %c0_2 = arith.constant 0 : index
    %c0_3 = arith.constant 0 : index
    %c0_4 = arith.constant 0 : index
    %2 = vector.load %arg2[%c0_2, %c0_3, %c0_4] : memref<1x8x16xf32, #tpu.memory_space<vmem>>, vector<1x8x16xf32>
    %3 = vector.shape_cast %2 : vector<1x8x16xf32> to vector<8x16xf32>
    %c0_5 = arith.constant 0 : index
    %c0_6 = arith.constant 0 : index
    %4 = vector.load %arg3[%c0_5, %c0_6] : memref<1x32xf32, #tpu.memory_space<vmem>>, vector<1x32xf32>
    %c0_7 = arith.constant 0 : index
    %c0_8 = arith.constant 0 : index
    %5 = vector.load %arg4[%c0_7, %c0_8] : memref<1x32xf32, #tpu.memory_space<vmem>>, vector<1x32xf32>
    %cst = arith.constant dense<0.000000e+00> : vector<8xf32>
    %6 = vector.multi_reduction <add>, %1, %cst [1] : vector<8x32xf32> to vector<8xf32>
    %7 = vector.shape_cast %6 : vector<8xf32> to vector<8x1xf32>
    %cst_9 = arith.constant 3.200000e+01 : f32
    %8 = vector.broadcast %cst_9 : f32 to vector<8x1xf32>
    %9 = arith.divf %7, %8 : vector<8x1xf32>
    %10 = vector.broadcast %9 : vector<8x1xf32> to vector<8x32xf32>
    %11 = arith.subf %1, %10 : vector<8x32xf32>
    %12 = arith.mulf %11, %11 : vector<8x32xf32>
    %cst_10 = arith.constant dense<0.000000e+00> : vector<8xf32>
    %13 = vector.multi_reduction <add>, %12, %cst_10 [1] : vector<8x32xf32> to vector<8xf32>
    %14 = vector.shape_cast %13 : vector<8xf32> to vector<8x1xf32>
    %cst_11 = arith.constant 3.200000e+01 : f32
    %15 = vector.broadcast %cst_11 : f32 to vector<8x1xf32>
    %16 = arith.divf %14, %15 : vector<8x1xf32>
    %17 = vector.broadcast %9 : vector<8x1xf32> to vector<8x32xf32>
    %18 = arith.subf %1, %17 : vector<8x32xf32>
    %cst_12 = arith.constant 9.99999974E-6 : f32
    %19 = vector.broadcast %cst_12 : f32 to vector<8x1xf32>
    %20 = arith.addf %16, %19 : vector<8x1xf32>
    %21 = math.rsqrt %20 : vector<8x1xf32>
    %22 = vector.broadcast %21 : vector<8x1xf32> to vector<8x32xf32>
    %23 = arith.mulf %18, %22 : vector<8x32xf32>
    %24 = vector.broadcast %4 : vector<1x32xf32> to vector<8x32xf32>
    %25 = arith.mulf %23, %24 : vector<8x32xf32>
    %26 = vector.broadcast %5 : vector<1x32xf32> to vector<8x32xf32>
    %27 = arith.addf %25, %26 : vector<8x32xf32>
    %c0_13 = arith.constant 0 : index
    %c0_14 = arith.constant 0 : index
    %28 = vector.load %arg5[%c0_13, %c0_14] : memref<32x32xf32, #tpu.memory_space<vmem>>, vector<32x32xf32>
    %cst_15 = arith.constant dense<0.000000e+00> : vector<8x32xf32>
    %29 = tpu.matmul %27, %28, %cst_15 {dimension_numbers = #tpu.dot_dimension_numbers<[1], [0], [0], [1], [0, 0, 1, 1], [], []>} : vector<8x32xf32>, vector<32x32xf32>, vector<8x32xf32> -> vector<8x32xf32>
    %c0_16 = arith.constant 0 : index
    %c0_17 = arith.constant 0 : index
    %30 = vector.load %arg6[%c0_16, %c0_17] : memref<1x32xf32, #tpu.memory_space<vmem>>, vector<1x32xf32>
    %31 = vector.broadcast %30 : vector<1x32xf32> to vector<8x32xf32>
    %32 = arith.addf %29, %31 : vector<8x32xf32>
    %cst_18 = arith.constant 0.353553385 : f32
    %33 = vector.broadcast %cst_18 : f32 to vector<8x32xf32>
    %34 = arith.mulf %32, %33 : vector<8x32xf32>
    %c0_19 = arith.constant 0 : index
    %c0_20 = arith.constant 0 : index
    %35 = vector.load %arg7[%c0_19, %c0_20] : memref<16x32xf32, #tpu.memory_space<vmem>>, vector<16x32xf32>
    %cst_21 = arith.constant dense<0.000000e+00> : vector<8x32xf32>
    %36 = tpu.matmul %3, %35, %cst_21 {dimension_numbers = #tpu.dot_dimension_numbers<[1], [0], [0], [1], [0, 0, 1, 1], [], []>} : vector<8x16xf32>, vector<16x32xf32>, vector<8x32xf32> -> vector<8x32xf32>
    %c0_22 = arith.constant 0 : index
    %c0_23 = arith.constant 0 : index
    %37 = vector.load %arg8[%c0_22, %c0_23] : memref<1x32xf32, #tpu.memory_space<vmem>>, vector<1x32xf32>
    %38 = vector.broadcast %37 : vector<1x32xf32> to vector<8x32xf32>
    %39 = arith.addf %36, %38 : vector<8x32xf32>
    %c0_24 = arith.constant 0 : index
    %c0_25 = arith.constant 0 : index
    %40 = vector.load %arg9[%c0_24, %c0_25] : memref<16x32xf32, #tpu.memory_space<vmem>>, vector<16x32xf32>
    %cst_26 = arith.constant dense<0.000000e+00> : vector<8x32xf32>
    %41 = tpu.matmul %3, %40, %cst_26 {dimension_numbers = #tpu.dot_dimension_numbers<[1], [0], [0], [1], [0, 0, 1, 1], [], []>} : vector<8x16xf32>, vector<16x32xf32>, vector<8x32xf32> -> vector<8x32xf32>
    %c0_27 = arith.constant 0 : index
    %c0_28 = arith.constant 0 : index
    %42 = vector.load %arg10[%c0_27, %c0_28] : memref<1x32xf32, #tpu.memory_space<vmem>>, vector<1x32xf32>
    %43 = vector.broadcast %42 : vector<1x32xf32> to vector<8x32xf32>
    %44 = arith.addf %41, %43 : vector<8x32xf32>
    %45 = vector.shape_cast %34 : vector<8x32xf32> to vector<8x4x8xf32>
    %46 = tpu.transpose %45, [1, 0, 2] : vector<8x4x8xf32> -> vector<4x8x8xf32>
    %47 = vector.shape_cast %39 : vector<8x32xf32> to vector<8x4x8xf32>
    %48 = tpu.transpose %47, [1, 0, 2] : vector<8x4x8xf32> -> vector<4x8x8xf32>
    %49 = vector.shape_cast %44 : vector<8x32xf32> to vector<8x4x8xf32>
    %50 = tpu.transpose %49, [1, 0, 2] : vector<8x4x8xf32> -> vector<4x8x8xf32>
    "tpu.trace_start"() <{level = 10 : i32, message = "hqd,hkd->hqk"}> : () -> ()
    %cst_29 = arith.constant dense<0.000000e+00> : vector<4x8x8xf32>
    %51 = tpu.matmul %46, %48, %cst_29 {dimension_numbers = #tpu.dot_dimension_numbers<[2], [2], [1], [1], [0, 0, 0, 1, 1, 1], [0], [0]>} : vector<4x8x8xf32>, vector<4x8x8xf32>, vector<4x8x8xf32> -> vector<4x8x8xf32>
    "tpu.trace_stop"() : () -> ()
    %cst_30 = arith.constant dense<0xFF800000> : vector<4x8xf32>
    %52 = vector.multi_reduction <maximumf>, %51, %cst_30 [2] : vector<4x8x8xf32> to vector<4x8xf32>
    %53 = vector.shape_cast %52 : vector<4x8xf32> to vector<4x8x1xf32>
    %54 = vector.broadcast %53 : vector<4x8x1xf32> to vector<4x8x8xf32>
    %55 = arith.subf %51, %54 : vector<4x8x8xf32>
    %56 = math.exp %55 : vector<4x8x8xf32>
    %cst_31 = arith.constant dense<0.000000e+00> : vector<4x8xf32>
    %57 = vector.multi_reduction <add>, %56, %cst_31 [2] : vector<4x8x8xf32> to vector<4x8xf32>
    %58 = vector.shape_cast %57 : vector<4x8xf32> to vector<4x8x1xf32>
    %59 = vector.broadcast %58 : vector<4x8x1xf32> to vector<4x8x8xf32>
    %60 = arith.divf %56, %59 : vector<4x8x8xf32>
    "tpu.trace_start"() <{level = 10 : i32, message = "hqk,hkd->hqd"}> : () -> ()
    %cst_32 = arith.constant dense<0.000000e+00> : vector<4x8x8xf32>
    %61 = tpu.matmul %60, %50, %cst_32 {dimension_numbers = #tpu.dot_dimension_numbers<[2], [1], [1], [2], [0, 0, 0, 1, 1, 2], [0], [0]>} : vector<4x8x8xf32>, vector<4x8x8xf32>, vector<4x8x8xf32> -> vector<4x8x8xf32>
    "tpu.trace_stop"() : () -> ()
    %62 = tpu.transpose %61, [1, 0, 2] : vector<4x8x8xf32> -> vector<8x4x8xf32>
    %63 = vector.shape_cast %62 : vector<8x4x8xf32> to vector<8x32xf32>
    %c0_33 = arith.constant 0 : index
    %c0_34 = arith.constant 0 : index
    %64 = vector.load %arg11[%c0_33, %c0_34] : memref<32x32xf32, #tpu.memory_space<vmem>>, vector<32x32xf32>
    %cst_35 = arith.constant dense<0.000000e+00> : vector<8x32xf32>
    %65 = tpu.matmul %63, %64, %cst_35 {dimension_numbers = #tpu.dot_dimension_numbers<[1], [0], [0], [1], [0, 0, 1, 1], [], []>} : vector<8x32xf32>, vector<32x32xf32>, vector<8x32xf32> -> vector<8x32xf32>
    %c0_36 = arith.constant 0 : index
    %c0_37 = arith.constant 0 : index
    %66 = vector.load %arg12[%c0_36, %c0_37] : memref<1x32xf32, #tpu.memory_space<vmem>>, vector<1x32xf32>
    %67 = vector.broadcast %66 : vector<1x32xf32> to vector<8x32xf32>
    %68 = arith.addf %65, %67 : vector<8x32xf32>
    %69 = arith.addf %1, %68 : vector<8x32xf32>
    %c0_38 = arith.constant 0 : index
    %c0_39 = arith.constant 0 : index
    %70 = vector.load %arg13[%c0_38, %c0_39] : memref<1x32xf32, #tpu.memory_space<vmem>>, vector<1x32xf32>
    %c0_40 = arith.constant 0 : index
    %c0_41 = arith.constant 0 : index
    %71 = vector.load %arg14[%c0_40, %c0_41] : memref<1x32xf32, #tpu.memory_space<vmem>>, vector<1x32xf32>
    %cst_42 = arith.constant dense<0.000000e+00> : vector<8xf32>
    %72 = vector.multi_reduction <add>, %69, %cst_42 [1] : vector<8x32xf32> to vector<8xf32>
    %73 = vector.shape_cast %72 : vector<8xf32> to vector<8x1xf32>
    %cst_43 = arith.constant 3.200000e+01 : f32
    %74 = vector.broadcast %cst_43 : f32 to vector<8x1xf32>
    %75 = arith.divf %73, %74 : vector<8x1xf32>
    %76 = vector.broadcast %75 : vector<8x1xf32> to vector<8x32xf32>
    %77 = arith.subf %69, %76 : vector<8x32xf32>
    %78 = arith.mulf %77, %77 : vector<8x32xf32>
    %cst_44 = arith.constant dense<0.000000e+00> : vector<8xf32>
    %79 = vector.multi_reduction <add>, %78, %cst_44 [1] : vector<8x32xf32> to vector<8xf32>
    %80 = vector.shape_cast %79 : vector<8xf32> to vector<8x1xf32>
    %cst_45 = arith.constant 3.200000e+01 : f32
    %81 = vector.broadcast %cst_45 : f32 to vector<8x1xf32>
    %82 = arith.divf %80, %81 : vector<8x1xf32>
    %83 = vector.broadcast %75 : vector<8x1xf32> to vector<8x32xf32>
    %84 = arith.subf %69, %83 : vector<8x32xf32>
    %cst_46 = arith.constant 9.99999974E-6 : f32
    %85 = vector.broadcast %cst_46 : f32 to vector<8x1xf32>
    %86 = arith.addf %82, %85 : vector<8x1xf32>
    %87 = math.rsqrt %86 : vector<8x1xf32>
    %88 = vector.broadcast %87 : vector<8x1xf32> to vector<8x32xf32>
    %89 = arith.mulf %84, %88 : vector<8x32xf32>
    %90 = vector.broadcast %70 : vector<1x32xf32> to vector<8x32xf32>
    %91 = arith.mulf %89, %90 : vector<8x32xf32>
    %92 = vector.broadcast %71 : vector<1x32xf32> to vector<8x32xf32>
    %93 = arith.addf %91, %92 : vector<8x32xf32>
    %c0_47 = arith.constant 0 : index
    %c0_48 = arith.constant 0 : index
    %94 = vector.load %arg15[%c0_47, %c0_48] : memref<32x128xf32, #tpu.memory_space<vmem>>, vector<32x128xf32>
    %cst_49 = arith.constant dense<0.000000e+00> : vector<8x128xf32>
    %95 = tpu.matmul %93, %94, %cst_49 {dimension_numbers = #tpu.dot_dimension_numbers<[1], [0], [0], [1], [0, 0, 1, 1], [], []>} : vector<8x32xf32>, vector<32x128xf32>, vector<8x128xf32> -> vector<8x128xf32>
    %c0_50 = arith.constant 0 : index
    %c0_51 = arith.constant 0 : index
    %96 = vector.load %arg16[%c0_50, %c0_51] : memref<1x128xf32, #tpu.memory_space<vmem>>, vector<1x128xf32>
    %97 = vector.broadcast %96 : vector<1x128xf32> to vector<8x128xf32>
    %98 = arith.addf %95, %97 : vector<8x128xf32>
    %cst_52 = arith.constant 5.000000e-01 : f32
    %99 = vector.broadcast %cst_52 : f32 to vector<8x128xf32>
    %100 = arith.mulf %99, %98 : vector<8x128xf32>
    %cst_53 = arith.constant 0.707106769 : f32
    %101 = vector.broadcast %cst_53 : f32 to vector<8x128xf32>
    %102 = arith.mulf %98, %101 : vector<8x128xf32>
    %103 = math.absf %102 : vector<8x128xf32>
    %cst_54 = arith.constant 0.327591091 : f32
    %104 = vector.broadcast %cst_54 : f32 to vector<8x128xf32>
    %105 = arith.mulf %104, %103 : vector<8x128xf32>
    %cst_55 = arith.constant 1.000000e+00 : f32
    %106 = vector.broadcast %cst_55 : f32 to vector<8x128xf32>
    %107 = arith.addf %106, %105 : vector<8x128xf32>
    %cst_56 = arith.constant 1.000000e+00 : f32
    %108 = vector.broadcast %cst_56 : f32 to vector<8x128xf32>
    %109 = arith.divf %108, %107 : vector<8x128xf32>
    %cst_57 = arith.constant 1.06140542 : f32
    %110 = vector.broadcast %cst_57 : f32 to vector<8x128xf32>
    %111 = arith.mulf %110, %109 : vector<8x128xf32>
    %cst_58 = arith.constant -1.45315206 : f32
    %112 = vector.broadcast %cst_58 : f32 to vector<8x128xf32>
    %113 = arith.addf %111, %112 : vector<8x128xf32>
    %114 = arith.mulf %113, %109 : vector<8x128xf32>
    %cst_59 = arith.constant 1.42141378 : f32
    %115 = vector.broadcast %cst_59 : f32 to vector<8x128xf32>
    %116 = arith.addf %114, %115 : vector<8x128xf32>
    %117 = arith.mulf %116, %109 : vector<8x128xf32>
    %cst_60 = arith.constant -0.284496725 : f32
    %118 = vector.broadcast %cst_60 : f32 to vector<8x128xf32>
    %119 = arith.addf %117, %118 : vector<8x128xf32>
    %120 = arith.mulf %119, %109 : vector<8x128xf32>
    %cst_61 = arith.constant 0.254829586 : f32
    %121 = vector.broadcast %cst_61 : f32 to vector<8x128xf32>
    %122 = arith.addf %120, %121 : vector<8x128xf32>
    %123 = arith.mulf %122, %109 : vector<8x128xf32>
    %124 = arith.mulf %103, %103 : vector<8x128xf32>
    %cst_62 = arith.constant 0.000000e+00 : f32
    %125 = vector.broadcast %cst_62 : f32 to vector<8x128xf32>
    %126 = arith.subf %125, %124 : vector<8x128xf32>
    %127 = math.exp %126 : vector<8x128xf32>
    %128 = arith.mulf %123, %127 : vector<8x128xf32>
    %cst_63 = arith.constant 1.000000e+00 : f32
    %129 = vector.broadcast %cst_63 : f32 to vector<8x128xf32>
    %130 = arith.subf %129, %128 : vector<8x128xf32>
    %cst_64 = arith.constant 0.000000e+00 : f32
    %131 = vector.broadcast %cst_64 : f32 to vector<8x128xf32>
    %132 = arith.cmpf olt, %102, %131 : vector<8x128xf32>
    %cst_65 = arith.constant 0.000000e+00 : f32
    %133 = vector.broadcast %cst_65 : f32 to vector<8x128xf32>
    %134 = arith.subf %133, %130 : vector<8x128xf32>
    %135 = arith.select %132, %134, %130 : vector<8x128xi1>, vector<8x128xf32>
    %cst_66 = arith.constant 1.000000e+00 : f32
    %136 = vector.broadcast %cst_66 : f32 to vector<8x128xf32>
    %137 = arith.addf %136, %135 : vector<8x128xf32>
    %138 = arith.mulf %100, %137 : vector<8x128xf32>
    %c0_67 = arith.constant 0 : index
    %c0_68 = arith.constant 0 : index
    %139 = vector.load %arg17[%c0_67, %c0_68] : memref<128x32xf32, #tpu.memory_space<vmem>>, vector<128x32xf32>
    %cst_69 = arith.constant dense<0.000000e+00> : vector<8x32xf32>
    %140 = tpu.matmul %138, %139, %cst_69 {dimension_numbers = #tpu.dot_dimension_numbers<[1], [0], [0], [1], [0, 0, 1, 1], [], []>} : vector<8x128xf32>, vector<128x32xf32>, vector<8x32xf32> -> vector<8x32xf32>
    %c0_70 = arith.constant 0 : index
    %c0_71 = arith.constant 0 : index
    %141 = vector.load %arg18[%c0_70, %c0_71] : memref<1x32xf32, #tpu.memory_space<vmem>>, vector<1x32xf32>
    %142 = vector.broadcast %141 : vector<1x32xf32> to vector<8x32xf32>
    %143 = arith.addf %140, %142 : vector<8x32xf32>
    %144 = arith.addf %69, %143 : vector<8x32xf32>
    %c0_72 = arith.constant 0 : index
    %c0_73 = arith.constant 0 : index
    %c0_74 = arith.constant 0 : index
    %145 = vector.load %arg19[%c0_72, %c0_73, %c0_74] : memref<1x8x32xf32, #tpu.memory_space<vmem>>, vector<1x8x32xf32>
    %146 = vector.shape_cast %145 : vector<1x8x32xf32> to vector<8x32xf32>
    %147 = vector.shape_cast %144 : vector<8x32xf32> to vector<1x8x32xf32>
    tpu.vector_store %arg19[%c0_72, %c0_73, %c0_74], %147 {strides = array<i32>} : memref<1x8x32xf32, #tpu.memory_space<vmem>>, vector<1x8x32xf32>,
    return
  }
  func.func @transform_0(%arg0: i32) -> (i32, i32, i32) {
    %c0_i32 = arith.constant 0 : i32
    %c0_i32_0 = arith.constant 0 : i32
    %c0_i32_1 = arith.constant 0 : i32
    return %arg0, %c0_i32, %c0_i32_0 : i32, i32, i32
  }
  func.func @transform_1(%arg0: i32) -> (i32, i32, i32) {
    %c0_i32 = arith.constant 0 : i32
    %c0_i32_0 = arith.constant 0 : i32
    %c0_i32_1 = arith.constant 0 : i32
    return %arg0, %c0_i32, %c0_i32_0 : i32, i32, i32
  }
  func.func @transform_2(%arg0: i32) -> (i32, i32) {
    %c0_i32 = arith.constant 0 : i32
    %c0_i32_0 = arith.constant 0 : i32
    %c0_i32_1 = arith.constant 0 : i32
    return %c0_i32, %c0_i32_0 : i32, i32
  }
  func.func @transform_3(%arg0: i32) -> (i32, i32) {
    %c0_i32 = arith.constant 0 : i32
    %c0_i32_0 = arith.constant 0 : i32
    %c0_i32_1 = arith.constant 0 : i32
    return %c0_i32, %c0_i32_0 : i32, i32
  }
  func.func @transform_4(%arg0: i32) -> (i32, i32) {
    %c0_i32 = arith.constant 0 : i32
    %c0_i32_0 = arith.constant 0 : i32
    %c0_i32_1 = arith.constant 0 : i32
    return %c0_i32, %c0_i32_0 : i32, i32
  }
  func.func @transform_5(%arg0: i32) -> (i32, i32) {
    %c0_i32 = arith.constant 0 : i32
    %c0_i32_0 = arith.constant 0 : i32
    %c0_i32_1 = arith.constant 0 : i32
    return %c0_i32, %c0_i32_0 : i32, i32
  }
  func.func @transform_6(%arg0: i32) -> (i32, i32) {
    %c0_i32 = arith.constant 0 : i32
    %c0_i32_0 = arith.constant 0 : i32
    %c0_i32_1 = arith.constant 0 : i32
    return %c0_i32, %c0_i32_0 : i32, i32
  }
  func.func @transform_7(%arg0: i32) -> (i32, i32) {
    %c0_i32 = arith.constant 0 : i32
    %c0_i32_0 = arith.constant 0 : i32
    %c0_i32_1 = arith.constant 0 : i32
    return %c0_i32, %c0_i32_0 : i32, i32
  }
  func.func @transform_8(%arg0: i32) -> (i32, i32) {
    %c0_i32 = arith.constant 0 : i32
    %c0_i32_0 = arith.constant 0 : i32
    %c0_i32_1 = arith.constant 0 : i32
    return %c0_i32, %c0_i32_0 : i32, i32
  }
  func.func @transform_9(%arg0: i32) -> (i32, i32) {
    %c0_i32 = arith.constant 0 : i32
    %c0_i32_0 = arith.constant 0 : i32
    %c0_i32_1 = arith.constant 0 : i32
    return %c0_i32, %c0_i32_0 : i32, i32
  }
  func.func @transform_10(%arg0: i32) -> (i32, i32) {
    %c0_i32 = arith.constant 0 : i32
    %c0_i32_0 = arith.constant 0 : i32
    %c0_i32_1 = arith.constant 0 : i32
    return %c0_i32, %c0_i32_0 : i32, i32
  }
  func.func @transform_11(%arg0: i32) -> (i32, i32) {
    %c0_i32 = arith.constant 0 : i32
    %c0_i32_0 = arith.constant 0 : i32
    %c0_i32_1 = arith.constant 0 : i32
    return %c0_i32, %c0_i32_0 : i32, i32
  }
  func.func @transform_12(%arg0: i32) -> (i32, i32) {
    %c0_i32 = arith.constant 0 : i32
    %c0_i32_0 = arith.constant 0 : i32
    %c0_i32_1 = arith.constant 0 : i32
    return %c0_i32, %c0_i32_0 : i32, i32
  }
  func.func @transform_13(%arg0: i32) -> (i32, i32) {
    %c0_i32 = arith.constant 0 : i32
    %c0_i32_0 = arith.constant 0 : i32
    %c0_i32_1 = arith.constant 0 : i32
    return %c0_i32, %c0_i32_0 : i32, i32
  }
  func.func @transform_14(%arg0: i32) -> (i32, i32) {
    %c0_i32 = arith.constant 0 : i32
    %c0_i32_0 = arith.constant 0 : i32
    %c0_i32_1 = arith.constant 0 : i32
    return %c0_i32, %c0_i32_0 : i32, i32
  }
  func.func @transform_15(%arg0: i32) -> (i32, i32) {
    %c0_i32 = arith.constant 0 : i32
    %c0_i32_0 = arith.constant 0 : i32
    %c0_i32_1 = arith.constant 0 : i32
    return %c0_i32, %c0_i32_0 : i32, i32
  }
  func.func @transform_16(%arg0: i32) -> (i32, i32) {
    %c0_i32 = arith.constant 0 : i32
    %c0_i32_0 = arith.constant 0 : i32
    %c0_i32_1 = arith.constant 0 : i32
    return %c0_i32, %c0_i32_0 : i32, i32
  }
  func.func @transform_17(%arg0: i32) -> (i32, i32) {
    %c0_i32 = arith.constant 0 : i32
    %c0_i32_0 = arith.constant 0 : i32
    %c0_i32_1 = arith.constant 0 : i32
    return %c0_i32, %c0_i32_0 : i32, i32
  }
  func.func @transform_18(%arg0: i32) -> (i32, i32, i32) {
    %c0_i32 = arith.constant 0 : i32
    %c0_i32_0 = arith.constant 0 : i32
    %c0_i32_1 = arith.constant 0 : i32
    return %arg0, %c0_i32, %c0_i32_0 : i32, i32, i32
  }
}

module attributes {stable_mosaic.version = 11 : i64} {
  func.func @fused_block_kernel(%arg0: i32, %arg1: memref<1x8x32xf32, #tpu.memory_space<vmem>>, %arg2: memref<1x8x32xf32, #tpu.memory_space<vmem>>, %arg3: memref<1x4x8x8xf32, #tpu.memory_space<vmem>>, %arg4: memref<1x32xf32, #tpu.memory_space<vmem>>, %arg5: memref<1x32xf32, #tpu.memory_space<vmem>>, %arg6: memref<32x32xf32, #tpu.memory_space<vmem>>, %arg7: memref<1x32xf32, #tpu.memory_space<vmem>>, %arg8: memref<32x32xf32, #tpu.memory_space<vmem>>, %arg9: memref<1x32xf32, #tpu.memory_space<vmem>>, %arg10: memref<32x32xf32, #tpu.memory_space<vmem>>, %arg11: memref<1x32xf32, #tpu.memory_space<vmem>>, %arg12: memref<32x32xf32, #tpu.memory_space<vmem>>, %arg13: memref<1x32xf32, #tpu.memory_space<vmem>>, %arg14: memref<1x32xf32, #tpu.memory_space<vmem>>, %arg15: memref<1x32xf32, #tpu.memory_space<vmem>>, %arg16: memref<32x128xf32, #tpu.memory_space<vmem>>, %arg17: memref<1x128xf32, #tpu.memory_space<vmem>>, %arg18: memref<128x32xf32, #tpu.memory_space<vmem>>, %arg19: memref<1x32xf32, #tpu.memory_space<vmem>>, %arg20: memref<1x8x32xf32, #tpu.memory_space<vmem>>) attributes {dimension_semantics = [#tpu.dimension_semantics<parallel>], iteration_bounds = array<i64: 2>, scalar_prefetch = 0 : i64, scratch_operands = 0 : i64, tpu.core_type = #tpu.core_type<tc>, window_params = [{transform_indices = @transform_0, window_bounds = array<i64: 1, 8, 32>}, {transform_indices = @transform_1, window_bounds = array<i64: 1, 8, 32>}, {transform_indices = @transform_2, window_bounds = array<i64: 1, 4, 8, 8>}, {pipeline_mode = #tpu.pipeline_mode<synchronous>, transform_indices = @transform_3, window_bounds = array<i64: 1, 32>}, {pipeline_mode = #tpu.pipeline_mode<synchronous>, transform_indices = @transform_4, window_bounds = array<i64: 1, 32>}, {pipeline_mode = #tpu.pipeline_mode<synchronous>, transform_indices = @transform_5, window_bounds = array<i64: 32, 32>}, {pipeline_mode = #tpu.pipeline_mode<synchronous>, transform_indices = @transform_6, window_bounds = array<i64: 1, 32>}, {pipeline_mode = #tpu.pipeline_mode<synchronous>, transform_indices = @transform_7, window_bounds = array<i64: 32, 32>}, {pipeline_mode = #tpu.pipeline_mode<synchronous>, transform_indices = @transform_8, window_bounds = array<i64: 1, 32>}, {pipeline_mode = #tpu.pipeline_mode<synchronous>, transform_indices = @transform_9, window_bounds = array<i64: 32, 32>}, {pipeline_mode = #tpu.pipeline_mode<synchronous>, transform_indices = @transform_10, window_bounds = array<i64: 1, 32>}, {pipeline_mode = #tpu.pipeline_mode<synchronous>, transform_indices = @transform_11, window_bounds = array<i64: 32, 32>}, {pipeline_mode = #tpu.pipeline_mode<synchronous>, transform_indices = @transform_12, window_bounds = array<i64: 1, 32>}, {pipeline_mode = #tpu.pipeline_mode<synchronous>, transform_indices = @transform_13, window_bounds = array<i64: 1, 32>}, {pipeline_mode = #tpu.pipeline_mode<synchronous>, transform_indices = @transform_14, window_bounds = array<i64: 1, 32>}, {pipeline_mode = #tpu.pipeline_mode<synchronous>, transform_indices = @transform_15, window_bounds = array<i64: 32, 128>}, {pipeline_mode = #tpu.pipeline_mode<synchronous>, transform_indices = @transform_16, window_bounds = array<i64: 1, 128>}, {pipeline_mode = #tpu.pipeline_mode<synchronous>, transform_indices = @transform_17, window_bounds = array<i64: 128, 32>}, {pipeline_mode = #tpu.pipeline_mode<synchronous>, transform_indices = @transform_18, window_bounds = array<i64: 1, 32>}, {transform_indices = @transform_19, window_bounds = array<i64: 1, 8, 32>}]} {
    %c0 = arith.constant 0 : index
    %c0_0 = arith.constant 0 : index
    %c0_1 = arith.constant 0 : index
    %0 = vector.load %arg1[%c0, %c0_0, %c0_1] : memref<1x8x32xf32, #tpu.memory_space<vmem>>, vector<1x8x32xf32>
    %1 = vector.shape_cast %0 : vector<1x8x32xf32> to vector<8x32xf32>
    %c0_2 = arith.constant 0 : index
    %c0_3 = arith.constant 0 : index
    %c0_4 = arith.constant 0 : index
    %2 = vector.load %arg2[%c0_2, %c0_3, %c0_4] : memref<1x8x32xf32, #tpu.memory_space<vmem>>, vector<1x8x32xf32>
    %3 = vector.shape_cast %2 : vector<1x8x32xf32> to vector<8x32xf32>
    %c0_5 = arith.constant 0 : index
    %c0_6 = arith.constant 0 : index
    %4 = vector.load %arg4[%c0_5, %c0_6] : memref<1x32xf32, #tpu.memory_space<vmem>>, vector<1x32xf32>
    %c0_7 = arith.constant 0 : index
    %c0_8 = arith.constant 0 : index
    %5 = vector.load %arg5[%c0_7, %c0_8] : memref<1x32xf32, #tpu.memory_space<vmem>>, vector<1x32xf32>
    %cst = arith.constant dense<0.000000e+00> : vector<8xf32>
    %6 = vector.multi_reduction <add>, %1, %cst [1] : vector<8x32xf32> to vector<8xf32>
    %7 = vector.shape_cast %6 : vector<8xf32> to vector<8x1xf32>
    %cst_9 = arith.constant 3.200000e+01 : f32
    %8 = vector.broadcast %cst_9 : f32 to vector<8x1xf32>
    %9 = arith.divf %7, %8 : vector<8x1xf32>
    %10 = vector.broadcast %9 : vector<8x1xf32> to vector<8x32xf32>
    %11 = arith.subf %1, %10 : vector<8x32xf32>
    %12 = arith.mulf %11, %11 : vector<8x32xf32>
    %cst_10 = arith.constant dense<0.000000e+00> : vector<8xf32>
    %13 = vector.multi_reduction <add>, %12, %cst_10 [1] : vector<8x32xf32> to vector<8xf32>
    %14 = vector.shape_cast %13 : vector<8xf32> to vector<8x1xf32>
    %cst_11 = arith.constant 3.200000e+01 : f32
    %15 = vector.broadcast %cst_11 : f32 to vector<8x1xf32>
    %16 = arith.divf %14, %15 : vector<8x1xf32>
    %17 = vector.broadcast %9 : vector<8x1xf32> to vector<8x32xf32>
    %18 = arith.subf %1, %17 : vector<8x32xf32>
    %cst_12 = arith.constant 9.99999974E-6 : f32
    %19 = vector.broadcast %cst_12 : f32 to vector<8x1xf32>
    %20 = arith.addf %16, %19 : vector<8x1xf32>
    %21 = math.rsqrt %20 : vector<8x1xf32>
    %22 = vector.broadcast %21 : vector<8x1xf32> to vector<8x32xf32>
    %23 = arith.mulf %18, %22 : vector<8x32xf32>
    %24 = vector.broadcast %4 : vector<1x32xf32> to vector<8x32xf32>
    %25 = arith.mulf %23, %24 : vector<8x32xf32>
    %26 = vector.broadcast %5 : vector<1x32xf32> to vector<8x32xf32>
    %27 = arith.addf %25, %26 : vector<8x32xf32>
    %c0_13 = arith.constant 0 : index
    %c0_14 = arith.constant 0 : index
    %28 = vector.load %arg6[%c0_13, %c0_14] : memref<32x32xf32, #tpu.memory_space<vmem>>, vector<32x32xf32>
    %cst_15 = arith.constant dense<0.000000e+00> : vector<8x32xf32>
    %29 = tpu.matmul %27, %28, %cst_15 {dimension_numbers = #tpu.dot_dimension_numbers<[1], [0], [0], [1], [0, 0, 1, 1], [], []>} : vector<8x32xf32>, vector<32x32xf32>, vector<8x32xf32> -> vector<8x32xf32>
    %c0_16 = arith.constant 0 : index
    %c0_17 = arith.constant 0 : index
    %30 = vector.load %arg7[%c0_16, %c0_17] : memref<1x32xf32, #tpu.memory_space<vmem>>, vector<1x32xf32>
    %31 = vector.broadcast %30 : vector<1x32xf32> to vector<8x32xf32>
    %32 = arith.addf %29, %31 : vector<8x32xf32>
    %cst_18 = arith.constant 0.353553385 : f32
    %33 = vector.broadcast %cst_18 : f32 to vector<8x32xf32>
    %34 = arith.mulf %32, %33 : vector<8x32xf32>
    %c0_19 = arith.constant 0 : index
    %c0_20 = arith.constant 0 : index
    %35 = vector.load %arg8[%c0_19, %c0_20] : memref<32x32xf32, #tpu.memory_space<vmem>>, vector<32x32xf32>
    %cst_21 = arith.constant dense<0.000000e+00> : vector<8x32xf32>
    %36 = tpu.matmul %3, %35, %cst_21 {dimension_numbers = #tpu.dot_dimension_numbers<[1], [0], [0], [1], [0, 0, 1, 1], [], []>} : vector<8x32xf32>, vector<32x32xf32>, vector<8x32xf32> -> vector<8x32xf32>
    %c0_22 = arith.constant 0 : index
    %c0_23 = arith.constant 0 : index
    %37 = vector.load %arg9[%c0_22, %c0_23] : memref<1x32xf32, #tpu.memory_space<vmem>>, vector<1x32xf32>
    %38 = vector.broadcast %37 : vector<1x32xf32> to vector<8x32xf32>
    %39 = arith.addf %36, %38 : vector<8x32xf32>
    %c0_24 = arith.constant 0 : index
    %c0_25 = arith.constant 0 : index
    %40 = vector.load %arg10[%c0_24, %c0_25] : memref<32x32xf32, #tpu.memory_space<vmem>>, vector<32x32xf32>
    %cst_26 = arith.constant dense<0.000000e+00> : vector<8x32xf32>
    %41 = tpu.matmul %3, %40, %cst_26 {dimension_numbers = #tpu.dot_dimension_numbers<[1], [0], [0], [1], [0, 0, 1, 1], [], []>} : vector<8x32xf32>, vector<32x32xf32>, vector<8x32xf32> -> vector<8x32xf32>
    %c0_27 = arith.constant 0 : index
    %c0_28 = arith.constant 0 : index
    %42 = vector.load %arg11[%c0_27, %c0_28] : memref<1x32xf32, #tpu.memory_space<vmem>>, vector<1x32xf32>
    %43 = vector.broadcast %42 : vector<1x32xf32> to vector<8x32xf32>
    %44 = arith.addf %41, %43 : vector<8x32xf32>
    %45 = vector.shape_cast %34 : vector<8x32xf32> to vector<8x4x8xf32>
    %46 = tpu.transpose %45, [1, 0, 2] : vector<8x4x8xf32> -> vector<4x8x8xf32>
    %47 = vector.shape_cast %39 : vector<8x32xf32> to vector<8x4x8xf32>
    %48 = tpu.transpose %47, [1, 0, 2] : vector<8x4x8xf32> -> vector<4x8x8xf32>
    %49 = vector.shape_cast %44 : vector<8x32xf32> to vector<8x4x8xf32>
    %50 = tpu.transpose %49, [1, 0, 2] : vector<8x4x8xf32> -> vector<4x8x8xf32>
    "tpu.trace_start"() <{level = 10 : i32, message = "hqd,hkd->hqk"}> : () -> ()
    %cst_29 = arith.constant dense<0.000000e+00> : vector<4x8x8xf32>
    %51 = tpu.matmul %46, %48, %cst_29 {dimension_numbers = #tpu.dot_dimension_numbers<[2], [2], [1], [1], [0, 0, 0, 1, 1, 1], [0], [0]>} : vector<4x8x8xf32>, vector<4x8x8xf32>, vector<4x8x8xf32> -> vector<4x8x8xf32>
    "tpu.trace_stop"() : () -> ()
    %c0_30 = arith.constant 0 : index
    %c0_31 = arith.constant 0 : index
    %c0_32 = arith.constant 0 : index
    %c0_33 = arith.constant 0 : index
    %52 = vector.load %arg3[%c0_30, %c0_31, %c0_32, %c0_33] : memref<1x4x8x8xf32, #tpu.memory_space<vmem>>, vector<1x4x8x8xf32>
    %53 = vector.shape_cast %52 : vector<1x4x8x8xf32> to vector<4x8x8xf32>
    %54 = arith.addf %51, %53 : vector<4x8x8xf32>
    %cst_34 = arith.constant dense<0xFF800000> : vector<4x8xf32>
    %55 = vector.multi_reduction <maximumf>, %54, %cst_34 [2] : vector<4x8x8xf32> to vector<4x8xf32>
    %56 = vector.shape_cast %55 : vector<4x8xf32> to vector<4x8x1xf32>
    %57 = vector.broadcast %56 : vector<4x8x1xf32> to vector<4x8x8xf32>
    %58 = arith.subf %54, %57 : vector<4x8x8xf32>
    %59 = math.exp %58 : vector<4x8x8xf32>
    %cst_35 = arith.constant dense<0.000000e+00> : vector<4x8xf32>
    %60 = vector.multi_reduction <add>, %59, %cst_35 [2] : vector<4x8x8xf32> to vector<4x8xf32>
    %61 = vector.shape_cast %60 : vector<4x8xf32> to vector<4x8x1xf32>
    %62 = vector.broadcast %61 : vector<4x8x1xf32> to vector<4x8x8xf32>
    %63 = arith.divf %59, %62 : vector<4x8x8xf32>
    "tpu.trace_start"() <{level = 10 : i32, message = "hqk,hkd->hqd"}> : () -> ()
    %cst_36 = arith.constant dense<0.000000e+00> : vector<4x8x8xf32>
    %64 = tpu.matmul %63, %50, %cst_36 {dimension_numbers = #tpu.dot_dimension_numbers<[2], [1], [1], [2], [0, 0, 0, 1, 1, 2], [0], [0]>} : vector<4x8x8xf32>, vector<4x8x8xf32>, vector<4x8x8xf32> -> vector<4x8x8xf32>
    "tpu.trace_stop"() : () -> ()
    %65 = tpu.transpose %64, [1, 0, 2] : vector<4x8x8xf32> -> vector<8x4x8xf32>
    %66 = vector.shape_cast %65 : vector<8x4x8xf32> to vector<8x32xf32>
    %c0_37 = arith.constant 0 : index
    %c0_38 = arith.constant 0 : index
    %67 = vector.load %arg12[%c0_37, %c0_38] : memref<32x32xf32, #tpu.memory_space<vmem>>, vector<32x32xf32>
    %cst_39 = arith.constant dense<0.000000e+00> : vector<8x32xf32>
    %68 = tpu.matmul %66, %67, %cst_39 {dimension_numbers = #tpu.dot_dimension_numbers<[1], [0], [0], [1], [0, 0, 1, 1], [], []>} : vector<8x32xf32>, vector<32x32xf32>, vector<8x32xf32> -> vector<8x32xf32>
    %c0_40 = arith.constant 0 : index
    %c0_41 = arith.constant 0 : index
    %69 = vector.load %arg13[%c0_40, %c0_41] : memref<1x32xf32, #tpu.memory_space<vmem>>, vector<1x32xf32>
    %70 = vector.broadcast %69 : vector<1x32xf32> to vector<8x32xf32>
    %71 = arith.addf %68, %70 : vector<8x32xf32>
    %72 = arith.addf %1, %71 : vector<8x32xf32>
    %c0_42 = arith.constant 0 : index
    %c0_43 = arith.constant 0 : index
    %73 = vector.load %arg14[%c0_42, %c0_43] : memref<1x32xf32, #tpu.memory_space<vmem>>, vector<1x32xf32>
    %c0_44 = arith.constant 0 : index
    %c0_45 = arith.constant 0 : index
    %74 = vector.load %arg15[%c0_44, %c0_45] : memref<1x32xf32, #tpu.memory_space<vmem>>, vector<1x32xf32>
    %cst_46 = arith.constant dense<0.000000e+00> : vector<8xf32>
    %75 = vector.multi_reduction <add>, %72, %cst_46 [1] : vector<8x32xf32> to vector<8xf32>
    %76 = vector.shape_cast %75 : vector<8xf32> to vector<8x1xf32>
    %cst_47 = arith.constant 3.200000e+01 : f32
    %77 = vector.broadcast %cst_47 : f32 to vector<8x1xf32>
    %78 = arith.divf %76, %77 : vector<8x1xf32>
    %79 = vector.broadcast %78 : vector<8x1xf32> to vector<8x32xf32>
    %80 = arith.subf %72, %79 : vector<8x32xf32>
    %81 = arith.mulf %80, %80 : vector<8x32xf32>
    %cst_48 = arith.constant dense<0.000000e+00> : vector<8xf32>
    %82 = vector.multi_reduction <add>, %81, %cst_48 [1] : vector<8x32xf32> to vector<8xf32>
    %83 = vector.shape_cast %82 : vector<8xf32> to vector<8x1xf32>
    %cst_49 = arith.constant 3.200000e+01 : f32
    %84 = vector.broadcast %cst_49 : f32 to vector<8x1xf32>
    %85 = arith.divf %83, %84 : vector<8x1xf32>
    %86 = vector.broadcast %78 : vector<8x1xf32> to vector<8x32xf32>
    %87 = arith.subf %72, %86 : vector<8x32xf32>
    %cst_50 = arith.constant 9.99999974E-6 : f32
    %88 = vector.broadcast %cst_50 : f32 to vector<8x1xf32>
    %89 = arith.addf %85, %88 : vector<8x1xf32>
    %90 = math.rsqrt %89 : vector<8x1xf32>
    %91 = vector.broadcast %90 : vector<8x1xf32> to vector<8x32xf32>
    %92 = arith.mulf %87, %91 : vector<8x32xf32>
    %93 = vector.broadcast %73 : vector<1x32xf32> to vector<8x32xf32>
    %94 = arith.mulf %92, %93 : vector<8x32xf32>
    %95 = vector.broadcast %74 : vector<1x32xf32> to vector<8x32xf32>
    %96 = arith.addf %94, %95 : vector<8x32xf32>
    %c0_51 = arith.constant 0 : index
    %c0_52 = arith.constant 0 : index
    %97 = vector.load %arg16[%c0_51, %c0_52] : memref<32x128xf32, #tpu.memory_space<vmem>>, vector<32x128xf32>
    %cst_53 = arith.constant dense<0.000000e+00> : vector<8x128xf32>
    %98 = tpu.matmul %96, %97, %cst_53 {dimension_numbers = #tpu.dot_dimension_numbers<[1], [0], [0], [1], [0, 0, 1, 1], [], []>} : vector<8x32xf32>, vector<32x128xf32>, vector<8x128xf32> -> vector<8x128xf32>
    %c0_54 = arith.constant 0 : index
    %c0_55 = arith.constant 0 : index
    %99 = vector.load %arg17[%c0_54, %c0_55] : memref<1x128xf32, #tpu.memory_space<vmem>>, vector<1x128xf32>
    %100 = vector.broadcast %99 : vector<1x128xf32> to vector<8x128xf32>
    %101 = arith.addf %98, %100 : vector<8x128xf32>
    %cst_56 = arith.constant 5.000000e-01 : f32
    %102 = vector.broadcast %cst_56 : f32 to vector<8x128xf32>
    %103 = arith.mulf %102, %101 : vector<8x128xf32>
    %cst_57 = arith.constant 0.707106769 : f32
    %104 = vector.broadcast %cst_57 : f32 to vector<8x128xf32>
    %105 = arith.mulf %101, %104 : vector<8x128xf32>
    %106 = math.absf %105 : vector<8x128xf32>
    %cst_58 = arith.constant 0.327591091 : f32
    %107 = vector.broadcast %cst_58 : f32 to vector<8x128xf32>
    %108 = arith.mulf %107, %106 : vector<8x128xf32>
    %cst_59 = arith.constant 1.000000e+00 : f32
    %109 = vector.broadcast %cst_59 : f32 to vector<8x128xf32>
    %110 = arith.addf %109, %108 : vector<8x128xf32>
    %cst_60 = arith.constant 1.000000e+00 : f32
    %111 = vector.broadcast %cst_60 : f32 to vector<8x128xf32>
    %112 = arith.divf %111, %110 : vector<8x128xf32>
    %cst_61 = arith.constant 1.06140542 : f32
    %113 = vector.broadcast %cst_61 : f32 to vector<8x128xf32>
    %114 = arith.mulf %113, %112 : vector<8x128xf32>
    %cst_62 = arith.constant -1.45315206 : f32
    %115 = vector.broadcast %cst_62 : f32 to vector<8x128xf32>
    %116 = arith.addf %114, %115 : vector<8x128xf32>
    %117 = arith.mulf %116, %112 : vector<8x128xf32>
    %cst_63 = arith.constant 1.42141378 : f32
    %118 = vector.broadcast %cst_63 : f32 to vector<8x128xf32>
    %119 = arith.addf %117, %118 : vector<8x128xf32>
    %120 = arith.mulf %119, %112 : vector<8x128xf32>
    %cst_64 = arith.constant -0.284496725 : f32
    %121 = vector.broadcast %cst_64 : f32 to vector<8x128xf32>
    %122 = arith.addf %120, %121 : vector<8x128xf32>
    %123 = arith.mulf %122, %112 : vector<8x128xf32>
    %cst_65 = arith.constant 0.254829586 : f32
    %124 = vector.broadcast %cst_65 : f32 to vector<8x128xf32>
    %125 = arith.addf %123, %124 : vector<8x128xf32>
    %126 = arith.mulf %125, %112 : vector<8x128xf32>
    %127 = arith.mulf %106, %106 : vector<8x128xf32>
    %cst_66 = arith.constant 0.000000e+00 : f32
    %128 = vector.broadcast %cst_66 : f32 to vector<8x128xf32>
    %129 = arith.subf %128, %127 : vector<8x128xf32>
    %130 = math.exp %129 : vector<8x128xf32>
    %131 = arith.mulf %126, %130 : vector<8x128xf32>
    %cst_67 = arith.constant 1.000000e+00 : f32
    %132 = vector.broadcast %cst_67 : f32 to vector<8x128xf32>
    %133 = arith.subf %132, %131 : vector<8x128xf32>
    %cst_68 = arith.constant 0.000000e+00 : f32
    %134 = vector.broadcast %cst_68 : f32 to vector<8x128xf32>
    %135 = arith.cmpf olt, %105, %134 : vector<8x128xf32>
    %cst_69 = arith.constant 0.000000e+00 : f32
    %136 = vector.broadcast %cst_69 : f32 to vector<8x128xf32>
    %137 = arith.subf %136, %133 : vector<8x128xf32>
    %138 = arith.select %135, %137, %133 : vector<8x128xi1>, vector<8x128xf32>
    %cst_70 = arith.constant 1.000000e+00 : f32
    %139 = vector.broadcast %cst_70 : f32 to vector<8x128xf32>
    %140 = arith.addf %139, %138 : vector<8x128xf32>
    %141 = arith.mulf %103, %140 : vector<8x128xf32>
    %c0_71 = arith.constant 0 : index
    %c0_72 = arith.constant 0 : index
    %142 = vector.load %arg18[%c0_71, %c0_72] : memref<128x32xf32, #tpu.memory_space<vmem>>, vector<128x32xf32>
    %cst_73 = arith.constant dense<0.000000e+00> : vector<8x32xf32>
    %143 = tpu.matmul %141, %142, %cst_73 {dimension_numbers = #tpu.dot_dimension_numbers<[1], [0], [0], [1], [0, 0, 1, 1], [], []>} : vector<8x128xf32>, vector<128x32xf32>, vector<8x32xf32> -> vector<8x32xf32>
    %c0_74 = arith.constant 0 : index
    %c0_75 = arith.constant 0 : index
    %144 = vector.load %arg19[%c0_74, %c0_75] : memref<1x32xf32, #tpu.memory_space<vmem>>, vector<1x32xf32>
    %145 = vector.broadcast %144 : vector<1x32xf32> to vector<8x32xf32>
    %146 = arith.addf %143, %145 : vector<8x32xf32>
    %147 = arith.addf %72, %146 : vector<8x32xf32>
    %c0_76 = arith.constant 0 : index
    %c0_77 = arith.constant 0 : index
    %c0_78 = arith.constant 0 : index
    %148 = vector.load %arg20[%c0_76, %c0_77, %c0_78] : memref<1x8x32xf32, #tpu.memory_space<vmem>>, vector<1x8x32xf32>
    %149 = vector.shape_cast %148 : vector<1x8x32xf32> to vector<8x32xf32>
    %150 = vector.shape_cast %147 : vector<8x32xf32> to vector<1x8x32xf32>
    tpu.vector_store %arg20[%c0_76, %c0_77, %c0_78], %150 {strides = array<i32>} : memref<1x8x32xf32, #tpu.memory_space<vmem>>, vector<1x8x32xf32>,
    return
  }
  func.func @transform_0(%arg0: i32) -> (i32, i32, i32) {
    %c0_i32 = arith.constant 0 : i32
    %c0_i32_0 = arith.constant 0 : i32
    %c0_i32_1 = arith.constant 0 : i32
    return %arg0, %c0_i32, %c0_i32_0 : i32, i32, i32
  }
  func.func @transform_1(%arg0: i32) -> (i32, i32, i32) {
    %c0_i32 = arith.constant 0 : i32
    %c0_i32_0 = arith.constant 0 : i32
    %c0_i32_1 = arith.constant 0 : i32
    return %arg0, %c0_i32, %c0_i32_0 : i32, i32, i32
  }
  func.func @transform_2(%arg0: i32) -> (i32, i32, i32, i32) {
    %c0_i32 = arith.constant 0 : i32
    %c0_i32_0 = arith.constant 0 : i32
    %c0_i32_1 = arith.constant 0 : i32
    %c0_i32_2 = arith.constant 0 : i32
    return %arg0, %c0_i32, %c0_i32_0, %c0_i32_1 : i32, i32, i32, i32
  }
  func.func @transform_3(%arg0: i32) -> (i32, i32) {
    %c0_i32 = arith.constant 0 : i32
    %c0_i32_0 = arith.constant 0 : i32
    %c0_i32_1 = arith.constant 0 : i32
    return %c0_i32, %c0_i32_0 : i32, i32
  }
  func.func @transform_4(%arg0: i32) -> (i32, i32) {
    %c0_i32 = arith.constant 0 : i32
    %c0_i32_0 = arith.constant 0 : i32
    %c0_i32_1 = arith.constant 0 : i32
    return %c0_i32, %c0_i32_0 : i32, i32
  }
  func.func @transform_5(%arg0: i32) -> (i32, i32) {
    %c0_i32 = arith.constant 0 : i32
    %c0_i32_0 = arith.constant 0 : i32
    %c0_i32_1 = arith.constant 0 : i32
    return %c0_i32, %c0_i32_0 : i32, i32
  }
  func.func @transform_6(%arg0: i32) -> (i32, i32) {
    %c0_i32 = arith.constant 0 : i32
    %c0_i32_0 = arith.constant 0 : i32
    %c0_i32_1 = arith.constant 0 : i32
    return %c0_i32, %c0_i32_0 : i32, i32
  }
  func.func @transform_7(%arg0: i32) -> (i32, i32) {
    %c0_i32 = arith.constant 0 : i32
    %c0_i32_0 = arith.constant 0 : i32
    %c0_i32_1 = arith.constant 0 : i32
    return %c0_i32, %c0_i32_0 : i32, i32
  }
  func.func @transform_8(%arg0: i32) -> (i32, i32) {
    %c0_i32 = arith.constant 0 : i32
    %c0_i32_0 = arith.constant 0 : i32
    %c0_i32_1 = arith.constant 0 : i32
    return %c0_i32, %c0_i32_0 : i32, i32
  }
  func.func @transform_9(%arg0: i32) -> (i32, i32) {
    %c0_i32 = arith.constant 0 : i32
    %c0_i32_0 = arith.constant 0 : i32
    %c0_i32_1 = arith.constant 0 : i32
    return %c0_i32, %c0_i32_0 : i32, i32
  }
  func.func @transform_10(%arg0: i32) -> (i32, i32) {
    %c0_i32 = arith.constant 0 : i32
    %c0_i32_0 = arith.constant 0 : i32
    %c0_i32_1 = arith.constant 0 : i32
    return %c0_i32, %c0_i32_0 : i32, i32
  }
  func.func @transform_11(%arg0: i32) -> (i32, i32) {
    %c0_i32 = arith.constant 0 : i32
    %c0_i32_0 = arith.constant 0 : i32
    %c0_i32_1 = arith.constant 0 : i32
    return %c0_i32, %c0_i32_0 : i32, i32
  }
  func.func @transform_12(%arg0: i32) -> (i32, i32) {
    %c0_i32 = arith.constant 0 : i32
    %c0_i32_0 = arith.constant 0 : i32
    %c0_i32_1 = arith.constant 0 : i32
    return %c0_i32, %c0_i32_0 : i32, i32
  }
  func.func @transform_13(%arg0: i32) -> (i32, i32) {
    %c0_i32 = arith.constant 0 : i32
    %c0_i32_0 = arith.constant 0 : i32
    %c0_i32_1 = arith.constant 0 : i32
    return %c0_i32, %c0_i32_0 : i32, i32
  }
  func.func @transform_14(%arg0: i32) -> (i32, i32) {
    %c0_i32 = arith.constant 0 : i32
    %c0_i32_0 = arith.constant 0 : i32
    %c0_i32_1 = arith.constant 0 : i32
    return %c0_i32, %c0_i32_0 : i32, i32
  }
  func.func @transform_15(%arg0: i32) -> (i32, i32) {
    %c0_i32 = arith.constant 0 : i32
    %c0_i32_0 = arith.constant 0 : i32
    %c0_i32_1 = arith.constant 0 : i32
    return %c0_i32, %c0_i32_0 : i32, i32
  }
  func.func @transform_16(%arg0: i32) -> (i32, i32) {
    %c0_i32 = arith.constant 0 : i32
    %c0_i32_0 = arith.constant 0 : i32
    %c0_i32_1 = arith.constant 0 : i32
    return %c0_i32, %c0_i32_0 : i32, i32
  }
  func.func @transform_17(%arg0: i32) -> (i32, i32) {
    %c0_i32 = arith.constant 0 : i32
    %c0_i32_0 = arith.constant 0 : i32
    %c0_i32_1 = arith.constant 0 : i32
    return %c0_i32, %c0_i32_0 : i32, i32
  }
  func.func @transform_18(%arg0: i32) -> (i32, i32) {
    %c0_i32 = arith.constant 0 : i32
    %c0_i32_0 = arith.constant 0 : i32
    %c0_i32_1 = arith.constant 0 : i32
    return %c0_i32, %c0_i32_0 : i32, i32
  }
  func.func @transform_19(%arg0: i32) -> (i32, i32, i32) {
    %c0_i32 = arith.constant 0 : i32
    %c0_i32_0 = arith.constant 0 : i32
    %c0_i32_1 = arith.constant 0 : i32
    return %arg0, %c0_i32, %c0_i32_0 : i32, i32, i32
  }
}

module attributes {stable_mosaic.version = 11 : i64} {
  func.func @fused_block_kernel(%arg0: i32, %arg1: memref<1x8x32xf32, #tpu.memory_space<vmem>>, %arg2: memref<1x8x32xf32, #tpu.memory_space<vmem>>, %arg3: memref<1x4x8x8xf32, #tpu.memory_space<vmem>>, %arg4: memref<1x32xf32, #tpu.memory_space<vmem>>, %arg5: memref<1x32xf32, #tpu.memory_space<vmem>>, %arg6: memref<32x32xf32, #tpu.memory_space<vmem>>, %arg7: memref<1x32xf32, #tpu.memory_space<vmem>>, %arg8: memref<32x32xf32, #tpu.memory_space<vmem>>, %arg9: memref<1x32xf32, #tpu.memory_space<vmem>>, %arg10: memref<32x32xf32, #tpu.memory_space<vmem>>, %arg11: memref<1x32xf32, #tpu.memory_space<vmem>>, %arg12: memref<32x32xf32, #tpu.memory_space<vmem>>, %arg13: memref<1x32xf32, #tpu.memory_space<vmem>>, %arg14: memref<1x32xf32, #tpu.memory_space<vmem>>, %arg15: memref<1x32xf32, #tpu.memory_space<vmem>>, %arg16: memref<32x128xf32, #tpu.memory_space<vmem>>, %arg17: memref<1x128xf32, #tpu.memory_space<vmem>>, %arg18: memref<128x32xf32, #tpu.memory_space<vmem>>, %arg19: memref<1x32xf32, #tpu.memory_space<vmem>>, %arg20: memref<1x8x32xf32, #tpu.memory_space<vmem>>) attributes {dimension_semantics = [#tpu.dimension_semantics<parallel>], iteration_bounds = array<i64: 2>, scalar_prefetch = 0 : i64, scratch_operands = 0 : i64, tpu.core_type = #tpu.core_type<tc>, window_params = [{transform_indices = @transform_0, window_bounds = array<i64: 1, 8, 32>}, {transform_indices = @transform_1, window_bounds = array<i64: 1, 8, 32>}, {transform_indices = @transform_2, window_bounds = array<i64: 1, 4, 8, 8>}, {pipeline_mode = #tpu.pipeline_mode<synchronous>, transform_indices = @transform_3, window_bounds = array<i64: 1, 32>}, {pipeline_mode = #tpu.pipeline_mode<synchronous>, transform_indices = @transform_4, window_bounds = array<i64: 1, 32>}, {pipeline_mode = #tpu.pipeline_mode<synchronous>, transform_indices = @transform_5, window_bounds = array<i64: 32, 32>}, {pipeline_mode = #tpu.pipeline_mode<synchronous>, transform_indices = @transform_6, window_bounds = array<i64: 1, 32>}, {pipeline_mode = #tpu.pipeline_mode<synchronous>, transform_indices = @transform_7, window_bounds = array<i64: 32, 32>}, {pipeline_mode = #tpu.pipeline_mode<synchronous>, transform_indices = @transform_8, window_bounds = array<i64: 1, 32>}, {pipeline_mode = #tpu.pipeline_mode<synchronous>, transform_indices = @transform_9, window_bounds = array<i64: 32, 32>}, {pipeline_mode = #tpu.pipeline_mode<synchronous>, transform_indices = @transform_10, window_bounds = array<i64: 1, 32>}, {pipeline_mode = #tpu.pipeline_mode<synchronous>, transform_indices = @transform_11, window_bounds = array<i64: 32, 32>}, {pipeline_mode = #tpu.pipeline_mode<synchronous>, transform_indices = @transform_12, window_bounds = array<i64: 1, 32>}, {pipeline_mode = #tpu.pipeline_mode<synchronous>, transform_indices = @transform_13, window_bounds = array<i64: 1, 32>}, {pipeline_mode = #tpu.pipeline_mode<synchronous>, transform_indices = @transform_14, window_bounds = array<i64: 1, 32>}, {pipeline_mode = #tpu.pipeline_mode<synchronous>, transform_indices = @transform_15, window_bounds = array<i64: 32, 128>}, {pipeline_mode = #tpu.pipeline_mode<synchronous>, transform_indices = @transform_16, window_bounds = array<i64: 1, 128>}, {pipeline_mode = #tpu.pipeline_mode<synchronous>, transform_indices = @transform_17, window_bounds = array<i64: 128, 32>}, {pipeline_mode = #tpu.pipeline_mode<synchronous>, transform_indices = @transform_18, window_bounds = array<i64: 1, 32>}, {transform_indices = @transform_19, window_bounds = array<i64: 1, 8, 32>}]} {
    %c0 = arith.constant 0 : index
    %c0_0 = arith.constant 0 : index
    %c0_1 = arith.constant 0 : index
    %0 = vector.load %arg1[%c0, %c0_0, %c0_1] : memref<1x8x32xf32, #tpu.memory_space<vmem>>, vector<1x8x32xf32>
    %1 = vector.shape_cast %0 : vector<1x8x32xf32> to vector<8x32xf32>
    %c0_2 = arith.constant 0 : index
    %c0_3 = arith.constant 0 : index
    %c0_4 = arith.constant 0 : index
    %2 = vector.load %arg2[%c0_2, %c0_3, %c0_4] : memref<1x8x32xf32, #tpu.memory_space<vmem>>, vector<1x8x32xf32>
    %3 = vector.shape_cast %2 : vector<1x8x32xf32> to vector<8x32xf32>
    %c0_5 = arith.constant 0 : index
    %c0_6 = arith.constant 0 : index
    %4 = vector.load %arg4[%c0_5, %c0_6] : memref<1x32xf32, #tpu.memory_space<vmem>>, vector<1x32xf32>
    %c0_7 = arith.constant 0 : index
    %c0_8 = arith.constant 0 : index
    %5 = vector.load %arg5[%c0_7, %c0_8] : memref<1x32xf32, #tpu.memory_space<vmem>>, vector<1x32xf32>
    %cst = arith.constant dense<0.000000e+00> : vector<8xf32>
    %6 = vector.multi_reduction <add>, %1, %cst [1] : vector<8x32xf32> to vector<8xf32>
    %7 = vector.shape_cast %6 : vector<8xf32> to vector<8x1xf32>
    %cst_9 = arith.constant 3.200000e+01 : f32
    %8 = vector.broadcast %cst_9 : f32 to vector<8x1xf32>
    %9 = arith.divf %7, %8 : vector<8x1xf32>
    %10 = vector.broadcast %9 : vector<8x1xf32> to vector<8x32xf32>
    %11 = arith.subf %1, %10 : vector<8x32xf32>
    %12 = arith.mulf %11, %11 : vector<8x32xf32>
    %cst_10 = arith.constant dense<0.000000e+00> : vector<8xf32>
    %13 = vector.multi_reduction <add>, %12, %cst_10 [1] : vector<8x32xf32> to vector<8xf32>
    %14 = vector.shape_cast %13 : vector<8xf32> to vector<8x1xf32>
    %cst_11 = arith.constant 3.200000e+01 : f32
    %15 = vector.broadcast %cst_11 : f32 to vector<8x1xf32>
    %16 = arith.divf %14, %15 : vector<8x1xf32>
    %17 = vector.broadcast %9 : vector<8x1xf32> to vector<8x32xf32>
    %18 = arith.subf %1, %17 : vector<8x32xf32>
    %cst_12 = arith.constant 9.99999974E-6 : f32
    %19 = vector.broadcast %cst_12 : f32 to vector<8x1xf32>
    %20 = arith.addf %16, %19 : vector<8x1xf32>
    %21 = math.rsqrt %20 : vector<8x1xf32>
    %22 = vector.broadcast %21 : vector<8x1xf32> to vector<8x32xf32>
    %23 = arith.mulf %18, %22 : vector<8x32xf32>
    %24 = vector.broadcast %4 : vector<1x32xf32> to vector<8x32xf32>
    %25 = arith.mulf %23, %24 : vector<8x32xf32>
    %26 = vector.broadcast %5 : vector<1x32xf32> to vector<8x32xf32>
    %27 = arith.addf %25, %26 : vector<8x32xf32>
    %c0_13 = arith.constant 0 : index
    %c0_14 = arith.constant 0 : index
    %28 = vector.load %arg6[%c0_13, %c0_14] : memref<32x32xf32, #tpu.memory_space<vmem>>, vector<32x32xf32>
    %cst_15 = arith.constant dense<0.000000e+00> : vector<8x32xf32>
    %29 = tpu.matmul %27, %28, %cst_15 {dimension_numbers = #tpu.dot_dimension_numbers<[1], [0], [0], [1], [0, 0, 1, 1], [], []>} : vector<8x32xf32>, vector<32x32xf32>, vector<8x32xf32> -> vector<8x32xf32>
    %c0_16 = arith.constant 0 : index
    %c0_17 = arith.constant 0 : index
    %30 = vector.load %arg7[%c0_16, %c0_17] : memref<1x32xf32, #tpu.memory_space<vmem>>, vector<1x32xf32>
    %31 = vector.broadcast %30 : vector<1x32xf32> to vector<8x32xf32>
    %32 = arith.addf %29, %31 : vector<8x32xf32>
    %cst_18 = arith.constant 0.353553385 : f32
    %33 = vector.broadcast %cst_18 : f32 to vector<8x32xf32>
    %34 = arith.mulf %32, %33 : vector<8x32xf32>
    %c0_19 = arith.constant 0 : index
    %c0_20 = arith.constant 0 : index
    %35 = vector.load %arg8[%c0_19, %c0_20] : memref<32x32xf32, #tpu.memory_space<vmem>>, vector<32x32xf32>
    %cst_21 = arith.constant dense<0.000000e+00> : vector<8x32xf32>
    %36 = tpu.matmul %3, %35, %cst_21 {dimension_numbers = #tpu.dot_dimension_numbers<[1], [0], [0], [1], [0, 0, 1, 1], [], []>} : vector<8x32xf32>, vector<32x32xf32>, vector<8x32xf32> -> vector<8x32xf32>
    %c0_22 = arith.constant 0 : index
    %c0_23 = arith.constant 0 : index
    %37 = vector.load %arg9[%c0_22, %c0_23] : memref<1x32xf32, #tpu.memory_space<vmem>>, vector<1x32xf32>
    %38 = vector.broadcast %37 : vector<1x32xf32> to vector<8x32xf32>
    %39 = arith.addf %36, %38 : vector<8x32xf32>
    %c0_24 = arith.constant 0 : index
    %c0_25 = arith.constant 0 : index
    %40 = vector.load %arg10[%c0_24, %c0_25] : memref<32x32xf32, #tpu.memory_space<vmem>>, vector<32x32xf32>
    %cst_26 = arith.constant dense<0.000000e+00> : vector<8x32xf32>
    %41 = tpu.matmul %3, %40, %cst_26 {dimension_numbers = #tpu.dot_dimension_numbers<[1], [0], [0], [1], [0, 0, 1, 1], [], []>} : vector<8x32xf32>, vector<32x32xf32>, vector<8x32xf32> -> vector<8x32xf32>
    %c0_27 = arith.constant 0 : index
    %c0_28 = arith.constant 0 : index
    %42 = vector.load %arg11[%c0_27, %c0_28] : memref<1x32xf32, #tpu.memory_space<vmem>>, vector<1x32xf32>
    %43 = vector.broadcast %42 : vector<1x32xf32> to vector<8x32xf32>
    %44 = arith.addf %41, %43 : vector<8x32xf32>
    %45 = vector.shape_cast %34 : vector<8x32xf32> to vector<8x4x8xf32>
    %46 = tpu.transpose %45, [1, 0, 2] : vector<8x4x8xf32> -> vector<4x8x8xf32>
    %47 = vector.shape_cast %39 : vector<8x32xf32> to vector<8x4x8xf32>
    %48 = tpu.transpose %47, [1, 0, 2] : vector<8x4x8xf32> -> vector<4x8x8xf32>
    %49 = vector.shape_cast %44 : vector<8x32xf32> to vector<8x4x8xf32>
    %50 = tpu.transpose %49, [1, 0, 2] : vector<8x4x8xf32> -> vector<4x8x8xf32>
    "tpu.trace_start"() <{level = 10 : i32, message = "hqd,hkd->hqk"}> : () -> ()
    %cst_29 = arith.constant dense<0.000000e+00> : vector<4x8x8xf32>
    %51 = tpu.matmul %46, %48, %cst_29 {dimension_numbers = #tpu.dot_dimension_numbers<[2], [2], [1], [1], [0, 0, 0, 1, 1, 1], [0], [0]>} : vector<4x8x8xf32>, vector<4x8x8xf32>, vector<4x8x8xf32> -> vector<4x8x8xf32>
    "tpu.trace_stop"() : () -> ()
    %c0_30 = arith.constant 0 : index
    %c0_31 = arith.constant 0 : index
    %c0_32 = arith.constant 0 : index
    %c0_33 = arith.constant 0 : index
    %52 = vector.load %arg3[%c0_30, %c0_31, %c0_32, %c0_33] : memref<1x4x8x8xf32, #tpu.memory_space<vmem>>, vector<1x4x8x8xf32>
    %53 = vector.shape_cast %52 : vector<1x4x8x8xf32> to vector<4x8x8xf32>
    %54 = arith.addf %51, %53 : vector<4x8x8xf32>
    %cst_34 = arith.constant dense<0xFF800000> : vector<4x8xf32>
    %55 = vector.multi_reduction <maximumf>, %54, %cst_34 [2] : vector<4x8x8xf32> to vector<4x8xf32>
    %56 = vector.shape_cast %55 : vector<4x8xf32> to vector<4x8x1xf32>
    %57 = vector.broadcast %56 : vector<4x8x1xf32> to vector<4x8x8xf32>
    %58 = arith.subf %54, %57 : vector<4x8x8xf32>
    %59 = math.exp %58 : vector<4x8x8xf32>
    %cst_35 = arith.constant dense<0.000000e+00> : vector<4x8xf32>
    %60 = vector.multi_reduction <add>, %59, %cst_35 [2] : vector<4x8x8xf32> to vector<4x8xf32>
    %61 = vector.shape_cast %60 : vector<4x8xf32> to vector<4x8x1xf32>
    %62 = vector.broadcast %61 : vector<4x8x1xf32> to vector<4x8x8xf32>
    %63 = arith.divf %59, %62 : vector<4x8x8xf32>
    "tpu.trace_start"() <{level = 10 : i32, message = "hqk,hkd->hqd"}> : () -> ()
    %cst_36 = arith.constant dense<0.000000e+00> : vector<4x8x8xf32>
    %64 = tpu.matmul %63, %50, %cst_36 {dimension_numbers = #tpu.dot_dimension_numbers<[2], [1], [1], [2], [0, 0, 0, 1, 1, 2], [0], [0]>} : vector<4x8x8xf32>, vector<4x8x8xf32>, vector<4x8x8xf32> -> vector<4x8x8xf32>
    "tpu.trace_stop"() : () -> ()
    %65 = tpu.transpose %64, [1, 0, 2] : vector<4x8x8xf32> -> vector<8x4x8xf32>
    %66 = vector.shape_cast %65 : vector<8x4x8xf32> to vector<8x32xf32>
    %c0_37 = arith.constant 0 : index
    %c0_38 = arith.constant 0 : index
    %67 = vector.load %arg12[%c0_37, %c0_38] : memref<32x32xf32, #tpu.memory_space<vmem>>, vector<32x32xf32>
    %cst_39 = arith.constant dense<0.000000e+00> : vector<8x32xf32>
    %68 = tpu.matmul %66, %67, %cst_39 {dimension_numbers = #tpu.dot_dimension_numbers<[1], [0], [0], [1], [0, 0, 1, 1], [], []>} : vector<8x32xf32>, vector<32x32xf32>, vector<8x32xf32> -> vector<8x32xf32>
    %c0_40 = arith.constant 0 : index
    %c0_41 = arith.constant 0 : index
    %69 = vector.load %arg13[%c0_40, %c0_41] : memref<1x32xf32, #tpu.memory_space<vmem>>, vector<1x32xf32>
    %70 = vector.broadcast %69 : vector<1x32xf32> to vector<8x32xf32>
    %71 = arith.addf %68, %70 : vector<8x32xf32>
    %72 = arith.addf %1, %71 : vector<8x32xf32>
    %c0_42 = arith.constant 0 : index
    %c0_43 = arith.constant 0 : index
    %73 = vector.load %arg14[%c0_42, %c0_43] : memref<1x32xf32, #tpu.memory_space<vmem>>, vector<1x32xf32>
    %c0_44 = arith.constant 0 : index
    %c0_45 = arith.constant 0 : index
    %74 = vector.load %arg15[%c0_44, %c0_45] : memref<1x32xf32, #tpu.memory_space<vmem>>, vector<1x32xf32>
    %cst_46 = arith.constant dense<0.000000e+00> : vector<8xf32>
    %75 = vector.multi_reduction <add>, %72, %cst_46 [1] : vector<8x32xf32> to vector<8xf32>
    %76 = vector.shape_cast %75 : vector<8xf32> to vector<8x1xf32>
    %cst_47 = arith.constant 3.200000e+01 : f32
    %77 = vector.broadcast %cst_47 : f32 to vector<8x1xf32>
    %78 = arith.divf %76, %77 : vector<8x1xf32>
    %79 = vector.broadcast %78 : vector<8x1xf32> to vector<8x32xf32>
    %80 = arith.subf %72, %79 : vector<8x32xf32>
    %81 = arith.mulf %80, %80 : vector<8x32xf32>
    %cst_48 = arith.constant dense<0.000000e+00> : vector<8xf32>
    %82 = vector.multi_reduction <add>, %81, %cst_48 [1] : vector<8x32xf32> to vector<8xf32>
    %83 = vector.shape_cast %82 : vector<8xf32> to vector<8x1xf32>
    %cst_49 = arith.constant 3.200000e+01 : f32
    %84 = vector.broadcast %cst_49 : f32 to vector<8x1xf32>
    %85 = arith.divf %83, %84 : vector<8x1xf32>
    %86 = vector.broadcast %78 : vector<8x1xf32> to vector<8x32xf32>
    %87 = arith.subf %72, %86 : vector<8x32xf32>
    %cst_50 = arith.constant 9.99999974E-6 : f32
    %88 = vector.broadcast %cst_50 : f32 to vector<8x1xf32>
    %89 = arith.addf %85, %88 : vector<8x1xf32>
    %90 = math.rsqrt %89 : vector<8x1xf32>
    %91 = vector.broadcast %90 : vector<8x1xf32> to vector<8x32xf32>
    %92 = arith.mulf %87, %91 : vector<8x32xf32>
    %93 = vector.broadcast %73 : vector<1x32xf32> to vector<8x32xf32>
    %94 = arith.mulf %92, %93 : vector<8x32xf32>
    %95 = vector.broadcast %74 : vector<1x32xf32> to vector<8x32xf32>
    %96 = arith.addf %94, %95 : vector<8x32xf32>
    %c0_51 = arith.constant 0 : index
    %c0_52 = arith.constant 0 : index
    %97 = vector.load %arg16[%c0_51, %c0_52] : memref<32x128xf32, #tpu.memory_space<vmem>>, vector<32x128xf32>
    %cst_53 = arith.constant dense<0.000000e+00> : vector<8x128xf32>
    %98 = tpu.matmul %96, %97, %cst_53 {dimension_numbers = #tpu.dot_dimension_numbers<[1], [0], [0], [1], [0, 0, 1, 1], [], []>} : vector<8x32xf32>, vector<32x128xf32>, vector<8x128xf32> -> vector<8x128xf32>
    %c0_54 = arith.constant 0 : index
    %c0_55 = arith.constant 0 : index
    %99 = vector.load %arg17[%c0_54, %c0_55] : memref<1x128xf32, #tpu.memory_space<vmem>>, vector<1x128xf32>
    %100 = vector.broadcast %99 : vector<1x128xf32> to vector<8x128xf32>
    %101 = arith.addf %98, %100 : vector<8x128xf32>
    %cst_56 = arith.constant 5.000000e-01 : f32
    %102 = vector.broadcast %cst_56 : f32 to vector<8x128xf32>
    %103 = arith.mulf %102, %101 : vector<8x128xf32>
    %cst_57 = arith.constant 0.707106769 : f32
    %104 = vector.broadcast %cst_57 : f32 to vector<8x128xf32>
    %105 = arith.mulf %101, %104 : vector<8x128xf32>
    %106 = math.absf %105 : vector<8x128xf32>
    %cst_58 = arith.constant 0.327591091 : f32
    %107 = vector.broadcast %cst_58 : f32 to vector<8x128xf32>
    %108 = arith.mulf %107, %106 : vector<8x128xf32>
    %cst_59 = arith.constant 1.000000e+00 : f32
    %109 = vector.broadcast %cst_59 : f32 to vector<8x128xf32>
    %110 = arith.addf %109, %108 : vector<8x128xf32>
    %cst_60 = arith.constant 1.000000e+00 : f32
    %111 = vector.broadcast %cst_60 : f32 to vector<8x128xf32>
    %112 = arith.divf %111, %110 : vector<8x128xf32>
    %cst_61 = arith.constant 1.06140542 : f32
    %113 = vector.broadcast %cst_61 : f32 to vector<8x128xf32>
    %114 = arith.mulf %113, %112 : vector<8x128xf32>
    %cst_62 = arith.constant -1.45315206 : f32
    %115 = vector.broadcast %cst_62 : f32 to vector<8x128xf32>
    %116 = arith.addf %114, %115 : vector<8x128xf32>
    %117 = arith.mulf %116, %112 : vector<8x128xf32>
    %cst_63 = arith.constant 1.42141378 : f32
    %118 = vector.broadcast %cst_63 : f32 to vector<8x128xf32>
    %119 = arith.addf %117, %118 : vector<8x128xf32>
    %120 = arith.mulf %119, %112 : vector<8x128xf32>
    %cst_64 = arith.constant -0.284496725 : f32
    %121 = vector.broadcast %cst_64 : f32 to vector<8x128xf32>
    %122 = arith.addf %120, %121 : vector<8x128xf32>
    %123 = arith.mulf %122, %112 : vector<8x128xf32>
    %cst_65 = arith.constant 0.254829586 : f32
    %124 = vector.broadcast %cst_65 : f32 to vector<8x128xf32>
    %125 = arith.addf %123, %124 : vector<8x128xf32>
    %126 = arith.mulf %125, %112 : vector<8x128xf32>
    %127 = arith.mulf %106, %106 : vector<8x128xf32>
    %cst_66 = arith.constant 0.000000e+00 : f32
    %128 = vector.broadcast %cst_66 : f32 to vector<8x128xf32>
    %129 = arith.subf %128, %127 : vector<8x128xf32>
    %130 = math.exp %129 : vector<8x128xf32>
    %131 = arith.mulf %126, %130 : vector<8x128xf32>
    %cst_67 = arith.constant 1.000000e+00 : f32
    %132 = vector.broadcast %cst_67 : f32 to vector<8x128xf32>
    %133 = arith.subf %132, %131 : vector<8x128xf32>
    %cst_68 = arith.constant 0.000000e+00 : f32
    %134 = vector.broadcast %cst_68 : f32 to vector<8x128xf32>
    %135 = arith.cmpf olt, %105, %134 : vector<8x128xf32>
    %cst_69 = arith.constant 0.000000e+00 : f32
    %136 = vector.broadcast %cst_69 : f32 to vector<8x128xf32>
    %137 = arith.subf %136, %133 : vector<8x128xf32>
    %138 = arith.select %135, %137, %133 : vector<8x128xi1>, vector<8x128xf32>
    %cst_70 = arith.constant 1.000000e+00 : f32
    %139 = vector.broadcast %cst_70 : f32 to vector<8x128xf32>
    %140 = arith.addf %139, %138 : vector<8x128xf32>
    %141 = arith.mulf %103, %140 : vector<8x128xf32>
    %c0_71 = arith.constant 0 : index
    %c0_72 = arith.constant 0 : index
    %142 = vector.load %arg18[%c0_71, %c0_72] : memref<128x32xf32, #tpu.memory_space<vmem>>, vector<128x32xf32>
    %cst_73 = arith.constant dense<0.000000e+00> : vector<8x32xf32>
    %143 = tpu.matmul %141, %142, %cst_73 {dimension_numbers = #tpu.dot_dimension_numbers<[1], [0], [0], [1], [0, 0, 1, 1], [], []>} : vector<8x128xf32>, vector<128x32xf32>, vector<8x32xf32> -> vector<8x32xf32>
    %c0_74 = arith.constant 0 : index
    %c0_75 = arith.constant 0 : index
    %144 = vector.load %arg19[%c0_74, %c0_75] : memref<1x32xf32, #tpu.memory_space<vmem>>, vector<1x32xf32>
    %145 = vector.broadcast %144 : vector<1x32xf32> to vector<8x32xf32>
    %146 = arith.addf %143, %145 : vector<8x32xf32>
    %147 = arith.addf %72, %146 : vector<8x32xf32>
    %c0_76 = arith.constant 0 : index
    %c0_77 = arith.constant 0 : index
    %c0_78 = arith.constant 0 : index
    %148 = vector.load %arg20[%c0_76, %c0_77, %c0_78] : memref<1x8x32xf32, #tpu.memory_space<vmem>>, vector<1x8x32xf32>
    %149 = vector.shape_cast %148 : vector<1x8x32xf32> to vector<8x32xf32>
    %150 = vector.shape_cast %147 : vector<8x32xf32> to vector<1x8x32xf32>
    tpu.vector_store %arg20[%c0_76, %c0_77, %c0_78], %150 {strides = array<i32>} : memref<1x8x32xf32, #tpu.memory_space<vmem>>, vector<1x8x32xf32>,
    return
  }
  func.func @transform_0(%arg0: i32) -> (i32, i32, i32) {
    %c0_i32 = arith.constant 0 : i32
    %c0_i32_0 = arith.constant 0 : i32
    %c0_i32_1 = arith.constant 0 : i32
    return %arg0, %c0_i32, %c0_i32_0 : i32, i32, i32
  }
  func.func @transform_1(%arg0: i32) -> (i32, i32, i32) {
    %c0_i32 = arith.constant 0 : i32
    %c0_i32_0 = arith.constant 0 : i32
    %c0_i32_1 = arith.constant 0 : i32
    return %arg0, %c0_i32, %c0_i32_0 : i32, i32, i32
  }
  func.func @transform_2(%arg0: i32) -> (i32, i32, i32, i32) {
    %c0_i32 = arith.constant 0 : i32
    %c0_i32_0 = arith.constant 0 : i32
    %c0_i32_1 = arith.constant 0 : i32
    %c0_i32_2 = arith.constant 0 : i32
    return %arg0, %c0_i32, %c0_i32_0, %c0_i32_1 : i32, i32, i32, i32
  }
  func.func @transform_3(%arg0: i32) -> (i32, i32) {
    %c0_i32 = arith.constant 0 : i32
    %c0_i32_0 = arith.constant 0 : i32
    %c0_i32_1 = arith.constant 0 : i32
    return %c0_i32, %c0_i32_0 : i32, i32
  }
  func.func @transform_4(%arg0: i32) -> (i32, i32) {
    %c0_i32 = arith.constant 0 : i32
    %c0_i32_0 = arith.constant 0 : i32
    %c0_i32_1 = arith.constant 0 : i32
    return %c0_i32, %c0_i32_0 : i32, i32
  }
  func.func @transform_5(%arg0: i32) -> (i32, i32) {
    %c0_i32 = arith.constant 0 : i32
    %c0_i32_0 = arith.constant 0 : i32
    %c0_i32_1 = arith.constant 0 : i32
    return %c0_i32, %c0_i32_0 : i32, i32
  }
  func.func @transform_6(%arg0: i32) -> (i32, i32) {
    %c0_i32 = arith.constant 0 : i32
    %c0_i32_0 = arith.constant 0 : i32
    %c0_i32_1 = arith.constant 0 : i32
    return %c0_i32, %c0_i32_0 : i32, i32
  }
  func.func @transform_7(%arg0: i32) -> (i32, i32) {
    %c0_i32 = arith.constant 0 : i32
    %c0_i32_0 = arith.constant 0 : i32
    %c0_i32_1 = arith.constant 0 : i32
    return %c0_i32, %c0_i32_0 : i32, i32
  }
  func.func @transform_8(%arg0: i32) -> (i32, i32) {
    %c0_i32 = arith.constant 0 : i32
    %c0_i32_0 = arith.constant 0 : i32
    %c0_i32_1 = arith.constant 0 : i32
    return %c0_i32, %c0_i32_0 : i32, i32
  }
  func.func @transform_9(%arg0: i32) -> (i32, i32) {
    %c0_i32 = arith.constant 0 : i32
    %c0_i32_0 = arith.constant 0 : i32
    %c0_i32_1 = arith.constant 0 : i32
    return %c0_i32, %c0_i32_0 : i32, i32
  }
  func.func @transform_10(%arg0: i32) -> (i32, i32) {
    %c0_i32 = arith.constant 0 : i32
    %c0_i32_0 = arith.constant 0 : i32
    %c0_i32_1 = arith.constant 0 : i32
    return %c0_i32, %c0_i32_0 : i32, i32
  }
  func.func @transform_11(%arg0: i32) -> (i32, i32) {
    %c0_i32 = arith.constant 0 : i32
    %c0_i32_0 = arith.constant 0 : i32
    %c0_i32_1 = arith.constant 0 : i32
    return %c0_i32, %c0_i32_0 : i32, i32
  }
  func.func @transform_12(%arg0: i32) -> (i32, i32) {
    %c0_i32 = arith.constant 0 : i32
    %c0_i32_0 = arith.constant 0 : i32
    %c0_i32_1 = arith.constant 0 : i32
    return %c0_i32, %c0_i32_0 : i32, i32
  }
  func.func @transform_13(%arg0: i32) -> (i32, i32) {
    %c0_i32 = arith.constant 0 : i32
    %c0_i32_0 = arith.constant 0 : i32
    %c0_i32_1 = arith.constant 0 : i32
    return %c0_i32, %c0_i32_0 : i32, i32
  }
  func.func @transform_14(%arg0: i32) -> (i32, i32) {
    %c0_i32 = arith.constant 0 : i32
    %c0_i32_0 = arith.constant 0 : i32
    %c0_i32_1 = arith.constant 0 : i32
    return %c0_i32, %c0_i32_0 : i32, i32
  }
  func.func @transform_15(%arg0: i32) -> (i32, i32) {
    %c0_i32 = arith.constant 0 : i32
    %c0_i32_0 = arith.constant 0 : i32
    %c0_i32_1 = arith.constant 0 : i32
    return %c0_i32, %c0_i32_0 : i32, i32
  }
  func.func @transform_16(%arg0: i32) -> (i32, i32) {
    %c0_i32 = arith.constant 0 : i32
    %c0_i32_0 = arith.constant 0 : i32
    %c0_i32_1 = arith.constant 0 : i32
    return %c0_i32, %c0_i32_0 : i32, i32
  }
  func.func @transform_17(%arg0: i32) -> (i32, i32) {
    %c0_i32 = arith.constant 0 : i32
    %c0_i32_0 = arith.constant 0 : i32
    %c0_i32_1 = arith.constant 0 : i32
    return %c0_i32, %c0_i32_0 : i32, i32
  }
  func.func @transform_18(%arg0: i32) -> (i32, i32) {
    %c0_i32 = arith.constant 0 : i32
    %c0_i32_0 = arith.constant 0 : i32
    %c0_i32_1 = arith.constant 0 : i32
    return %c0_i32, %c0_i32_0 : i32, i32
  }
  func.func @transform_19(%arg0: i32) -> (i32, i32, i32) {
    %c0_i32 = arith.constant 0 : i32
    %c0_i32_0 = arith.constant 0 : i32
    %c0_i32_1 = arith.constant 0 : i32
    return %arg0, %c0_i32, %c0_i32_0 : i32, i32, i32
  }
}

</mosaic_0001>

<bundles_post_ra>
// kernel: bias_attention_module_fwd.6
= control target key start
LH: loop header
LB: loop body
LE: loop exit
PB: predicated region body
PF: predicated region fallthrough
CT: control target
= control target key end

     0   :  { %s3315_s0 = inlined_call_operand.vmem [shape: f32[2,8,32], index: 0, kind: input, shape index: {}, may-alias: {0,1}]   ;;  %s3316_s1 = inlined_call_operand.vmem [shape: f32[2,8,32], index: 1, kind: input, shape index: {}, may-alias: {0,1}]   ;;  %s3317_s2 = inlined_call_operand.vmem [shape: f32[2,4,8,8], index: 2, kind: input, shape index: {}]   ;;  %s3318_s3 = inlined_call_operand.vmem [shape: f32[1,32], index: 3, kind: input, shape index: {}]   ;;  %s3319_s4 = inlined_call_operand.vmem [shape: f32[1,32], index: 4, kind: input, shape index: {}]   ;;  %s3320_s5 = inlined_call_operand.vmem [shape: f32[32,32], index: 5, kind: input, shape index: {}]   ;;  %s3321_s6 = inlined_call_operand.vmem [shape: f32[1,32], index: 6, kind: input, shape index: {}]   ;;  %s3322_s7 = inlined_call_operand.vmem [shape: f32[32,32], index: 7, kind: input, shape index: {}]   ;;  %s3323_s8 = inlined_call_operand.vmem [shape: f32[1,32], index: 8, kind: input, shape index: {}]   ;;  %s3324_s9 = inlined_call_operand.vmem [shape: f32[32,32], index: 9, kind: input, shape index: {}]   ;;  %s3325_s10 = inlined_call_operand.vmem [shape: f32[1,32], index: 10, kind: input, shape index: {}]   ;;  %s3326_s11 = inlined_call_operand.vmem [shape: f32[32,32], index: 11, kind: input, shape index: {}]   ;;  %s3327_s12 = inlined_call_operand.vmem [shape: f32[1,32], index: 12, kind: input, shape index: {}]   ;;  %s3328_s13 = inlined_call_operand.vmem [shape: f32[1,32], index: 13, kind: input, shape index: {}]   ;;  %s3329_s14 = inlined_call_operand.vmem [shape: f32[1,32], index: 14, kind: input, shape index: {}]   ;;  %s3330_s15 = inlined_call_operand.vmem [shape: f32[32,128], index: 15, kind: input, shape index: {}]   ;;  %s3331_s16 = inlined_call_operand.vmem [shape: f32[1,128], index: 16, kind: input, shape index: {}]   ;;  %s3332_s17 = inlined_call_operand.vmem [shape: f32[128,32], index: 17, kind: input, shape index: {}]   ;;  %s3333_s18 = inlined_call_operand.vmem [shape: f32[1,32], index: 18, kind: input, shape index: {}]   ;;  %s3334_s19 = inlined_call_operand.vmem [shape: f32[2,8,32], index: 19, kind: output, shape index: {}]  }
   0x1   :  { %3335 = sst [smem:[#allocation2_spill]] %s3315_s0  ;;  %s2947_s0 = smov 0  }
   0x2   :  { %3336 = sst [smem:[#allocation3_spill]] %s3316_s1 }
   0x3   :  { %3337 = sst [smem:[#allocation4_spill]] %s3317_s2 }
   0x4   :  { %3338 = sst [smem:[#allocation5_spill]] %s3318_s3 }
   0x5 LB: > { %s2551_s30 = sadd.s32 4294967295, %s2835_s0   ;;  %p2555_p0 = scmp.ge.s32.totalorder %s2835_s0, 1  ;;  %s2835_s0 = sphi %s2947_s0, %s29_s0  }
   0x6   : > { %p555_p1 = scmp.lt.s32.totalorder %s2835_s0, 3 }
   0x8   : > { %p556_p2 = pnand %p2555_p0, %p555_p1 }
   0x9   : > { %p618_p3 = scmp.lt.s32.totalorder (!%p556_p2), %s2551_s30, 1  ;;  %s3339_s22 = sld [smem:[#allocation2_spill]] (!%p556_p2) }
   0xa   : > { %559 = sbr.rel (%p556_p2) target bundleno = 2486 (0x9b6), region = 96  ;;  %s3341_s1 = sld [smem:[#allocation3_spill]] (!%p556_p2) }
   0xb   : > { %s2839_s27 = smov (!%p556_p2), 104   ;;  %s2840_s28 = smov (!%p556_p2), 120  }
   0xc   : > { %s2844_s21 = smov (!%p556_p2), 16  }
   0xf   : > { %s3344_s30 = smov (!%p618_p3, %s2551_s30), 1  ;;  %vm639_vm0 = vcmask 261120   ;;  %v671_v7 = vld [vmem:[%s3320_s5 + $0x18] sm:$0xff]  ;;  %v2837_v8 = vmov 0.0   ;;  %v670_v9 = vld [vmem:[%s3320_s5 + $0x10] sm:$0xff]  ;;  %vm2838_vm1 = vmmov 0   ;;  %v933_v41 = vlaneseq }
  0x10   : > { %s2958_s20 = sshll.u32 %s3344_s30, 3  ;;  %2657 = vmatprep.subr.mxu1 %v2837_v8  ;;  %2665 = vmatprep.mubr.msk.f32.mxu1 %vm2838_vm1, %v2837_v8  ;;  %v669_v10 = vld [vmem:[%s3320_s5 + $0x8] sm:$0xff]  ;;  %v668_v11 = vld [vmem:[%s3320_s5] sm:$0xff]  ;;  %v756_v21 = vld [vmem:[%s3322_s7 + $0x18] sm:$0xff]  ;;  %v2842_v39 = vmov 1983009808  }
  0x11   : > { %s621_s2 = scalar_lea.vmem %s3339_s22, %s2958_s20  ;;  %2658 = vmatpush3.msra.mxu1 %v671_v7  ;;  %2700 = vmatprep.subr.mxu0 %v2837_v8  ;;  %s3340_s22 = sld [smem:[#allocation5_spill]]  ;;  %v2562_v18 = vld [vmem:[%s3319_s4] ss:$0 sm:$0xff]  ;;  %v755_v22 = vld [vmem:[%s3322_s7 + $0x10] sm:$0xff]  ;;  %v754_v23 = vld [vmem:[%s3322_s7 + $0x8] sm:$0xff]  ;;  %v931_v40 = vunpack.c.l.s4 %v2842_v39  ;;  %v934_v45 = vshrl.u32 %v933_v41, 7 }
  0x12   : > { %v2964_v0 = vld [vmem:[%s621_s2] sm:$0xff]  ;;  %2659 = vmatprep.subr.mxu1 %v2837_v8  ;;  %2702 = vmatprep.mubr.msk.f32.mxu0 %vm2838_vm1, %v2837_v8  ;;  %v840_v33 = vld [vmem:[%s3324_s9 + $0x18] sm:$0xff]  ;;  %v839_v35 = vld [vmem:[%s3324_s9 + $0x10] sm:$0xff]  ;;  %s2841_s2 = smov 112   ;;  %v2843_v42 = vmov 1934713408  }
  0x13   : > { %v640_v1 = vsel %vm639_vm0, %v2964_v0, 0.0  ;;  %2660 = vmatpush3.msra.mxu1 %v670_v9  ;;  %v753_v24 = vld [vmem:[%s3322_s7] sm:$0xff]  ;;  %v838_v36 = vld [vmem:[%s3324_s9 + $0x8] sm:$0xff]  ;;  %v963_v43 = vunpack.c.l.s4 %v2843_v42  ;;  %v932_v44 = vunpack.c.0.s8 %v931_v40  ;;  %vm1360_vm2 = vcmask 64512   ;;  %s2598_s26 = sshll.u32 %s3344_s30, 5  ;;  %s634_s30 = scalar_lea.vmem %s3334_s19, %s2958_s20 }
  0x14   : > { %641 = vadd.xlane.f32.xlu0 %v640_v1  ;;  %2661 = vmatprep.subr.mxu1 %v2837_v8  ;;  %v2565_v28 = vld [vmem:[%s3323_s8] ss:$0 sm:$0xff]  ;;  %vm2150_vm3 = vcmask 130048   ;;  %vm2152_vm4 = vcmask 195584  }
  0x15   : > { %2662 = vmatpush3.msra.mxu1 %v669_v10  ;;  %v2563_v31 = vld [vmem:[%s3321_s6] ss:$0 sm:$0xff]  ;;  %v964_v48 = vunpack.c.0.s8 %v963_v43  ;;  %v3055_v49 = vsub.s32 %v932_v44, %v934_v45 }
  0x16   : > { %2663 = vmatprep.subr.mxu1 %v2837_v8  ;;  %v837_v38 = vld [vmem:[%s3324_s9] sm:$0xff] }
  0x17   : > { %2664 = vmatpush3.msra.mxu1 %v668_v11  ;;  %v2561_v16 = vld [vmem:[%s3340_s22] ss:$0 sm:$0xff]  ;;  %s625_s22 = scalar_lea.vmem %s3341_s1, %s2958_s20  ;;  %v3057_v55 = vsub.s32 %v964_v48, %v934_v45  ;;  %s3342_s1 = sld [smem:[#allocation4_spill]] }
  0x18   : > { %2668 = vmatprep.subr.mxu1 %v2837_v8  ;;  %v636_v25 = vld [vmem:[%s625_s22] sm:$0xff] }
  0x1d   : > { %s630_s22 = scalar_lea.vmem %s3342_s1, %s2598_s26  ;;  %s2845_s1 = smov 8  }
  0x9d   : > { %v642_v2 = vpop.xlane.xlu0 %641 }
  0x9e   : > { %v644_v3 = vmul.f32 0.03125, %v642_v2 }
  0xa0   : > { %v645_v4 = vsub.f32 %v2964_v0, %v644_v3 }
  0xa2   : > { %v646_v5 = vmul.f32 %v645_v4, %v645_v4 }
  0xa4   : > { %v647_v6 = vsel %vm639_vm0, %v646_v5, 0.0 }
  0xa5   : > { %648 = vadd.xlane.f32.xlu0 %v647_v6 }
 0x12e   : > { %v649_v12 = vpop.xlane.xlu0 %648 }
 0x12f   : > { %v650_v13 = vmul.f32 0.03125, %v649_v12 }
 0x131   : > { %v651_v14 = vadd.f32 1e-05, %v650_v13 }
 0x133   : > { %2805 = vrsqrt.f32 %v651_v14 }
 0x140   : > { %v2806_v15 = vpop.eup %2805 }
 0x141   : > { %v653_v17 = vmul.f32 %v2806_v15, %v645_v4 }
 0x143   : > { %v660_v19 = vmul.f32 %v2561_v16, %v653_v17 }
 0x145   : > { %v667_v20 = vadd.f32 %v2562_v18, %v660_v19 }
 0x147   : > { %2666 = vmatmul.mubr.msk.f32.vlgmr.msra.gmra.mxu1 %vm639_vm0, %v667_v20 }
 0x148   : > { %2669 = vmatpush3.msra.mxu1 %v756_v21  ;;  %2676 = vmatprep.mubr.msk.f32.mxu1 %vm2838_vm1, %v2837_v8 }
 0x149   : > { %2670 = vmatprep.subr.mxu1 %v2837_v8 }
 0x14a   : > { %2671 = vmatpush3.msra.mxu1 %v755_v22 }
 0x14b   : > { %2672 = vmatprep.subr.mxu1 %v2837_v8 }
 0x14c   : > { %2673 = vmatpush3.msra.mxu1 %v754_v23 }
 0x14d   : > { %2674 = vmatprep.subr.mxu1 %v2837_v8 }
 0x14e   : > { %2675 = vmatpush3.msra.mxu1 %v753_v24 }
 0x14f   : > { %2677 = vmatmul.mubr.msk.f32.vlgmr.msra.gmra.mxu1 %vm639_vm0, %v636_v25  ;;  %2679 = vmatprep.subr.mxu1 %v2837_v8 }
 0x150   : > { %2687 = vmatprep.mubr.msk.f32.mxu1 %vm2838_vm1, %v2837_v8  ;;  %2680 = vmatpush3.msra.mxu1 %v840_v33 }
 0x151   : > { %2681 = vmatprep.subr.mxu1 %v2837_v8 }
 0x152   : > { %2682 = vmatpush3.msra.mxu1 %v839_v35 }
 0x153   : > { %2683 = vmatprep.subr.mxu1 %v2837_v8 }
 0x154   : > { %2684 = vmatpush3.msra.mxu1 %v838_v36 }
 0x155   : > { %2685 = vmatprep.subr.mxu1 %v2837_v8 }
 0x156   : > { %2686 = vmatpush3.msra.mxu1 %v837_v38 }
 0x157   : > { %2690 = vmatprep.subr.mxu1 %v2837_v8  ;;  %2688 = vmatmul.mubr.msk.f32.vlgmr.msra.gmra.mxu1 %vm639_vm0, %v636_v25 }
 0x158   : > { %2692 = vmatprep.mubr.msk.f32.mxu1 %vm2838_vm1, %v2837_v8 }
 0x207   : > { %v748_v26 = vpop.f32.mrf.mxu1 }
 0x208   : > { %v749_v34 = vadd.f32 %v2563_v31, %v748_v26 }
 0x209   : > { %v2667_v27 = vpop.f32.mrf.mxu1 }
 0x20a   : > { %v752_v37 = vmul.f32 0.35355338, %v749_v34 }
 0x20f   : > { %v833_v29 = vpop.f32.mrf.mxu1 }
 0x210   : > { %v834_v30 = vadd.f32 %v2565_v28, %v833_v29 }
 0x211   : > { %v2678_v32 = vpop.f32.mrf.mxu1 }
 0x212   : > { %1071 = vrot.lane.b32.xlu0 %v834_v30, %s2839_s27  ;;  %1065 = vrot.lane.b32.xlu1 %v834_v30, %s2840_s28 }
 0x216   : > { %1068 = vrot.lane.b32.xlu1 %v834_v30, %s2841_s2 }
 0x21a   : > { %919 = vrot.lane.b32.xlu1 %v752_v37, %s2840_s28 }
 0x21e   : > { %922 = vrot.lane.b32.xlu1 %v752_v37, %s2841_s2 }
 0x222   : > { %925 = vrot.lane.b32.xlu1 %v752_v37, %s2839_s27 }
 0x284   : > { %v1072_v46 = vpop.permute.xlu0 %1071  ;;  %v1066_v47 = vpop.permute.xlu1 %1065 }
 0x285   : > { %v1090_v50 = vcombine.low %v1066_v47, %v1072_v46  ;;  %v1091_v51 = vcombine.high %v1066_v47, %v1072_v46 }
 0x287   : > { %v1098_v56 = vrot.slane %v1090_v50, %v3055_v49  ;;  %v1105_v57 = vrot.slane %v1091_v51, %v3055_v49 }
 0x288   : > { %v1069_v52 = vpop.permute.xlu1 %1068 }
 0x289   : > { %v1074_v53 = vcombine.low %v834_v30, %v1069_v52  ;;  %v1075_v54 = vcombine.high %v834_v30, %v1069_v52 }
 0x28b   : > { %v1082_v58 = vrot.slane %v1074_v53, %v3055_v49  ;;  %v1089_v59 = vrot.slane %v1075_v54, %v3055_v49 }
 0x28c   : > { %v920_v60 = vpop.permute.xlu1 %919 }
 0x28d   : > { %v1106_v61 = vcombine.low %v1082_v58, %v1098_v56  ;;  %v1107_v62 = vcombine.high %v1082_v58, %v1098_v56  ;;  %v1122_v63 = vcombine.low %v1089_v59, %v1105_v57  ;;  %v1123_v1 = vcombine.high %v1089_v59, %v1105_v57 }
 0x28f   : > { %v1114_v2 = vrot.slane %v1106_v61, %v3057_v55  ;;  %v1121_v3 = vrot.slane %v1107_v62, %v3057_v55  ;;  %v1130_v4 = vrot.slane %v1122_v63, %v3057_v55  ;;  %v1137_v5 = vrot.slane %v1123_v1, %v3057_v55 }
 0x290   : > { %v923_v6 = vpop.permute.xlu1 %922 }
 0x291   : > { %v1142_v7 = vcombine.low %v1114_v2, %v1121_v3  ;;  %v2571_v9 = vcombine.high %v1114_v2, %v1121_v3  ;;  %v1158_v10 = vcombine.low %v1130_v4, %v1137_v5  ;;  %v2572_v11 = vcombine.high %v1130_v4, %v1137_v5  ;;  %v914_v4 = vpop.f32.mrf.mxu1 }
 0x292   : > { %v928_v12 = vcombine.low %v752_v37, %v923_v6  ;;  %v929_v13 = vcombine.high %v752_v37, %v923_v6  ;;  %v1356_v6 = vld [vmem:[%s630_s22] sm:$0xff] }
 0x293   : > { %v1149_v14 = vrot.slane %v1142_v7, %v3055_v49  ;;  %v1157_v15 = vrot.slane %v2571_v9, %v3055_v49  ;;  %v1165_v16 = vrot.slane %v1158_v10, %v3055_v49  ;;  %v1173_v17 = vrot.slane %v2572_v11, %v3055_v49  ;;  %v2689_v5 = vpop.f32.mrf.mxu1  ;;  %v1358_v9 = vld [vmem:[%s630_s22 + $0x10] sm:$0xff] }
 0x294   : > { %v926_v18 = vpop.permute.xlu1 %925  ;;  %v936_v23 = vrot.slane %v928_v12, %v3055_v49  ;;  %v943_v24 = vrot.slane %v929_v13, %v3055_v49 }
 0x295   : > { %v1174_v19 = vcombine.low %v1149_v14, %v1157_v15  ;;  %v1190_v20 = vcombine.low %v1165_v16, %v1173_v17  ;;  %v944_v21 = vcombine.low %v920_v60, %v926_v18  ;;  %v945_v22 = vcombine.high %v920_v60, %v926_v18 }
 0x296   : > { %v1175_v25 = vcombine.high %v1149_v14, %v1157_v15  ;;  %v1191_v26 = vcombine.high %v1165_v16, %v1173_v17  ;;  %v1357_v14 = vld [vmem:[%s630_s22 + $0x8] sm:$0xff] }
 0x297   : > { %v952_v27 = vrot.slane %v944_v21, %v3055_v49  ;;  %v959_v28 = vrot.slane %v945_v22, %v3055_v49  ;;  %v1182_v29 = vrot.slane %v1174_v19, %v3057_v55  ;;  %v1198_v30 = vrot.slane %v1190_v20, %v3057_v55  ;;  %v1359_v20 = vld [vmem:[%s630_s22 + $0x18] sm:$0xff]  ;;  %s2846_s22 = smov 24  }
 0x298   : > { %v1189_v31 = vrot.slane %v1175_v25, %v3057_v55  ;;  %v1205_v32 = vrot.slane %v1191_v26, %v3057_v55 }
 0x299   : > { %v960_v33 = vcombine.low %v936_v23, %v952_v27  ;;  %v961_v34 = vcombine.high %v936_v23, %v952_v27  ;;  %v976_v35 = vcombine.low %v943_v24, %v959_v28  ;;  %v977_v36 = vcombine.high %v943_v24, %v959_v28  ;;  %v2567_v27 = vld [vmem:[%s3325_s10] ss:$0 sm:$0xff] }
 0x29a   : > { %v1206_v37 = vcombine.low %v1182_v29, %v1198_v30  ;;  %v1208_v38 = vcombine.low %v1189_v31, %v1205_v32  ;;  %v1207_v63 = vcombine.high %v1182_v29, %v1198_v30  ;;  %v1209_v2 = vcombine.high %v1189_v31, %v1205_v32 }
 0x29b   : > { %v968_v39 = vrot.slane %v960_v33, %v3057_v55  ;;  %v975_v40 = vrot.slane %v961_v34, %v3057_v55  ;;  %v984_v41 = vrot.slane %v976_v35, %v3057_v55  ;;  %v991_v42 = vrot.slane %v977_v36, %v3057_v55 }
 0x29c   : > { %2691 = vmatpush3.xpose.msk.msra.mxu1 %vm1360_vm2, %v1206_v37  ;;  %2701 = vmatpush3.xpose.msk.msra.mxu0 %vm1360_vm2, %v1208_v38  ;;  %v915_v28 = vadd.f32 %v2567_v27, %v914_v4 }
 0x29d   : > { %v996_v43 = vcombine.low %v968_v39, %v975_v40  ;;  %v2569_v44 = vcombine.high %v968_v39, %v975_v40  ;;  %v1012_v45 = vcombine.low %v984_v41, %v991_v42  ;;  %v2570_v46 = vcombine.high %v984_v41, %v991_v42  ;;  %2695 = vmatprep.subr.mxu1 %v2837_v8 }
 0x29e   : > { %2710 = vmatprep.subr.mxu0 %v2837_v8 }
 0x29f   : > { %v1003_v47 = vrot.slane %v996_v43, %v3055_v49  ;;  %v1011_v48 = vrot.slane %v2569_v44, %v3055_v49  ;;  %v1019_v50 = vrot.slane %v1012_v45, %v3055_v49  ;;  %v1027_v51 = vrot.slane %v2570_v46, %v3055_v49 }
 0x2a1   : > { %v1028_v52 = vcombine.low %v1003_v47, %v1011_v48  ;;  %v1044_v53 = vcombine.low %v1019_v50, %v1027_v51  ;;  %v1029_v54 = vcombine.high %v1003_v47, %v1011_v48  ;;  %v1045_v56 = vcombine.high %v1019_v50, %v1027_v51 }
 0x2a3   : > { %v1036_v57 = vrot.slane %v1028_v52, %v3057_v55  ;;  %v1052_v58 = vrot.slane %v1044_v53, %v3057_v55  ;;  %v1043_v59 = vrot.slane %v1029_v54, %v3057_v55  ;;  %v1059_v60 = vrot.slane %v1045_v56, %v3057_v55 }
 0x2a5   : > { %v1060_v61 = vcombine.low %v1036_v57, %v1052_v58  ;;  %v1062_v62 = vcombine.low %v1043_v59, %v1059_v60  ;;  %v1061_v1 = vcombine.high %v1036_v57, %v1052_v58  ;;  %v1063_v3 = vcombine.high %v1043_v59, %v1059_v60 }
 0x2a7   : > { %2693 = vmatmul.mubr.msk.f32.vlgmr.msra.gmra.mxu1 %vm1360_vm2, %v1060_v61  ;;  %2703 = vmatmul.mubr.msk.f32.vlgmr.msra.gmra.mxu0 %vm1360_vm2, %v1062_v62 }
 0x2a8   : > { %2696 = vmatpush3.xpose.msk.msra.mxu1 %vm1360_vm2, %v1207_v63  ;;  %2697 = vmatprep.mubr.msk.f32.mxu1 %vm2838_vm1, %v2837_v8 }
 0x2a9   : > { %2705 = vmatprep.subr.mxu1 %v2837_v8  ;;  %2712 = vmatprep.mubr.msk.f32.mxu0 %vm2838_vm1, %v2837_v8 }
 0x2ab   : > { %2698 = vmatmul.mubr.msk.f32.vlgmr.msra.gmra.mxu1 %vm1360_vm2, %v1061_v1 }
 0x2ac   : > { %2706 = vmatpush3.xpose.msk.msra.mxu1 %vm1360_vm2, %v1209_v2  ;;  %2707 = vmatprep.mubr.msk.f32.mxu1 %vm2838_vm1, %v2837_v8 }
 0x2ad   : > { %2715 = vmatprep.subr.mxu1 %v2837_v8 }
 0x2af   : > { %2708 = vmatmul.mubr.msk.f32.vlgmr.msra.gmra.mxu1 %vm1360_vm2, %v1063_v3 }
 0x2b0   : > { %2717 = vmatprep.mubr.msk.f32.mxu1 %vm2838_vm1, %v2837_v8 }
 0x367   : > { %v1433_v7 = vpop.f32.mrf.mxu1  ;;  %v1585_v10 = vpop.f32.mrf.mxu0 }
 0x368   : > { %v1434_v11 = vadd.f32 %v1433_v7, %v1356_v6  ;;  %v1586_v15 = vadd.f32 %v1585_v10, %v1358_v9 }
 0x369   : > { %v2694_v12 = vpop.f32.mrf.mxu1  ;;  %v2704_v13 = vpop.f32.mrf.mxu0 }
 0x36a   : > { %v1665_v16 = vsel %vm1360_vm2, %v1434_v11, -inf  ;;  %v1671_v21 = vsel %vm1360_vm2, %v1586_v15, -inf }
 0x36b   : > { %1666 = vmax.xlane.f32.xlu1 %v1665_v16  ;;  %v1509_v17 = vpop.f32.mrf.mxu1 }
 0x36c   : > { %v1510_v18 = vadd.f32 %v1509_v17, %v1357_v14 }
 0x36d   : > { %v2699_v19 = vpop.f32.mrf.mxu1 }
 0x36e   : > { %v1668_v22 = vsel %vm1360_vm2, %v1510_v18, -inf }
 0x36f   : > { %1672 = vmax.xlane.f32.xlu1 %v1671_v21  ;;  %1669 = vmax.xlane.f32.xlu0 %v1668_v22  ;;  %v1661_v23 = vpop.f32.mrf.mxu1 }
 0x370   : > { %v1662_v24 = vadd.f32 %v1661_v23, %v1359_v20 }
 0x371   : > { %v2709_v25 = vpop.f32.mrf.mxu1 }
 0x372   : > { %v1674_v26 = vsel %vm1360_vm2, %v1662_v24, -inf }
 0x373   : > { %1675 = vmax.xlane.f32.xlu1 %v1674_v26 }
 0x384   : > { %1214 = vrot.lane.b32.xlu1 %v915_v28, %s2841_s2 }
 0x3f4   : > { %v1667_v29 = vpop.xlane.xlu1 %1666 }
 0x3f5   : > { %v1677_v30 = vsub.f32 %v1434_v11, %v1667_v29 }
 0x3f7   : > { %v1681_v31 = vmul.f32 1.442695, %v1677_v30 }
 0x3f8   : > { %v1673_v32 = vpop.xlane.xlu1 %1672  ;;  %v1670_v33 = vpop.xlane.xlu0 %1669 }
 0x3f9   : > { %2807 = vpow2.f32 %v1681_v31  ;;  %v1679_v34 = vsub.f32 %v1586_v15, %v1673_v32  ;;  %v1678_v35 = vsub.f32 %v1510_v18, %v1670_v33 }
 0x3fb   : > { %v1685_v36 = vmul.f32 1.442695, %v1679_v34  ;;  %v1683_v37 = vmul.f32 1.442695, %v1678_v35 }
 0x3fc   : > { %v1676_v38 = vpop.xlane.xlu1 %1675 }
 0x3fd   : > { %2809 = vpow2.f32 %v1685_v36  ;;  %v1680_v39 = vsub.f32 %v1662_v24, %v1676_v38 }
 0x3fe   : > { %2811 = vpow2.f32 %v1683_v37 }
 0x3ff   : > { %v1687_v40 = vmul.f32 1.442695, %v1680_v39 }
 0x400   : > { %v1215_v50 = vpop.permute.xlu1 %1214 }
 0x401   : > { %2813 = vpow2.f32 %v1687_v40  ;;  %v1220_v56 = vcombine.low %v915_v28, %v1215_v50  ;;  %v1221_v57 = vcombine.high %v915_v28, %v1215_v50  ;;  %v2157_v40 = vld [vmem:[%s3326_s11 + $0x18] sm:$0xff] }
 0x403   : > { %v1228_v62 = vrot.slane %v1220_v56, %v3055_v49  ;;  %v1235_v63 = vrot.slane %v1221_v57, %v3055_v49 }
 0x406   : > { %v2808_v41 = vpop.eup %2807 }
 0x407   : > { %v1689_v42 = vsel %vm1360_vm2, %v2808_v41, 0.0 }
 0x408   : > { %1690 = vadd.xlane.f32.xlu0 %v1689_v42 }
 0x40a   : > { %v3124_v43 = vpop.eup %2809 }
 0x40b   : > { %v2812_v44 = vpop.eup %2811  ;;  %v1695_v45 = vsel %vm1360_vm2, %v3124_v43, 0.0 }
 0x40c   : > { %1696 = vadd.xlane.f32.xlu0 %v1695_v45  ;;  %v1692_v46 = vsel %vm1360_vm2, %v2812_v44, 0.0 }
 0x40d   : > { %1693 = vadd.xlane.f32.xlu1 %v1692_v46 }
 0x40e   : > { %v3129_v47 = vpop.eup %2813 }
 0x40f   : > { %v1698_v48 = vsel %vm1360_vm2, %v3129_v47, 0.0 }
 0x411   : > { %1699 = vadd.xlane.f32.xlu1 %v1698_v48 }
 0x422   : > { %1217 = vrot.lane.b32.xlu1 %v915_v28, %s2839_s27  ;;  %1211 = vrot.lane.b32.xlu0 %v915_v28, %s2840_s28 }
 0x491   : > { %v1691_v51 = vpop.xlane.xlu0 %1690 }
 0x492   : > { %2815 = vrcp.f32 %v1691_v51 }
 0x495   : > { %v1697_v53 = vpop.xlane.xlu0 %1696 }
 0x496   : > { %v1694_v52 = vpop.xlane.xlu1 %1693 }
 0x497   : > { %2817 = vrcp.f32 %v1694_v52 }
 0x498   : > { %2819 = vrcp.f32 %v1697_v53 }
 0x499   : > { %v1212_v58 = vpop.permute.xlu0 %1211 }
 0x49a   : > { %v1700_v54 = vpop.xlane.xlu1 %1699 }
 0x49b   : > { %2821 = vrcp.f32 %v1700_v54 }
 0x49e   : > { %v1218_v59 = vpop.permute.xlu1 %1217 }
 0x49f   : > { %v1236_v60 = vcombine.low %v1212_v58, %v1218_v59  ;;  %v1237_v61 = vcombine.high %v1212_v58, %v1218_v59  ;;  %v2816_v24 = vpop.eup %2815 }
 0x4a0   : > { %v1702_v33 = vmul.f32 %v2816_v24, %v2808_v41 }
 0x4a1   : > { %v1244_v1 = vrot.slane %v1236_v60, %v3055_v49  ;;  %v1251_v2 = vrot.slane %v1237_v61, %v3055_v49 }
 0x4a3   : > { %v1252_v3 = vcombine.low %v1228_v62, %v1244_v1  ;;  %v1253_v4 = vcombine.high %v1228_v62, %v1244_v1  ;;  %v1268_v5 = vcombine.low %v1235_v63, %v1251_v2  ;;  %v1269_v6 = vcombine.high %v1235_v63, %v1251_v2  ;;  %v2156_v63 = vld [vmem:[%s3326_s11 + $0x10] sm:$0xff]  ;;  %v2155_v1 = vld [vmem:[%s3326_s11 + $0x8] sm:$0xff] }
 0x4a4   : > { %v2818_v25 = vpop.eup %2817 }
 0x4a5   : > { %v1260_v7 = vrot.slane %v1252_v3, %v3057_v55  ;;  %v1267_v9 = vrot.slane %v1253_v4, %v3057_v55  ;;  %v1276_v10 = vrot.slane %v1268_v5, %v3057_v55  ;;  %v1283_v11 = vrot.slane %v1269_v6, %v3057_v55  ;;  %v2820_v30 = vpop.eup %2819 }
 0x4a6   : > { %v1704_v34 = vmul.f32 %v2818_v25, %v2812_v44  ;;  %v1706_v38 = vmul.f32 %v2820_v30, %v3124_v43 }
 0x4a7   : > { %v1288_v12 = vcombine.low %v1260_v7, %v1267_v9  ;;  %v2573_v13 = vcombine.high %v1260_v7, %v1267_v9  ;;  %v1304_v14 = vcombine.low %v1276_v10, %v1283_v11  ;;  %v2574_v15 = vcombine.high %v1276_v10, %v1283_v11  ;;  %v2154_v11 = vld [vmem:[%s3326_s11] sm:$0xff] }
 0x4a8   : > { %v2822_v35 = vpop.eup %2821 }
 0x4a9   : > { %v1295_v16 = vrot.slane %v1288_v12, %v3055_v49  ;;  %v1303_v17 = vrot.slane %v2573_v13, %v3055_v49  ;;  %v1311_v18 = vrot.slane %v1304_v14, %v3055_v49  ;;  %v1319_v19 = vrot.slane %v2574_v15, %v3055_v49 }
 0x4aa   : > { %v1708_v39 = vmul.f32 %v2822_v35, %v3129_v47 }
 0x4ab   : > { %v1320_v20 = vcombine.low %v1295_v16, %v1303_v17  ;;  %v1336_v21 = vcombine.low %v1311_v18, %v1319_v19  ;;  %v1321_v22 = vcombine.high %v1295_v16, %v1303_v17  ;;  %v1337_v23 = vcombine.high %v1311_v18, %v1319_v19 }
 0x4ad   : > { %v1328_v26 = vrot.slane %v1320_v20, %v3057_v55  ;;  %v1344_v27 = vrot.slane %v1336_v21, %v3057_v55  ;;  %v1335_v28 = vrot.slane %v1321_v22, %v3057_v55  ;;  %v1351_v29 = vrot.slane %v1337_v23, %v3057_v55 }
 0x4af   : > { %v1352_v31 = vcombine.low %v1328_v26, %v1344_v27  ;;  %v1353_v32 = vcombine.high %v1328_v26, %v1344_v27  ;;  %v1354_v36 = vcombine.low %v1335_v28, %v1351_v29  ;;  %v1355_v37 = vcombine.high %v1335_v28, %v1351_v29 }
 0x4b1   : > { %2711 = vmatpush3.msra.mxu0 %v1352_v31  ;;  %2716 = vmatpush3.msra.mxu1 %v1353_v32 }
 0x4b2   : > { %2713 = vmatmul.mubr.msk.f32.vlgmr.msra.gmra.mxu0 %vm1360_vm2, %v1702_v33  ;;  %2718 = vmatmul.mubr.msk.f32.vlgmr.msra.gmra.mxu1 %vm1360_vm2, %v1704_v34 }
 0x4b3   : > { %2720 = vmatprep.subr.mxu0 %v2837_v8  ;;  %2725 = vmatprep.subr.mxu1 %v2837_v8 }
 0x4b4   : > { %2721 = vmatpush3.msra.mxu0 %v1354_v36  ;;  %2726 = vmatpush3.msra.mxu1 %v1355_v37 }
 0x4b5   : > { %2722 = vmatprep.mubr.msk.f32.mxu0 %vm2838_vm1, %v2837_v8  ;;  %2727 = vmatprep.mubr.msk.f32.mxu1 %vm2838_vm1, %v2837_v8 }
 0x4b6   : > { %2723 = vmatmul.mubr.msk.f32.vlgmr.msra.gmra.mxu0 %vm1360_vm2, %v1706_v38  ;;  %2728 = vmatmul.mubr.msk.f32.vlgmr.msra.gmra.mxu1 %vm1360_vm2, %v1708_v39 }
 0x4b7   : > { %2730 = vmatprep.subr.mxu0 %v2837_v8  ;;  %2738 = vmatprep.mubr.msk.f32.mxu0 %vm2838_vm1, %v2837_v8 }
 0x4b8   : > { %2741 = vmatprep.subr.mxu1 %v2837_v8  ;;  %2749 = vmatprep.mubr.msk.f32.mxu1 %vm2838_vm1, %v2837_v8 }
 0x4b9   : > { %2731 = vmatpush3.msra.mxu0 %v2157_v40 }
 0x4ba   : > { %2732 = vmatprep.subr.mxu0 %v2837_v8 }
 0x4bb   : > { %2733 = vmatpush3.msra.mxu0 %v2156_v63  ;;  %v2388_v63 = vld [vmem:[%s3332_s17 + $0x48] sm:$0xff] }
 0x4bc   : > { %2734 = vmatprep.subr.mxu0 %v2837_v8 }
 0x4bd   : > { %2735 = vmatpush3.msra.mxu0 %v2155_v1  ;;  %v2387_v1 = vld [vmem:[%s3332_s17 + $0x40] sm:$0xff] }
 0x4be   : > { %2736 = vmatprep.subr.mxu0 %v2837_v8 }
 0x4bf   : > { %2737 = vmatpush3.msra.mxu0 %v2154_v11  ;;  %v2593_v11 = vld [vmem:[%s3331_s16] ss:$0 sm:$0xff] }
 0x4c0   : > { %2752 = vmatprep.subr.mxu0 %v2837_v8 }
 0x572   : > { %v1778_v41 = vpop.f32.mrf.mxu0  ;;  %v1851_v42 = vpop.f32.mrf.mxu1 }
 0x574   : > { %v2714_v43 = vpop.f32.mrf.mxu0  ;;  %v2719_v44 = vpop.f32.mrf.mxu1 }
 0x575   : > { %v2271_v43 = vld [vmem:[%s3330_s15 + $0x18] sm:$0xff]  ;;  %v2269_v44 = vld [vmem:[%s3330_s15 + $0x8] sm:$0xff] }
 0x576   : > { %v1924_v45 = vpop.f32.mrf.mxu0  ;;  %v1997_v46 = vpop.f32.mrf.mxu1  ;;  %2742 = vmatpush3.msra.mxu1 %v2271_v43 }
 0x577   : > { %v2001_v47 = vcombine.low %v1778_v41, %v1924_v45  ;;  %v2002_v48 = vcombine.high %v1778_v41, %v1924_v45  ;;  %v2017_v50 = vcombine.low %v1851_v42, %v1997_v46  ;;  %v2018_v51 = vcombine.high %v1851_v42, %v1997_v46  ;;  %2743 = vmatprep.subr.mxu1 %v2837_v8  ;;  %v2268_v45 = vld [vmem:[%s3330_s15] sm:$0xff] }
 0x578   : > { %v2724_v52 = vpop.f32.mrf.mxu0  ;;  %v2729_v53 = vpop.f32.mrf.mxu1 }
 0x579   : > { %v2009_v54 = vrot.slane %v2001_v47, %v3055_v49  ;;  %v2016_v56 = vrot.slane %v2002_v48, %v3055_v49  ;;  %v2025_v57 = vrot.slane %v2017_v50, %v3055_v49  ;;  %v2032_v58 = vrot.slane %v2018_v51, %v3055_v49  ;;  %v2591_v51 = vld [vmem:[%s3328_s13] ss:$0 sm:$0xff] }
 0x57a   : > { %v2592_v53 = vld [vmem:[%s3329_s14] ss:$0 sm:$0xff] }
 0x57b   : > { %v2033_v59 = vcombine.low %v2009_v54, %v2025_v57  ;;  %v2034_v60 = vcombine.high %v2009_v54, %v2025_v57  ;;  %v2049_v61 = vcombine.low %v2016_v56, %v2032_v58  ;;  %v2050_v62 = vcombine.high %v2016_v56, %v2032_v58  ;;  %v2394_v57 = vld [vmem:[%s3332_s17 + $0x78] sm:$0xff]  ;;  %v2393_v58 = vld [vmem:[%s3332_s17 + $0x70] sm:$0xff] }
 0x57d   : > { %v2041_v2 = vrot.slane %v2033_v59, %v3057_v55  ;;  %v2048_v3 = vrot.slane %v2034_v60, %v3057_v55  ;;  %v2057_v4 = vrot.slane %v2049_v61, %v3057_v55  ;;  %v2064_v5 = vrot.slane %v2050_v62, %v3057_v55  ;;  %v2392_v59 = vld [vmem:[%s3332_s17 + $0x68] sm:$0xff]  ;;  %v2391_v60 = vld [vmem:[%s3332_s17 + $0x60] sm:$0xff]  ;;  %v2390_v61 = vld [vmem:[%s3332_s17 + $0x58] sm:$0xff] }
 0x57e   : > { %v2389_v62 = vld [vmem:[%s3332_s17 + $0x50] sm:$0xff] }
 0x57f   : > { %v2069_v6 = vcombine.low %v2041_v2, %v2048_v3  ;;  %v2587_v7 = vcombine.high %v2041_v2, %v2048_v3  ;;  %v2085_v9 = vcombine.low %v2057_v4, %v2064_v5  ;;  %v2588_v10 = vcombine.high %v2057_v4, %v2064_v5  ;;  %v2386_v2 = vld [vmem:[%s3332_s17 + $0x38] sm:$0xff]  ;;  %v2385_v3 = vld [vmem:[%s3332_s17 + $0x30] sm:$0xff]  ;;  %v2384_v4 = vld [vmem:[%s3332_s17 + $0x28] sm:$0xff] }
 0x580   : > { %v2383_v5 = vld [vmem:[%s3332_s17 + $0x20] sm:$0xff] }
 0x581   : > { %v2076_v12 = vrot.slane %v2069_v6, %v3055_v49  ;;  %v2084_v13 = vrot.slane %v2587_v7, %v3055_v49  ;;  %v2092_v14 = vrot.slane %v2085_v9, %v3055_v49  ;;  %v2100_v15 = vrot.slane %v2588_v10, %v3055_v49  ;;  %v2382_v6 = vld [vmem:[%s3332_s17 + $0x18] sm:$0xff]  ;;  %v2381_v7 = vld [vmem:[%s3332_s17 + $0x10] sm:$0xff]  ;;  %v2380_v9 = vld [vmem:[%s3332_s17 + $0x8] sm:$0xff] }
 0x582   : > { %v2379_v10 = vld [vmem:[%s3332_s17] sm:$0xff] }
 0x583   : > { %v2102_v16 = vcombine.high %v2076_v12, %v2084_v13  ;;  %v2118_v17 = vcombine.high %v2092_v14, %v2100_v15  ;;  %v2101_v18 = vcombine.low %v2076_v12, %v2084_v13  ;;  %v2117_v19 = vcombine.low %v2092_v14, %v2100_v15 }
 0x585   : > { %v2116_v20 = vrot.slane %v2102_v16, %v3057_v55  ;;  %v2132_v21 = vrot.slane %v2118_v17, %v3057_v55  ;;  %v2109_v22 = vrot.slane %v2101_v18, %v3057_v55  ;;  %v2125_v23 = vrot.slane %v2117_v19, %v3057_v55  ;;  %v2589_v55 = vld [vmem:[%s3327_s12] ss:$0 sm:$0xff] }
 0x587   : > { %v2135_v24 = vcombine.low %v2116_v20, %v2132_v21  ;;  %v2134_v25 = vcombine.high %v2109_v22, %v2125_v23  ;;  %v2133_v26 = vcombine.low %v2109_v22, %v2125_v23  ;;  %v2136_v49 = vcombine.high %v2116_v20, %v2132_v21 }
 0x589   : > { %2142 = vrot.lane.b32.xlu1 %v2135_v24, %s2844_s21  ;;  %2138 = vrot.lane.b32.xlu0 %v2134_v25, %s2845_s1 }
 0x58d   : > { %2146 = vrot.lane.b32.xlu0 %v2136_v49, %s2846_s22 }
 0x5fb   : > { %v2139_v27 = vpop.permute.xlu0 %2138  ;;  %v2143_v28 = vpop.permute.xlu1 %2142 }
 0x5fc   : > { %v2149_v29 = vsel %vm1360_vm2, %v2133_v26, %v2139_v27 }
 0x5fd   : > { %v2151_v31 = vsel %vm2150_vm3, %v2149_v29, %v2143_v28 }
 0x5ff   : > { %v2147_v30 = vpop.permute.xlu0 %2146 }
 0x600   : > { %v2153_v32 = vsel %vm2152_vm4, %v2151_v31, %v2147_v30 }
 0x601   : > { %2739 = vmatmul.mubr.msk.f32.vlgmr.msra.gmra.mxu0 %vm639_vm0, %v2153_v32 }
 0x602   : > { %2784 = vmatprep.mubr.msk.f32.mxu0 %vm2838_vm1, %v2837_v8  ;;  %2753 = vmatpush3.msra.mxu0 %v2394_v57 }
 0x603   : > { %2754 = vmatprep.subr.mxu0 %v2837_v8 }
 0x604   : > { %2755 = vmatpush3.msra.mxu0 %v2393_v58 }
 0x605   : > { %2756 = vmatprep.subr.mxu0 %v2837_v8 }
 0x606   : > { %2757 = vmatpush3.msra.mxu0 %v2392_v59 }
 0x607   : > { %2758 = vmatprep.subr.mxu0 %v2837_v8 }
 0x608   : > { %2759 = vmatpush3.msra.mxu0 %v2391_v60 }
 0x609   : > { %2760 = vmatprep.subr.mxu0 %v2837_v8 }
 0x60a   : > { %2761 = vmatpush3.msra.mxu0 %v2390_v61 }
 0x60b   : > { %2762 = vmatprep.subr.mxu0 %v2837_v8 }
 0x60c   : > { %2763 = vmatpush3.msra.mxu0 %v2389_v62 }
 0x60d   : > { %2764 = vmatprep.subr.mxu0 %v2837_v8 }
 0x60e   : > { %2765 = vmatpush3.msra.mxu0 %v2388_v63 }
 0x60f   : > { %2766 = vmatprep.subr.mxu0 %v2837_v8 }
 0x610   : > { %2767 = vmatpush3.msra.mxu0 %v2387_v1 }
 0x611   : > { %2768 = vmatprep.subr.mxu0 %v2837_v8 }
 0x612   : > { %2769 = vmatpush3.msra.mxu0 %v2386_v2 }
 0x613   : > { %2770 = vmatprep.subr.mxu0 %v2837_v8 }
 0x614   : > { %2771 = vmatpush3.msra.mxu0 %v2385_v3 }
 0x615   : > { %2772 = vmatprep.subr.mxu0 %v2837_v8 }
 0x616   : > { %2773 = vmatpush3.msra.mxu0 %v2384_v4 }
 0x617   : > { %2774 = vmatprep.subr.mxu0 %v2837_v8 }
 0x618   : > { %2775 = vmatpush3.msra.mxu0 %v2383_v5 }
 0x619   : > { %2776 = vmatprep.subr.mxu0 %v2837_v8 }
 0x61a   : > { %2777 = vmatpush3.msra.mxu0 %v2382_v6 }
 0x61b   : > { %2778 = vmatprep.subr.mxu0 %v2837_v8 }
 0x61c   : > { %2779 = vmatpush3.msra.mxu0 %v2381_v7 }
 0x61d   : > { %2780 = vmatprep.subr.mxu0 %v2837_v8 }
 0x61e   : > { %2781 = vmatpush3.msra.mxu0 %v2380_v9 }
 0x61f   : > { %2782 = vmatprep.subr.mxu0 %v2837_v8 }
 0x620   : > { %2783 = vmatpush3.msra.mxu0 %v2379_v10 }
 0x6c1   : > { %v2234_v33 = vpop.f32.mrf.mxu0 }
 0x6c2   : > { %v2235_v34 = vadd.f32 %v2589_v55, %v2234_v33 }
 0x6c3   : > { %v2740_v35 = vpop.f32.mrf.mxu0 }
 0x6c4   : > { %v3209_v36 = vadd.f32 %v2235_v34, %v2964_v0  ;;  %v2270_v0 = vld [vmem:[%s3330_s15 + $0x10] sm:$0xff] }
 0x6c5   : > { %2744 = vmatpush3.msra.mxu1 %v2270_v0 }
 0x6c6   : > { %v2241_v37 = vsel %vm639_vm0, %v3209_v36, 0.0  ;;  %2745 = vmatprep.subr.mxu1 %v2837_v8 }
 0x6c7   : > { %2242 = vadd.xlane.f32.xlu1 %v2241_v37  ;;  %2746 = vmatpush3.msra.mxu1 %v2269_v44 }
 0x6c8   : > { %2747 = vmatprep.subr.mxu1 %v2837_v8 }
 0x6c9   : > { %2748 = vmatpush3.msra.mxu1 %v2268_v45 }
 0x750   : > { %v2243_v38 = vpop.xlane.xlu1 %2242 }
 0x751   : > { %v2244_v39 = vmul.f32 0.03125, %v2243_v38  ;;  %v2595_v38 = vld [vmem:[%s3333_s18] ss:$0 sm:$0xff] }
 0x753   : > { %v2245_v40 = vsub.f32 %v3209_v36, %v2244_v39 }
 0x755   : > { %v2246_v41 = vmul.f32 %v2245_v40, %v2245_v40 }
 0x757   : > { %v2247_v42 = vsel %vm639_vm0, %v2246_v41, 0.0 }
 0x758   : > { %2248 = vadd.xlane.f32.xlu0 %v2247_v42 }
 0x7e1   : > { %v2249_v46 = vpop.xlane.xlu0 %2248 }
 0x7e2   : > { %v2250_v47 = vmul.f32 0.03125, %v2249_v46 }
 0x7e4   : > { %v2251_v48 = vadd.f32 1e-05, %v2250_v47 }
 0x7e6   : > { %2823 = vrsqrt.f32 %v2251_v48 }
 0x7f3   : > { %v2824_v50 = vpop.eup %2823 }
 0x7f4   : > { %v2253_v52 = vmul.f32 %v2824_v50, %v2245_v40 }
 0x7f6   : > { %v2260_v54 = vmul.f32 %v2591_v51, %v2253_v52 }
 0x7f8   : > { %v2267_v56 = vadd.f32 %v2592_v53, %v2260_v54 }
 0x7fa   : > { %2750 = vmatmul.mubr.msk.f32.vlgmr.msra.gmra.mxu1 %vm639_vm0, %v2267_v56 }
 0x8ba   : > { %v2348_v12 = vpop.f32.mrf.mxu1 }
 0x8bb   : > { %v2349_v13 = vadd.f32 %v2593_v11, %v2348_v12 }
 0x8bc   : > { %v2751_v14 = vpop.f32.mrf.mxu1 }
 0x8bd   : > { %v2353_v15 = vmul.f32 0.70710677, %v2349_v13  ;;  %v2352_v34 = vmul.f32 0.5, %v2349_v13 }
 0x8bf   : > { %v2354_v16 = vand.u32 2147483647, %v2353_v15  ;;  %vm2374_vm5 = vcmp.lt.f32.partialorder %v2353_v15, 0.0 }
 0x8c1   : > { %v2355_v17 = vmul.f32 0.3275911, %v2354_v16  ;;  %v2368_v19 = vmul.f32 %v2354_v16, %v2354_v16 }
 0x8c3   : > { %v2356_v18 = vadd.f32 1.0, %v2355_v17  ;;  %v2369_v20 = vsub.f32 0.0, %v2368_v19 }
 0x8c5   : > { %2825 = vrcp.f32 %v2356_v18  ;;  %v2370_v23 = vmul.f32 1.442695, %v2369_v20 }
 0x8c7   : > { %2827 = vpow2.f32 %v2370_v23 }
 0x8d2   : > { %v2826_v21 = vpop.eup %2825 }
 0x8d3   : > { %v2359_v22 = vmul.f32 1.0614054, %v2826_v21 }
 0x8d4   : > { %v2828_v30 = vpop.eup %2827 }
 0x8d5   : > { %v2360_v24 = vadd.f32 -1.4531521, %v2359_v22 }
 0x8d7   : > { %v2361_v8 = vmul.f32 %v2826_v21, %v2360_v24 }
 0x8d9   : > { %v2362_v25 = vadd.f32 1.4214138, %v2361_v8 }
 0x8db   : > { %v2363_v26 = vmul.f32 %v2826_v21, %v2362_v25 }
 0x8dd   : > { %v2364_v49 = vadd.f32 -0.28449672, %v2363_v26 }
 0x8df   : > { %v2365_v27 = vmul.f32 %v2826_v21, %v2364_v49 }
 0x8e1   : > { %v2366_v28 = vadd.f32 0.2548296, %v2365_v27 }
 0x8e3   : > { %v2367_v29 = vmul.f32 %v2826_v21, %v2366_v28 }
 0x8e5   : > { %v2372_v31 = vmul.f32 %v2828_v30, %v2367_v29 }
 0x8e7   : > { %v2373_v32 = vsub.f32 1.0, %v2372_v31 }
 0x8e9   : > { %v2375_v55 = vsub.f32 0.0, %v2373_v32 }
 0x8eb   : > { %v2376_v33 = vsel %vm2374_vm5, %v2375_v55, %v2373_v32 }
 0x8ec   : > { %v2377_v35 = vadd.f32 1.0, %v2376_v33 }
 0x8ee   : > { %v2378_v37 = vmul.f32 %v2377_v35, %v2352_v34 }
 0x8f0   : > { %2785 = vmatmul.mubr.f32.vlgmr.msra.gmra.mxu0 %v2378_v37 }
 0x9b0   : > { %v2468_v39 = vpop.f32.mrf.mxu0 }
 0x9b1   : > { %v2469_v40 = vadd.f32 %v2595_v38, %v2468_v39 }
 0x9b2   : > { %v2786_v41 = vpop.f32.mrf.mxu0 }
 0x9b3   : > { %v2472_v42 = vadd.f32 %v2469_v40, %v3209_v36 }
 0x9b5   : > { %2473 = vst.msk [vmem:[%s634_s30] sm:$0xff] %vm639_vm0, %v2472_v42 }
 0x9b6 PF: > { %s29_s0 = sadd.s32 1, %s2835_s0  }
 0x9b7   : > { %p26_p4 = scmp.ge.s32.totalorder %s29_s0, 4  }
 0x9b9   :  { %28 = sbr.rel (!%p26_p4) target bundleno = 5 (0x5), region = 132 }

// kernel: bias_attention_module_fwd.8
= control target key start
LH: loop header
LB: loop body
LE: loop exit
PB: predicated region body
PF: predicated region fallthrough
CT: control target
= control target key end

     0   :  { %s2860_s27 = smov 0   ;;  %s3214_s0 = inlined_call_operand.vmem [shape: f32[2,8,32], index: 0, kind: input, shape index: {}]   ;;  %s3215_s1 = inlined_call_operand.vmem [shape: f32[2,8,16], index: 1, kind: input, shape index: {}]   ;;  %s3216_s2 = inlined_call_operand.vmem [shape: f32[1,32], index: 2, kind: input, shape index: {}]   ;;  %s3217_s3 = inlined_call_operand.vmem [shape: f32[1,32], index: 3, kind: input, shape index: {}]   ;;  %s3218_s4 = inlined_call_operand.vmem [shape: f32[32,32], index: 4, kind: input, shape index: {}]   ;;  %s3219_s5 = inlined_call_operand.vmem [shape: f32[1,32], index: 5, kind: input, shape index: {}]   ;;  %s3220_s6 = inlined_call_operand.vmem [shape: f32[16,32], index: 6, kind: input, shape index: {}]   ;;  %s3221_s7 = inlined_call_operand.vmem [shape: f32[1,32], index: 7, kind: input, shape index: {}]   ;;  %s3222_s8 = inlined_call_operand.vmem [shape: f32[16,32], index: 8, kind: input, shape index: {}]   ;;  %s3223_s9 = inlined_call_operand.vmem [shape: f32[1,32], index: 9, kind: input, shape index: {}]   ;;  %s3224_s10 = inlined_call_operand.vmem [shape: f32[32,32], index: 10, kind: input, shape index: {}]   ;;  %s3225_s11 = inlined_call_operand.vmem [shape: f32[1,32], index: 11, kind: input, shape index: {}]   ;;  %s3226_s12 = inlined_call_operand.vmem [shape: f32[1,32], index: 12, kind: input, shape index: {}]   ;;  %s3227_s13 = inlined_call_operand.vmem [shape: f32[1,32], index: 13, kind: input, shape index: {}]   ;;  %s3228_s14 = inlined_call_operand.vmem [shape: f32[32,128], index: 14, kind: input, shape index: {}]   ;;  %s3229_s15 = inlined_call_operand.vmem [shape: f32[1,128], index: 15, kind: input, shape index: {}]   ;;  %s3230_s16 = inlined_call_operand.vmem [shape: f32[128,32], index: 16, kind: input, shape index: {}]   ;;  %s3231_s17 = inlined_call_operand.vmem [shape: f32[1,32], index: 17, kind: input, shape index: {}]   ;;  %s3232_s18 = inlined_call_operand.vmem [shape: f32[2,8,32], index: 18, kind: output, shape index: {}]  }
   0x1   :  { %3233 = sst [smem:[#allocation2_spill]] %s3214_s0 }
   0x2   :  { %3234 = sst [smem:[#allocation3_spill]] %s3215_s1 }
   0x3   :  { %3235 = sst [smem:[#allocation4_spill]] %s3216_s2 }
   0x4 LB: > { %s2484_s28 = sadd.s32 4294967295, %s2753_s27   ;;  %p2488_p0 = scmp.ge.s32.totalorder %s2753_s27, 1  ;;  %s2753_s27 = sphi %s2860_s27, %s28_s27  }
   0x5   : > { %p520_p1 = scmp.lt.s32.totalorder %s2753_s27, 3 }
   0x7   : > { %p521_p2 = pnand %p2488_p0, %p520_p1 }
   0x8   : > { %p576_p3 = scmp.lt.s32.totalorder (!%p521_p2), %s2484_s28, 1  ;;  %s3236_s19 = sld [smem:[#allocation2_spill]] (!%p521_p2) }
   0x9   : > { %524 = sbr.rel (%p521_p2) target bundleno = 2524 (0x9dc), region = 92  ;;  %s3237_s0 = sld [smem:[#allocation4_spill]] (!%p521_p2) }
   0xa   : > { %s3238_s23 = sld [smem:[#allocation3_spill]] (!%p521_p2)  ;;  %s2758_s20 = smov (!%p521_p2), 120  }
   0xb   : > { %s2759_s21 = smov (!%p521_p2), 112   ;;  %s2762_s2 = smov (!%p521_p2), 16  }
   0xe   : > { %s3240_s28 = smov (!%p576_p3, %s2484_s28), 1  ;;  %vm592_vm0 = vcmask 261120   ;;  %v624_v7 = vld [vmem:[%s3218_s4 + $0x18] sm:$0xff]  ;;  %v2755_v8 = vmov 0.0   ;;  %v623_v9 = vld [vmem:[%s3218_s4 + $0x10] sm:$0xff]  ;;  %vm2756_vm1 = vmmov 0   ;;  %v883_v37 = vlaneseq }
   0xf   : > { %s2868_s29 = sshll.u32 %s3240_s28, 3  ;;  %2583 = vmatprep.subr.mxu1 %v2755_v8  ;;  %2591 = vmatprep.mubr.msk.f32.mxu1 %vm2756_vm1, %v2755_v8  ;;  %v622_v10 = vld [vmem:[%s3218_s4 + $0x8] sm:$0xff]  ;;  %v621_v11 = vld [vmem:[%s3218_s4] sm:$0xff]  ;;  %vm715_vm2 = vcmask 130048   ;;  %v2760_v35 = vmov 1983009808  }
  0x10   : > { %s579_s1 = scalar_lea.vmem %s3236_s19, %s2868_s29  ;;  %2584 = vmatpush3.msra.mxu1 %v624_v7  ;;  %2608 = vmatprep.subr.mxu0 %v2755_v8  ;;  %v2492_v16 = vld [vmem:[%s3237_s0] ss:$0 sm:$0xff]  ;;  %v707_v21 = vld [vmem:[%s3220_s6 + $0x8] sm:$0xff]  ;;  %s583_s24 = scalar_lea.vmem %s3238_s23, %s2868_s29  ;;  %v881_v36 = vunpack.c.l.s4 %v2760_v35  ;;  %v2761_v38 = vmov 1934713408   ;;  %v884_v41 = vshrl.u32 %v883_v37, 7 }
  0x11   : > { %v2874_v0 = vld [vmem:[%s579_s1] sm:$0xff]  ;;  %2585 = vmatprep.subr.mxu1 %v2755_v8  ;;  %2610 = vmatprep.mubr.msk.f32.mxu0 %vm2756_vm1, %v2755_v8  ;;  %s2757_s1 = smov 104   ;;  %v790_v32 = vld [vmem:[%s3222_s8 + $0x8] sm:$0xff]  ;;  %v913_v39 = vunpack.c.l.s4 %v2761_v38  ;;  %vm1306_vm3 = vcmask 64512   ;;  %s2763_s23 = smov 8   ;;  %vm2097_vm4 = vcmask 195584  }
  0x12   : > { %v593_v1 = vsel %vm592_vm0, %v2874_v0, 0.0  ;;  %2586 = vmatpush3.msra.mxu1 %v623_v9  ;;  %v2493_v18 = vld [vmem:[%s3217_s3] ss:$0 sm:$0xff]  ;;  %v882_v40 = vunpack.c.0.s8 %v881_v36  ;;  %s587_s25 = scalar_lea.vmem %s3232_s18, %s2868_s29 }
  0x13   : > { %594 = vadd.xlane.f32.xlu0 %v593_v1  ;;  %2587 = vmatprep.subr.mxu1 %v2755_v8  ;;  %v706_v22 = vld [vmem:[%s3220_s6] sm:$0xff]  ;;  %v914_v44 = vunpack.c.0.s8 %v913_v39 }
  0x14   : > { %2588 = vmatpush3.msra.mxu1 %v622_v10  ;;  %v589_v23 = vld [vmem:[%s583_s24] sm:$0xff]  ;;  %v2949_v45 = vsub.s32 %v882_v40, %v884_v41  ;;  %s2764_s24 = smov 24  }
  0x15   : > { %2589 = vmatprep.subr.mxu1 %v2755_v8  ;;  %v2496_v26 = vld [vmem:[%s3221_s7] ss:$0 sm:$0xff]  ;;  %v2951_v51 = vsub.s32 %v914_v44, %v884_v41 }
  0x16   : > { %2590 = vmatpush3.msra.mxu1 %v621_v11  ;;  %v2494_v29 = vld [vmem:[%s3219_s5] ss:$0 sm:$0xff] }
  0x17   : > { %2594 = vmatprep.subr.mxu1 %v2755_v8  ;;  %v789_v34 = vld [vmem:[%s3222_s8] sm:$0xff] }
  0x9c   : > { %v595_v2 = vpop.xlane.xlu0 %594 }
  0x9d   : > { %v597_v3 = vmul.f32 0.03125, %v595_v2 }
  0x9f   : > { %v598_v4 = vsub.f32 %v2874_v0, %v597_v3 }
  0xa1   : > { %v599_v5 = vmul.f32 %v598_v4, %v598_v4 }
  0xa3   : > { %v600_v6 = vsel %vm592_vm0, %v599_v5, 0.0 }
  0xa4   : > { %601 = vadd.xlane.f32.xlu0 %v600_v6 }
 0x12d   : > { %v602_v12 = vpop.xlane.xlu0 %601 }
 0x12e   : > { %v603_v13 = vmul.f32 0.03125, %v602_v12 }
 0x130   : > { %v604_v14 = vadd.f32 1e-05, %v603_v13 }
 0x132   : > { %2723 = vrsqrt.f32 %v604_v14 }
 0x13f   : > { %v2724_v15 = vpop.eup %2723 }
 0x140   : > { %v606_v17 = vmul.f32 %v2724_v15, %v598_v4 }
 0x142   : > { %v613_v19 = vmul.f32 %v2492_v16, %v606_v17 }
 0x144   : > { %v620_v20 = vadd.f32 %v2493_v18, %v613_v19 }
 0x146   : > { %2592 = vmatmul.mubr.msk.f32.vlgmr.msra.gmra.mxu1 %vm592_vm0, %v620_v20 }
 0x147   : > { %2595 = vmatpush3.msra.mxu1 %v707_v21  ;;  %2598 = vmatprep.mubr.msk.f32.mxu1 %vm2756_vm1, %v2755_v8 }
 0x148   : > { %2596 = vmatprep.subr.mxu1 %v2755_v8 }
 0x149   : > { %2597 = vmatpush3.msra.mxu1 %v706_v22 }
 0x14a   : > { %2599 = vmatmul.mubr.msk.f32.vlgmr.msra.gmra.mxu1 %vm715_vm2, %v589_v23  ;;  %2601 = vmatprep.subr.mxu1 %v2755_v8 }
 0x14b   : > { %2605 = vmatprep.mubr.msk.f32.mxu1 %vm2756_vm1, %v2755_v8  ;;  %2602 = vmatpush3.msra.mxu1 %v790_v32 }
 0x14c   : > { %2603 = vmatprep.subr.mxu1 %v2755_v8 }
 0x14d   : > { %2604 = vmatpush3.msra.mxu1 %v789_v34 }
 0x14e   : > { %2613 = vmatprep.subr.mxu1 %v2755_v8  ;;  %2606 = vmatmul.mubr.msk.f32.vlgmr.msra.gmra.mxu1 %vm715_vm2, %v589_v23 }
 0x14f   : > { %2615 = vmatprep.mubr.msk.f32.mxu1 %vm2756_vm1, %v2755_v8 }
 0x206   : > { %v701_v24 = vpop.f32.mrf.mxu1 }
 0x207   : > { %v702_v31 = vadd.f32 %v2494_v29, %v701_v24 }
 0x208   : > { %v2593_v25 = vpop.f32.mrf.mxu1 }
 0x209   : > { %v705_v33 = vmul.f32 0.35355338, %v702_v31 }
 0x20a   : > { %v785_v27 = vpop.f32.mrf.mxu1 }
 0x20b   : > { %v786_v28 = vadd.f32 %v2496_v26, %v785_v27 }
 0x20c   : > { %v2600_v30 = vpop.f32.mrf.mxu1 }
 0x20d   : > { %1021 = vrot.lane.b32.xlu0 %v786_v28, %s2757_s1  ;;  %1015 = vrot.lane.b32.xlu1 %v786_v28, %s2758_s20 }
 0x211   : > { %1018 = vrot.lane.b32.xlu1 %v786_v28, %s2759_s21 }
 0x215   : > { %869 = vrot.lane.b32.xlu1 %v705_v33, %s2758_s20 }
 0x219   : > { %872 = vrot.lane.b32.xlu1 %v705_v33, %s2759_s21 }
 0x21d   : > { %875 = vrot.lane.b32.xlu1 %v705_v33, %s2757_s1 }
 0x27f   : > { %v1022_v42 = vpop.permute.xlu0 %1021  ;;  %v1016_v43 = vpop.permute.xlu1 %1015 }
 0x280   : > { %v1040_v46 = vcombine.low %v1016_v43, %v1022_v42  ;;  %v1041_v47 = vcombine.high %v1016_v43, %v1022_v42 }
 0x282   : > { %v1048_v52 = vrot.slane %v1040_v46, %v2949_v45  ;;  %v1055_v53 = vrot.slane %v1041_v47, %v2949_v45 }
 0x283   : > { %v1019_v48 = vpop.permute.xlu1 %1018 }
 0x284   : > { %v1024_v49 = vcombine.low %v786_v28, %v1019_v48  ;;  %v1025_v50 = vcombine.high %v786_v28, %v1019_v48 }
 0x286   : > { %v1032_v54 = vrot.slane %v1024_v49, %v2949_v45  ;;  %v1039_v55 = vrot.slane %v1025_v50, %v2949_v45 }
 0x287   : > { %v870_v56 = vpop.permute.xlu1 %869 }
 0x288   : > { %v1056_v57 = vcombine.low %v1032_v54, %v1048_v52  ;;  %v1057_v58 = vcombine.high %v1032_v54, %v1048_v52  ;;  %v1072_v59 = vcombine.low %v1039_v55, %v1055_v53  ;;  %v1073_v60 = vcombine.high %v1039_v55, %v1055_v53 }
 0x28a   : > { %v1064_v61 = vrot.slane %v1056_v57, %v2951_v51  ;;  %v1071_v62 = vrot.slane %v1057_v58, %v2951_v51  ;;  %v1080_v63 = vrot.slane %v1072_v59, %v2951_v51  ;;  %v1087_v1 = vrot.slane %v1073_v60, %v2951_v51 }
 0x28b   : > { %v873_v2 = vpop.permute.xlu1 %872 }
 0x28c   : > { %v1092_v3 = vcombine.low %v1064_v61, %v1071_v62  ;;  %v2502_v4 = vcombine.high %v1064_v61, %v1071_v62  ;;  %v1108_v5 = vcombine.low %v1080_v63, %v1087_v1  ;;  %v2503_v6 = vcombine.high %v1080_v63, %v1087_v1  ;;  %v864_v63 = vpop.f32.mrf.mxu1 }
 0x28d   : > { %v878_v7 = vcombine.low %v705_v33, %v873_v2  ;;  %v879_v9 = vcombine.high %v705_v33, %v873_v2 }
 0x28e   : > { %v1099_v10 = vrot.slane %v1092_v3, %v2949_v45  ;;  %v1107_v11 = vrot.slane %v2502_v4, %v2949_v45  ;;  %v1115_v12 = vrot.slane %v1108_v5, %v2949_v45  ;;  %v1123_v13 = vrot.slane %v2503_v6, %v2949_v45  ;;  %v2607_v1 = vpop.f32.mrf.mxu1 }
 0x28f   : > { %v876_v14 = vpop.permute.xlu1 %875  ;;  %v886_v18 = vrot.slane %v878_v7, %v2949_v45  ;;  %v893_v20 = vrot.slane %v879_v9, %v2949_v45 }
 0x290   : > { %v894_v15 = vcombine.low %v870_v56, %v876_v14  ;;  %v895_v16 = vcombine.high %v870_v56, %v876_v14  ;;  %v1124_v17 = vcombine.low %v1099_v10, %v1107_v11  ;;  %v1140_v19 = vcombine.low %v1115_v12, %v1123_v13 }
 0x291   : > { %v1125_v39 = vcombine.high %v1099_v10, %v1107_v11  ;;  %v1141_v40 = vcombine.high %v1115_v12, %v1123_v13 }
 0x292   : > { %v902_v21 = vrot.slane %v894_v15, %v2949_v45  ;;  %v909_v22 = vrot.slane %v895_v16, %v2949_v45  ;;  %v1132_v23 = vrot.slane %v1124_v17, %v2951_v51  ;;  %v1148_v24 = vrot.slane %v1140_v19, %v2951_v51 }
 0x293   : > { %v1139_v50 = vrot.slane %v1125_v39, %v2951_v51  ;;  %v1155_v52 = vrot.slane %v1141_v40, %v2951_v51 }
 0x294   : > { %v910_v25 = vcombine.low %v886_v18, %v902_v21  ;;  %v911_v26 = vcombine.high %v886_v18, %v902_v21  ;;  %v926_v27 = vcombine.low %v893_v20, %v909_v22  ;;  %v927_v28 = vcombine.high %v893_v20, %v909_v22 }
 0x295   : > { %v1156_v29 = vcombine.low %v1132_v23, %v1148_v24  ;;  %v1157_v30 = vcombine.high %v1132_v23, %v1148_v24  ;;  %v1158_v59 = vcombine.low %v1139_v50, %v1155_v52  ;;  %v1159_v60 = vcombine.high %v1139_v50, %v1155_v52 }
 0x296   : > { %v918_v31 = vrot.slane %v910_v25, %v2951_v51  ;;  %v925_v32 = vrot.slane %v911_v26, %v2951_v51  ;;  %v934_v33 = vrot.slane %v926_v27, %v2951_v51  ;;  %v941_v34 = vrot.slane %v927_v28, %v2951_v51 }
 0x297   : > { %2609 = vmatpush3.xpose.msk.msra.mxu0 %vm1306_vm3, %v1156_v29  ;;  %2614 = vmatpush3.xpose.msk.msra.mxu1 %vm1306_vm3, %v1157_v30  ;;  %v2498_v30 = vld [vmem:[%s3223_s9] ss:$0 sm:$0xff] }
 0x298   : > { %v946_v35 = vcombine.low %v918_v31, %v925_v32  ;;  %v2500_v36 = vcombine.high %v918_v31, %v925_v32  ;;  %v962_v37 = vcombine.low %v934_v33, %v941_v34  ;;  %v2501_v38 = vcombine.high %v934_v33, %v941_v34  ;;  %2618 = vmatprep.subr.mxu0 %v2755_v8 }
 0x299   : > { %2623 = vmatprep.subr.mxu1 %v2755_v8  ;;  %v865_v31 = vadd.f32 %v2498_v30, %v864_v63 }
 0x29a   : > { %v953_v41 = vrot.slane %v946_v35, %v2949_v45  ;;  %v961_v42 = vrot.slane %v2500_v36, %v2949_v45  ;;  %v969_v43 = vrot.slane %v962_v37, %v2949_v45  ;;  %v977_v44 = vrot.slane %v2501_v38, %v2949_v45 }
 0x29c   : > { %v979_v46 = vcombine.high %v953_v41, %v961_v42  ;;  %v995_v47 = vcombine.high %v969_v43, %v977_v44  ;;  %v978_v48 = vcombine.low %v953_v41, %v961_v42  ;;  %v994_v49 = vcombine.low %v969_v43, %v977_v44 }
 0x29e   : > { %v986_v53 = vrot.slane %v978_v48, %v2951_v51  ;;  %v1002_v54 = vrot.slane %v994_v49, %v2951_v51  ;;  %v993_v57 = vrot.slane %v979_v46, %v2951_v51  ;;  %v1009_v58 = vrot.slane %v995_v47, %v2951_v51 }
 0x2a0   : > { %v1010_v55 = vcombine.low %v986_v53, %v1002_v54  ;;  %v1011_v56 = vcombine.high %v986_v53, %v1002_v54  ;;  %v1012_v61 = vcombine.low %v993_v57, %v1009_v58  ;;  %v1013_v62 = vcombine.high %v993_v57, %v1009_v58 }
 0x2a2   : > { %2611 = vmatmul.mubr.msk.f32.vlgmr.msra.gmra.mxu0 %vm1306_vm3, %v1010_v55  ;;  %2616 = vmatmul.mubr.msk.f32.vlgmr.msra.gmra.mxu1 %vm1306_vm3, %v1011_v56 }
 0x2a3   : > { %2619 = vmatpush3.xpose.msk.msra.mxu0 %vm1306_vm3, %v1158_v59  ;;  %2624 = vmatpush3.xpose.msk.msra.mxu1 %vm1306_vm3, %v1159_v60 }
 0x2a4   : > { %2620 = vmatprep.mubr.msk.f32.mxu0 %vm2756_vm1, %v2755_v8  ;;  %2625 = vmatprep.mubr.msk.f32.mxu1 %vm2756_vm1, %v2755_v8 }
 0x2a5   : > { %2628 = vmatprep.subr.mxu0 %v2755_v8  ;;  %2633 = vmatprep.subr.mxu1 %v2755_v8 }
 0x2a6   : > { %2621 = vmatmul.mubr.msk.f32.vlgmr.msra.gmra.mxu0 %vm1306_vm3, %v1012_v61  ;;  %2626 = vmatmul.mubr.msk.f32.vlgmr.msra.gmra.mxu1 %vm1306_vm3, %v1013_v62 }
 0x2a7   : > { %2630 = vmatprep.mubr.msk.f32.mxu0 %vm2756_vm1, %v2755_v8  ;;  %2635 = vmatprep.mubr.msk.f32.mxu1 %vm2756_vm1, %v2755_v8 }
 0x362   : > { %v1379_v2 = vpop.f32.mrf.mxu0  ;;  %v1455_v3 = vpop.f32.mrf.mxu1 }
 0x363   : > { %v1611_v4 = vsel %vm1306_vm3, %v1379_v2, -inf  ;;  %v1614_v5 = vsel %vm1306_vm3, %v1455_v3, -inf }
 0x364   : > { %1612 = vmax.xlane.f32.xlu1 %v1611_v4  ;;  %v2612_v6 = vpop.f32.mrf.mxu0  ;;  %1615 = vmax.xlane.f32.xlu0 %v1614_v5  ;;  %v2617_v7 = vpop.f32.mrf.mxu1 }
 0x366   : > { %v1531_v9 = vpop.f32.mrf.mxu0  ;;  %v1607_v10 = vpop.f32.mrf.mxu1 }
 0x367   : > { %v1617_v11 = vsel %vm1306_vm3, %v1531_v9, -inf  ;;  %v1620_v14 = vsel %vm1306_vm3, %v1607_v10, -inf }
 0x368   : > { %1618 = vmax.xlane.f32.xlu1 %v1617_v11  ;;  %v2622_v12 = vpop.f32.mrf.mxu0  ;;  %v2627_v13 = vpop.f32.mrf.mxu1 }
 0x36c   : > { %1621 = vmax.xlane.f32.xlu1 %v1620_v14 }
 0x3ed   : > { %v1613_v15 = vpop.xlane.xlu1 %1612  ;;  %v1616_v16 = vpop.xlane.xlu0 %1615 }
 0x3ee   : > { %v1623_v17 = vsub.f32 %v1379_v2, %v1613_v15  ;;  %v1624_v18 = vsub.f32 %v1455_v3, %v1616_v16 }
 0x3f0   : > { %v1627_v19 = vmul.f32 1.442695, %v1623_v17  ;;  %v1629_v20 = vmul.f32 1.442695, %v1624_v18 }
 0x3f1   : > { %v1619_v21 = vpop.xlane.xlu1 %1618 }
 0x3f2   : > { %2725 = vpow2.f32 %v1627_v19  ;;  %v1625_v22 = vsub.f32 %v1531_v9, %v1619_v21 }
 0x3f3   : > { %2727 = vpow2.f32 %v1629_v20 }
 0x3f4   : > { %v1631_v23 = vmul.f32 1.442695, %v1625_v22 }
 0x3f5   : > { %v1622_v32 = vpop.xlane.xlu1 %1621 }
 0x3f6   : > { %2729 = vpow2.f32 %v1631_v23  ;;  %v1626_v33 = vsub.f32 %v1607_v10, %v1622_v32 }
 0x3f8   : > { %v1633_v34 = vmul.f32 1.442695, %v1626_v33 }
 0x3fa   : > { %2731 = vpow2.f32 %v1633_v34 }
 0x3ff   : > { %v3009_v24 = vpop.eup %2725 }
 0x400   : > { %v3011_v25 = vpop.eup %2727  ;;  %v1635_v26 = vsel %vm1306_vm3, %v3009_v24, 0.0 }
 0x401   : > { %1636 = vadd.xlane.f32.xlu0 %v1635_v26  ;;  %v1638_v27 = vsel %vm1306_vm3, %v3011_v25, 0.0 }
 0x402   : > { %1639 = vadd.xlane.f32.xlu1 %v1638_v27 }
 0x403   : > { %v3017_v28 = vpop.eup %2729 }
 0x404   : > { %v1641_v29 = vsel %vm1306_vm3, %v3017_v28, 0.0 }
 0x405   : > { %1642 = vadd.xlane.f32.xlu0 %v1641_v29 }
 0x407   : > { %v3026_v35 = vpop.eup %2731 }
 0x408   : > { %v1644_v36 = vsel %vm1306_vm3, %v3026_v35, 0.0 }
 0x413   : > { %1164 = vrot.lane.b32.xlu1 %v865_v31, %s2759_s21 }
 0x41b   : > { %1161 = vrot.lane.b32.xlu0 %v865_v31, %s2758_s20 }
 0x437   : > { %1645 = vadd.xlane.f32.xlu1 %v1644_v36 }
 0x448   : > { %1167 = vrot.lane.b32.xlu1 %v865_v31, %s2757_s1 }
 0x48a   : > { %v1637_v38 = vpop.xlane.xlu0 %1636 }
 0x48b   : > { %v1640_v37 = vpop.xlane.xlu1 %1639  ;;  %2733 = vrcp.f32 %v1637_v38 }
 0x48c   : > { %2735 = vrcp.f32 %v1640_v37 }
 0x48e   : > { %v1643_v40 = vpop.xlane.xlu0 %1642 }
 0x48f   : > { %v1165_v39 = vpop.permute.xlu1 %1164  ;;  %2737 = vrcp.f32 %v1643_v40 }
 0x490   : > { %v1170_v42 = vcombine.low %v865_v31, %v1165_v39  ;;  %v1171_v43 = vcombine.high %v865_v31, %v1165_v39 }
 0x492   : > { %v1162_v44 = vpop.permute.xlu0 %1161  ;;  %v1178_v49 = vrot.slane %v1170_v42, %v2949_v45  ;;  %v1185_v50 = vrot.slane %v1171_v43, %v2949_v45 }
 0x498   : > { %v2734_v12 = vpop.eup %2733 }
 0x499   : > { %v2736_v13 = vpop.eup %2735  ;;  %v1648_v21 = vmul.f32 %v2734_v12, %v3009_v24 }
 0x49a   : > { %v1650_v22 = vmul.f32 %v2736_v13, %v3011_v25  ;;  %v2102_v25 = vld [vmem:[%s3224_s10 + $0x18] sm:$0xff] }
 0x49c   : > { %v2738_v18 = vpop.eup %2737 }
 0x49d   : > { %v1652_v29 = vmul.f32 %v2738_v18, %v3017_v28 }
 0x4c0   : > { %v1646_v41 = vpop.xlane.xlu1 %1645 }
 0x4c1   : > { %2739 = vrcp.f32 %v1646_v41 }
 0x4c4   : > { %v1168_v46 = vpop.permute.xlu1 %1167 }
 0x4c5   : > { %v1186_v47 = vcombine.low %v1162_v44, %v1168_v46  ;;  %v1187_v48 = vcombine.high %v1162_v44, %v1168_v46 }
 0x4c7   : > { %v1194_v52 = vrot.slane %v1186_v47, %v2949_v45  ;;  %v1201_v53 = vrot.slane %v1187_v48, %v2949_v45 }
 0x4c9   : > { %v1202_v54 = vcombine.low %v1178_v49, %v1194_v52  ;;  %v1203_v55 = vcombine.high %v1178_v49, %v1194_v52  ;;  %v1218_v56 = vcombine.low %v1185_v50, %v1201_v53  ;;  %v1219_v57 = vcombine.high %v1185_v50, %v1201_v53  ;;  %v2101_v50 = vld [vmem:[%s3224_s10 + $0x10] sm:$0xff]  ;;  %v2100_v52 = vld [vmem:[%s3224_s10 + $0x8] sm:$0xff] }
 0x4cb   : > { %v1210_v58 = vrot.slane %v1202_v54, %v2951_v51  ;;  %v1217_v59 = vrot.slane %v1203_v55, %v2951_v51  ;;  %v1226_v60 = vrot.slane %v1218_v56, %v2951_v51  ;;  %v1233_v61 = vrot.slane %v1219_v57, %v2951_v51 }
 0x4cd   : > { %v1238_v62 = vcombine.low %v1210_v58, %v1217_v59  ;;  %v2504_v63 = vcombine.high %v1210_v58, %v1217_v59  ;;  %v1254_v1 = vcombine.low %v1226_v60, %v1233_v61  ;;  %v2505_v2 = vcombine.high %v1226_v60, %v1233_v61  ;;  %v2099_v61 = vld [vmem:[%s3224_s10] sm:$0xff] }
 0x4ce   : > { %v2740_v23 = vpop.eup %2739 }
 0x4cf   : > { %v1245_v3 = vrot.slane %v1238_v62, %v2949_v45  ;;  %v1253_v4 = vrot.slane %v2504_v63, %v2949_v45  ;;  %v1261_v5 = vrot.slane %v1254_v1, %v2949_v45  ;;  %v1269_v6 = vrot.slane %v2505_v2, %v2949_v45 }
 0x4d0   : > { %v1654_v24 = vmul.f32 %v2740_v23, %v3026_v35 }
 0x4d1   : > { %v1270_v7 = vcombine.low %v1245_v3, %v1253_v4  ;;  %v1286_v9 = vcombine.low %v1261_v5, %v1269_v6  ;;  %v1271_v10 = vcombine.high %v1245_v3, %v1253_v4  ;;  %v1287_v11 = vcombine.high %v1261_v5, %v1269_v6 }
 0x4d3   : > { %v1278_v14 = vrot.slane %v1270_v7, %v2951_v51  ;;  %v1294_v15 = vrot.slane %v1286_v9, %v2951_v51  ;;  %v1285_v16 = vrot.slane %v1271_v10, %v2951_v51  ;;  %v1301_v17 = vrot.slane %v1287_v11, %v2951_v51 }
 0x4d5   : > { %v1302_v19 = vcombine.low %v1278_v14, %v1294_v15  ;;  %v1303_v20 = vcombine.high %v1278_v14, %v1294_v15  ;;  %v1304_v26 = vcombine.low %v1285_v16, %v1301_v17  ;;  %v1305_v27 = vcombine.high %v1285_v16, %v1301_v17 }
 0x4d7   : > { %2629 = vmatpush3.msra.mxu0 %v1302_v19  ;;  %2634 = vmatpush3.msra.mxu1 %v1303_v20 }
 0x4d8   : > { %2631 = vmatmul.mubr.msk.f32.vlgmr.msra.gmra.mxu0 %vm1306_vm3, %v1648_v21  ;;  %2636 = vmatmul.mubr.msk.f32.vlgmr.msra.gmra.mxu1 %vm1306_vm3, %v1650_v22 }
 0x4d9   : > { %2638 = vmatprep.subr.mxu0 %v2755_v8  ;;  %2643 = vmatprep.subr.mxu1 %v2755_v8 }
 0x4da   : > { %2639 = vmatpush3.msra.mxu0 %v1304_v26  ;;  %2644 = vmatpush3.msra.mxu1 %v1305_v27 }
 0x4db   : > { %2640 = vmatprep.mubr.msk.f32.mxu0 %vm2756_vm1, %v2755_v8  ;;  %2645 = vmatprep.mubr.msk.f32.mxu1 %vm2756_vm1, %v2755_v8 }
 0x4dc   : > { %2641 = vmatmul.mubr.msk.f32.vlgmr.msra.gmra.mxu0 %vm1306_vm3, %v1652_v29  ;;  %2646 = vmatmul.mubr.msk.f32.vlgmr.msra.gmra.mxu1 %vm1306_vm3, %v1654_v24 }
 0x4dd   : > { %2648 = vmatprep.subr.mxu1 %v2755_v8  ;;  %2656 = vmatprep.mubr.msk.f32.mxu1 %vm2756_vm1, %v2755_v8 }
 0x4de   : > { %2670 = vmatprep.subr.mxu0 %v2755_v8  ;;  %2702 = vmatprep.mubr.msk.f32.mxu0 %vm2756_vm1, %v2755_v8 }
 0x4df   : > { %2649 = vmatpush3.msra.mxu1 %v2102_v25 }
 0x4e0   : > { %2650 = vmatprep.subr.mxu1 %v2755_v8 }
 0x4e1   : > { %2651 = vmatpush3.msra.mxu1 %v2101_v50  ;;  %v2333_v50 = vld [vmem:[%s3230_s16 + $0x48] sm:$0xff] }
 0x4e2   : > { %2652 = vmatprep.subr.mxu1 %v2755_v8 }
 0x4e3   : > { %2653 = vmatpush3.msra.mxu1 %v2100_v52  ;;  %v2332_v52 = vld [vmem:[%s3230_s16 + $0x40] sm:$0xff] }
 0x4e4   : > { %2654 = vmatprep.subr.mxu1 %v2755_v8 }
 0x4e5   : > { %2655 = vmatpush3.msra.mxu1 %v2099_v61  ;;  %v2524_v61 = vld [vmem:[%s3229_s15] ss:$0 sm:$0xff] }
 0x4e6   : > { %2659 = vmatprep.subr.mxu1 %v2755_v8 }
 0x598   : > { %v1724_v28 = vpop.f32.mrf.mxu0  ;;  %v1797_v30 = vpop.f32.mrf.mxu1 }
 0x59a   : > { %v2632_v31 = vpop.f32.mrf.mxu0  ;;  %v2637_v32 = vpop.f32.mrf.mxu1 }
 0x59b   : > { %v2216_v31 = vld [vmem:[%s3228_s14 + $0x18] sm:$0xff]  ;;  %v2214_v32 = vld [vmem:[%s3228_s14 + $0x8] sm:$0xff] }
 0x59c   : > { %v1870_v33 = vpop.f32.mrf.mxu0  ;;  %v1943_v34 = vpop.f32.mrf.mxu1 }
 0x59d   : > { %v1947_v35 = vcombine.low %v1724_v28, %v1870_v33  ;;  %v1948_v36 = vcombine.high %v1724_v28, %v1870_v33  ;;  %v1963_v37 = vcombine.low %v1797_v30, %v1943_v34  ;;  %v1964_v38 = vcombine.high %v1797_v30, %v1943_v34  ;;  %v2213_v33 = vld [vmem:[%s3228_s14] sm:$0xff] }
 0x59e   : > { %v2642_v39 = vpop.f32.mrf.mxu0  ;;  %v2647_v40 = vpop.f32.mrf.mxu1 }
 0x59f   : > { %v1955_v41 = vrot.slane %v1947_v35, %v2949_v45  ;;  %v1962_v42 = vrot.slane %v1948_v36, %v2949_v45  ;;  %v1971_v43 = vrot.slane %v1963_v37, %v2949_v45  ;;  %v1978_v44 = vrot.slane %v1964_v38, %v2949_v45  ;;  %v2522_v38 = vld [vmem:[%s3226_s12] ss:$0 sm:$0xff] }
 0x5a0   : > { %v2523_v40 = vld [vmem:[%s3227_s13] ss:$0 sm:$0xff] }
 0x5a1   : > { %v1979_v46 = vcombine.low %v1955_v41, %v1971_v43  ;;  %v1980_v47 = vcombine.high %v1955_v41, %v1971_v43  ;;  %v1995_v48 = vcombine.low %v1962_v42, %v1978_v44  ;;  %v1996_v49 = vcombine.high %v1962_v42, %v1978_v44  ;;  %v2339_v43 = vld [vmem:[%s3230_s16 + $0x78] sm:$0xff]  ;;  %v2338_v44 = vld [vmem:[%s3230_s16 + $0x70] sm:$0xff] }
 0x5a2   : > { %2671 = vmatpush3.msra.mxu0 %v2339_v43 }
 0x5a3   : > { %v1987_v53 = vrot.slane %v1979_v46, %v2951_v51  ;;  %v1994_v54 = vrot.slane %v1980_v47, %v2951_v51  ;;  %v2003_v55 = vrot.slane %v1995_v48, %v2951_v51  ;;  %v2010_v56 = vrot.slane %v1996_v49, %v2951_v51  ;;  %2672 = vmatprep.subr.mxu0 %v2755_v8  ;;  %v2337_v46 = vld [vmem:[%s3230_s16 + $0x68] sm:$0xff]  ;;  %v2336_v47 = vld [vmem:[%s3230_s16 + $0x60] sm:$0xff]  ;;  %v2335_v48 = vld [vmem:[%s3230_s16 + $0x58] sm:$0xff] }
 0x5a4   : > { %2673 = vmatpush3.msra.mxu0 %v2338_v44  ;;  %v2334_v49 = vld [vmem:[%s3230_s16 + $0x50] sm:$0xff] }
 0x5a5   : > { %v2015_v57 = vcombine.low %v1987_v53, %v1994_v54  ;;  %v2518_v58 = vcombine.high %v1987_v53, %v1994_v54  ;;  %v2031_v59 = vcombine.low %v2003_v55, %v2010_v56  ;;  %v2519_v60 = vcombine.high %v2003_v55, %v2010_v56  ;;  %2674 = vmatprep.subr.mxu0 %v2755_v8  ;;  %v2331_v53 = vld [vmem:[%s3230_s16 + $0x38] sm:$0xff]  ;;  %v2330_v54 = vld [vmem:[%s3230_s16 + $0x30] sm:$0xff]  ;;  %v2329_v55 = vld [vmem:[%s3230_s16 + $0x28] sm:$0xff] }
 0x5a6   : > { %2675 = vmatpush3.msra.mxu0 %v2337_v46  ;;  %v2328_v56 = vld [vmem:[%s3230_s16 + $0x20] sm:$0xff] }
 0x5a7   : > { %v2022_v62 = vrot.slane %v2015_v57, %v2949_v45  ;;  %v2030_v63 = vrot.slane %v2518_v58, %v2949_v45  ;;  %v2038_v1 = vrot.slane %v2031_v59, %v2949_v45  ;;  %v2046_v2 = vrot.slane %v2519_v60, %v2949_v45  ;;  %2676 = vmatprep.subr.mxu0 %v2755_v8  ;;  %v2327_v57 = vld [vmem:[%s3230_s16 + $0x18] sm:$0xff]  ;;  %v2326_v58 = vld [vmem:[%s3230_s16 + $0x10] sm:$0xff]  ;;  %v2325_v59 = vld [vmem:[%s3230_s16 + $0x8] sm:$0xff] }
 0x5a8   : > { %2677 = vmatpush3.msra.mxu0 %v2336_v47  ;;  %v2324_v60 = vld [vmem:[%s3230_s16] sm:$0xff] }
 0x5a9   : > { %v2048_v3 = vcombine.high %v2022_v62, %v2030_v63  ;;  %v2064_v4 = vcombine.high %v2038_v1, %v2046_v2  ;;  %v2047_v5 = vcombine.low %v2022_v62, %v2030_v63  ;;  %v2063_v6 = vcombine.low %v2038_v1, %v2046_v2  ;;  %2678 = vmatprep.subr.mxu0 %v2755_v8 }
 0x5aa   : > { %2679 = vmatpush3.msra.mxu0 %v2335_v48 }
 0x5ab   : > { %v2062_v7 = vrot.slane %v2048_v3, %v2951_v51  ;;  %v2078_v9 = vrot.slane %v2064_v4, %v2951_v51  ;;  %v2055_v10 = vrot.slane %v2047_v5, %v2951_v51  ;;  %v2071_v11 = vrot.slane %v2063_v6, %v2951_v51  ;;  %v2520_v51 = vld [vmem:[%s3225_s11] ss:$0 sm:$0xff]  ;;  %2680 = vmatprep.subr.mxu0 %v2755_v8 }
 0x5ac   : > { %2681 = vmatpush3.msra.mxu0 %v2334_v49 }
 0x5ad   : > { %v2081_v12 = vcombine.low %v2062_v7, %v2078_v9  ;;  %v2080_v13 = vcombine.high %v2055_v10, %v2071_v11  ;;  %v2079_v14 = vcombine.low %v2055_v10, %v2071_v11  ;;  %v2082_v45 = vcombine.high %v2062_v7, %v2078_v9  ;;  %2682 = vmatprep.subr.mxu0 %v2755_v8 }
 0x5ae   : > { %2683 = vmatpush3.msra.mxu0 %v2333_v50 }
 0x5af   : > { %2088 = vrot.lane.b32.xlu1 %v2081_v12, %s2762_s2  ;;  %2084 = vrot.lane.b32.xlu0 %v2080_v13, %s2763_s23 }
 0x5b0   : > { %2684 = vmatprep.subr.mxu0 %v2755_v8 }
 0x5b1   : > { %2685 = vmatpush3.msra.mxu0 %v2332_v52 }
 0x5b2   : > { %2686 = vmatprep.subr.mxu0 %v2755_v8 }
 0x5b3   : > { %2092 = vrot.lane.b32.xlu0 %v2082_v45, %s2764_s24  ;;  %2687 = vmatpush3.msra.mxu0 %v2331_v53 }
 0x5b4   : > { %2688 = vmatprep.subr.mxu0 %v2755_v8 }
 0x5b5   : > { %2689 = vmatpush3.msra.mxu0 %v2330_v54 }
 0x5b6   : > { %2690 = vmatprep.subr.mxu0 %v2755_v8 }
 0x5b7   : > { %2691 = vmatpush3.msra.mxu0 %v2329_v55 }
 0x5b8   : > { %2692 = vmatprep.subr.mxu0 %v2755_v8 }
 0x5b9   : > { %2693 = vmatpush3.msra.mxu0 %v2328_v56 }
 0x5ba   : > { %2694 = vmatprep.subr.mxu0 %v2755_v8 }
 0x5bb   : > { %2695 = vmatpush3.msra.mxu0 %v2327_v57 }
 0x5bc   : > { %2696 = vmatprep.subr.mxu0 %v2755_v8 }
 0x5bd   : > { %2697 = vmatpush3.msra.mxu0 %v2326_v58 }
 0x5be   : > { %2698 = vmatprep.subr.mxu0 %v2755_v8 }
 0x5bf   : > { %2699 = vmatpush3.msra.mxu0 %v2325_v59 }
 0x5c0   : > { %2700 = vmatprep.subr.mxu0 %v2755_v8 }
 0x5c1   : > { %2701 = vmatpush3.msra.mxu0 %v2324_v60 }
 0x621   : > { %v2085_v15 = vpop.permute.xlu0 %2084  ;;  %v2089_v16 = vpop.permute.xlu1 %2088 }
 0x622   : > { %v2095_v17 = vsel %vm1306_vm3, %v2079_v14, %v2085_v15 }
 0x623   : > { %v2096_v19 = vsel %vm715_vm2, %v2095_v17, %v2089_v16 }
 0x625   : > { %v2093_v18 = vpop.permute.xlu0 %2092 }
 0x626   : > { %v2098_v20 = vsel %vm2097_vm4, %v2096_v19, %v2093_v18 }
 0x627   : > { %2657 = vmatmul.mubr.msk.f32.vlgmr.msra.gmra.mxu1 %vm592_vm0, %v2098_v20 }
 0x628   : > { %2667 = vmatprep.mubr.msk.f32.mxu1 %vm2756_vm1, %v2755_v8  ;;  %2660 = vmatpush3.msra.mxu1 %v2216_v31 }
 0x629   : > { %2661 = vmatprep.subr.mxu1 %v2755_v8 }
 0x6e7   : > { %v2179_v21 = vpop.f32.mrf.mxu1 }
 0x6e8   : > { %v2180_v22 = vadd.f32 %v2520_v51, %v2179_v21 }
 0x6e9   : > { %v2658_v23 = vpop.f32.mrf.mxu1 }
 0x6ea   : > { %v3108_v26 = vadd.f32 %v2180_v22, %v2874_v0  ;;  %v2215_v0 = vld [vmem:[%s3228_s14 + $0x10] sm:$0xff] }
 0x6eb   : > { %2662 = vmatpush3.msra.mxu1 %v2215_v0 }
 0x6ec   : > { %v2186_v27 = vsel %vm592_vm0, %v3108_v26, 0.0  ;;  %2663 = vmatprep.subr.mxu1 %v2755_v8 }
 0x6ed   : > { %2187 = vadd.xlane.f32.xlu1 %v2186_v27  ;;  %2664 = vmatpush3.msra.mxu1 %v2214_v32 }
 0x6ee   : > { %2665 = vmatprep.subr.mxu1 %v2755_v8 }
 0x6ef   : > { %2666 = vmatpush3.msra.mxu1 %v2213_v33 }
 0x776   : > { %v2188_v29 = vpop.xlane.xlu1 %2187 }
 0x777   : > { %v2189_v24 = vmul.f32 0.03125, %v2188_v29  ;;  %v2526_v29 = vld [vmem:[%s3231_s17] ss:$0 sm:$0xff] }
 0x779   : > { %v2190_v25 = vsub.f32 %v3108_v26, %v2189_v24 }
 0x77b   : > { %v2191_v28 = vmul.f32 %v2190_v25, %v2190_v25 }
 0x77d   : > { %v2192_v30 = vsel %vm592_vm0, %v2191_v28, 0.0 }
 0x77e   : > { %2193 = vadd.xlane.f32.xlu0 %v2192_v30 }
 0x807   : > { %v2194_v34 = vpop.xlane.xlu0 %2193 }
 0x808   : > { %v2195_v35 = vmul.f32 0.03125, %v2194_v34 }
 0x80a   : > { %v2196_v36 = vadd.f32 1e-05, %v2195_v35 }
 0x80c   : > { %2741 = vrsqrt.f32 %v2196_v36 }
 0x819   : > { %v2742_v37 = vpop.eup %2741 }
 0x81a   : > { %v2198_v39 = vmul.f32 %v2742_v37, %v2190_v25 }
 0x81c   : > { %v2205_v41 = vmul.f32 %v2522_v38, %v2198_v39 }
 0x81e   : > { %v2212_v42 = vadd.f32 %v2523_v40, %v2205_v41 }
 0x820   : > { %2668 = vmatmul.mubr.msk.f32.vlgmr.msra.gmra.mxu1 %vm592_vm0, %v2212_v42 }
 0x8e0   : > { %v2293_v62 = vpop.f32.mrf.mxu1 }
 0x8e1   : > { %v2294_v63 = vadd.f32 %v2524_v61, %v2293_v62 }
 0x8e2   : > { %v2669_v1 = vpop.f32.mrf.mxu1 }
 0x8e3   : > { %v2298_v2 = vmul.f32 0.70710677, %v2294_v63  ;;  %v2297_v22 = vmul.f32 0.5, %v2294_v63 }
 0x8e5   : > { %v2299_v3 = vand.u32 2147483647, %v2298_v2  ;;  %vm2319_vm5 = vcmp.lt.f32.partialorder %v2298_v2, 0.0 }
 0x8e7   : > { %v2300_v4 = vmul.f32 0.3275911, %v2299_v3  ;;  %v2313_v6 = vmul.f32 %v2299_v3, %v2299_v3 }
 0x8e9   : > { %v2301_v5 = vadd.f32 1.0, %v2300_v4  ;;  %v2314_v7 = vsub.f32 0.0, %v2313_v6 }
 0x8eb   : > { %2743 = vrcp.f32 %v2301_v5  ;;  %v2315_v11 = vmul.f32 1.442695, %v2314_v7 }
 0x8ed   : > { %2745 = vpow2.f32 %v2315_v11 }
 0x8f8   : > { %v2744_v9 = vpop.eup %2743 }
 0x8f9   : > { %v2304_v10 = vmul.f32 1.0614054, %v2744_v9 }
 0x8fa   : > { %v2746_v18 = vpop.eup %2745 }
 0x8fb   : > { %v2305_v12 = vadd.f32 -1.4531521, %v2304_v10 }
 0x8fd   : > { %v2306_v8 = vmul.f32 %v2744_v9, %v2305_v12 }
 0x8ff   : > { %v2307_v13 = vadd.f32 1.4214138, %v2306_v8 }
 0x901   : > { %v2308_v14 = vmul.f32 %v2744_v9, %v2307_v13 }
 0x903   : > { %v2309_v45 = vadd.f32 -0.28449672, %v2308_v14 }
 0x905   : > { %v2310_v15 = vmul.f32 %v2744_v9, %v2309_v45 }
 0x907   : > { %v2311_v16 = vadd.f32 0.2548296, %v2310_v15 }
 0x909   : > { %v2312_v17 = vmul.f32 %v2744_v9, %v2311_v16 }
 0x90b   : > { %v2317_v19 = vmul.f32 %v2746_v18, %v2312_v17 }
 0x90d   : > { %v2318_v20 = vsub.f32 1.0, %v2317_v19 }
 0x90f   : > { %v2320_v51 = vsub.f32 0.0, %v2318_v20 }
 0x911   : > { %v2321_v21 = vsel %vm2319_vm5, %v2320_v51, %v2318_v20 }
 0x912   : > { %v2322_v23 = vadd.f32 1.0, %v2321_v21 }
 0x914   : > { %v2323_v27 = vmul.f32 %v2322_v23, %v2297_v22 }
 0x916   : > { %2703 = vmatmul.mubr.f32.vlgmr.msra.gmra.mxu0 %v2323_v27 }
 0x9d6   : > { %v2413_v24 = vpop.f32.mrf.mxu0 }
 0x9d7   : > { %v2414_v25 = vadd.f32 %v2526_v29, %v2413_v24 }
 0x9d8   : > { %v2704_v28 = vpop.f32.mrf.mxu0 }
 0x9d9   : > { %v2417_v30 = vadd.f32 %v2414_v25, %v3108_v26 }
 0x9db   : > { %2418 = vst.msk [vmem:[%s587_s25] sm:$0xff] %vm592_vm0, %v2417_v30 }
 0x9dc PF: > { %s28_s27 = sadd.s32 1, %s2753_s27  }
 0x9dd   : > { %p25_p4 = scmp.ge.s32.totalorder %s28_s27, 4  }
 0x9df   :  { %27 = sbr.rel (!%p25_p4) target bundleno = 4 (0x4), region = 125 }

// kernel: bias_attention_module_fwd.11
= control target key start
LH: loop header
LB: loop body
LE: loop exit
PB: predicated region body
PF: predicated region fallthrough
CT: control target
= control target key end

     0   :  { %s3491_s0 = inlined_call_operand.vmem [shape: f32[2,8,32], index: 0, kind: input, shape index: {}]   ;;  %s3492_s1 = inlined_call_operand.vmem [shape: f32[2,8,32], index: 1, kind: input, shape index: {}]   ;;  %s3493_s2 = inlined_call_operand.vmem [shape: f32[2,4,8,8], index: 2, kind: input, shape index: {}]   ;;  %s3494_s3 = inlined_call_operand.vmem [shape: f32[1,32], index: 3, kind: input, shape index: {}]   ;;  %s3495_s4 = inlined_call_operand.vmem [shape: f32[1,32], index: 4, kind: input, shape index: {}]   ;;  %s3496_s5 = inlined_call_operand.vmem [shape: f32[32,32], index: 5, kind: input, shape index: {}]   ;;  %s3497_s6 = inlined_call_operand.vmem [shape: f32[1,32], index: 6, kind: input, shape index: {}]   ;;  %s3498_s7 = inlined_call_operand.vmem [shape: f32[32,32], index: 7, kind: input, shape index: {}]   ;;  %s3499_s8 = inlined_call_operand.vmem [shape: f32[1,32], index: 8, kind: input, shape index: {}]   ;;  %s3500_s9 = inlined_call_operand.vmem [shape: f32[32,32], index: 9, kind: input, shape index: {}]   ;;  %s3501_s10 = inlined_call_operand.vmem [shape: f32[1,32], index: 10, kind: input, shape index: {}]   ;;  %s3502_s11 = inlined_call_operand.vmem [shape: f32[32,32], index: 11, kind: input, shape index: {}]   ;;  %s3503_s12 = inlined_call_operand.vmem [shape: f32[1,32], index: 12, kind: input, shape index: {}]   ;;  %s3504_s13 = inlined_call_operand.vmem [shape: f32[1,32], index: 13, kind: input, shape index: {}]   ;;  %s3505_s14 = inlined_call_operand.vmem [shape: f32[1,32], index: 14, kind: input, shape index: {}]   ;;  %s3506_s15 = inlined_call_operand.vmem [shape: f32[32,128], index: 15, kind: input, shape index: {}]   ;;  %s3507_s16 = inlined_call_operand.vmem [shape: f32[1,128], index: 16, kind: input, shape index: {}]   ;;  %s3508_s17 = inlined_call_operand.vmem [shape: f32[128,32], index: 17, kind: input, shape index: {}]   ;;  %s3509_s18 = inlined_call_operand.vmem [shape: f32[1,32], index: 18, kind: input, shape index: {}]   ;;  %s3510_s19 = inlined_call_operand.hbm [shape: f32[2,8,32], index: 19, kind: output, shape index: {}]  }
   0x1   :  { %3515 = sst [smem:[#allocation8_spill]] %s3491_s0 }
   0x2   :  { %3516 = sst [smem:[#allocation9_spill]] %s3492_s1 }
   0x3   :  { %3517 = sst [smem:[#allocation10_spill]] %s3493_s2 }
   0x4   :  { %3518 = sst [smem:[#allocation11_spill]] %s3494_s3 }
   0x5   :  { %3519 = sst [smem:[#allocation12_spill]] %s3495_s4 }
   0x6   :  { %3520 = sst [smem:[#allocation13_spill]] %s3496_s5 }
   0x7   :  { %3521 = sst [smem:[#allocation14_spill]] %s3497_s6 }
   0x8   :  { %24 = vsyncpa [#allocation3], 0 }
   0x9   :  { %26 = vsyncpa [#allocation3 + $0x1], 0  ;;  %s3054_s0 = smov 0   ;;  %s3056_s30 = smov 0  }
   0xa   :  { %s3058_s20 = smov 0   ;;  %s3060_s21 = smov 0  }
   0xb LB: > { %3522 = sst [smem:[#allocation5_spill]] %s2937_s20  ;;  %s3075_s1 = sadd.s32 4294967295, %s2941_s21   ;;  %s2941_s21 = sphi %s3060_s21, %s3535_s21   ;;  %s2937_s20 = sphi %s3058_s20, %s3537_s20   ;;  %s2933_s30 = sphi %s3056_s30, %s3539_s30   ;;  %s2929_s0 = sphi %s3054_s0, %s3538_s0  }
   0xc   : > { %s2571_s22 = sadd.s32 4294967294, %s2941_s21   ;;  %s3079_s2 = sadd.s32 1, %s2941_s21  }
   0xd   : > { %3523 = sst [smem:[#allocation6_spill]] %s3079_s2  ;;  %s453_s23 = sadd.s32 1, %s2937_s20 }
   0xe   : > { %s450_s24 = ssub.s32 %s2941_s21, %s3079_s2  ;;  %p463_p0 = scmp.ne.s32.totalorder %s2937_s20, %s2933_s30 }
   0xf   : > { %p451_p1 = scmp.eq.s32.totalorder %s450_s24, 0  ;;  %p464_p2 = scmp.eq.s32.totalorder %s3075_s1, 1 }
  0x10   : > { %p469_p3 = scmp.ne.s32.totalorder %s2933_s30, %s2929_s0  ;;  %p470_p4 = scmp.eq.s32.totalorder %s2571_s22, 1 }
  0x11   : > { %s3090_s25 = scalar_select %p451_p1, %s2937_s20, %s453_s23  }
  0x12   : > { %p3092_p5 = por %p464_p2, %p463_p0  ;;  %p3096_p6 = por %p470_p4, %p469_p3 }
  0x13   : > { %3524 = sst [smem:[#allocation7_spill]] %s3090_s25  ;;  %p2574_p7 = scmp.ge.s32.totalorder %s2941_s21, 1 }
  0x14   : > { %p558_p8 = scmp.lt.s32.totalorder %s2941_s21, 3 }
  0x16   : > { %p559_p9 = pnand %p2574_p7, %p558_p8 }
  0x17   : > { %p622_p10 = scmp.lt.s32.totalorder (!%p559_p9), %s3075_s1, 1  ;;  %s3527_s23 = sld [smem:[#allocation8_spill]] (!%p559_p9) }
  0x18   : > { %562 = sbr.rel (%p559_p9) target bundleno = 2513 (0x9d1), region = 96  ;;  %s3528_s5 = sld [smem:[#allocation13_spill]] (!%p559_p9) }
  0x19   : > { %s3530_s4 = sld [smem:[#allocation12_spill]] (!%p559_p9)  ;;  %s2952_s22 = smov (!%p559_p9), 24  }
  0x1a   : > { %s3533_s6 = sld [smem:[#allocation14_spill]] (!%p559_p9) }
  0x1b   : > { %s3534_s25 = sld [smem:[#allocation10_spill]] (!%p559_p9) }
  0x1d   : > { %s3104_s27 = scalar_select %p622_p10, %s3075_s1, 1  ;;  %vm639_vm0 = vcmask 261120   ;;  %v2943_v8 = vmov 0.0   ;;  %vm2944_vm1 = vmmov 0   ;;  %v756_v21 = vld [vmem:[%s3498_s7 + $0x18] sm:$0xff]  ;;  %v755_v22 = vld [vmem:[%s3498_s7 + $0x10] sm:$0xff]  ;;  %v933_v41 = vlaneseq }
  0x1e   : > { %v671_v7 = vld [vmem:[%s3528_s5 + $0x18] sm:$0xff]  ;;  %2678 = vmatprep.subr.mxu1 %v2943_v8  ;;  %v670_v9 = vld [vmem:[%s3528_s5 + $0x10] sm:$0xff]  ;;  %2686 = vmatprep.mubr.msk.f32.mxu1 %vm2944_vm1, %v2943_v8  ;;  %v669_v10 = vld [vmem:[%s3528_s5 + $0x8] sm:$0xff]  ;;  %v2948_v39 = vmov 1983009808   ;;  %vm1360_vm2 = vcmask 64512  }
  0x1f   : > { %s3512_s28 = sshll.u32 %s3104_s27, 3  ;;  %2679 = vmatpush3.msra.mxu1 %v671_v7  ;;  %2721 = vmatprep.subr.mxu0 %v2943_v8  ;;  %v668_v11 = vld [vmem:[%s3528_s5] sm:$0xff]  ;;  %s3531_s29 = sshll.u32 %s3104_s27, 3  ;;  %v754_v23 = vld [vmem:[%s3498_s7 + $0x8] sm:$0xff]  ;;  %v840_v33 = vld [vmem:[%s3500_s9 + $0x18] sm:$0xff]  ;;  %v931_v40 = vunpack.c.l.s4 %v2948_v39  ;;  %v934_v45 = vshrl.u32 %v933_v41, 7 }
  0x20   : > { %s625_s24 = scalar_lea.vmem %s3527_s23, %s3512_s28  ;;  %2680 = vmatprep.subr.mxu1 %v2943_v8  ;;  %2723 = vmatprep.mubr.msk.f32.mxu0 %vm2944_vm1, %v2943_v8  ;;  %s3529_s23 = sld [smem:[#allocation11_spill]]  ;;  %v2581_v18 = vld [vmem:[%s3530_s4] ss:$0 sm:$0xff]  ;;  %v839_v35 = vld [vmem:[%s3500_s9 + $0x10] sm:$0xff]  ;;  %v838_v36 = vld [vmem:[%s3500_s9 + $0x8] sm:$0xff]  ;;  %vm2150_vm3 = vcmask 130048  }
  0x21   : > { %v3112_v0 = vld [vmem:[%s625_s24] sm:$0xff]  ;;  %2681 = vmatpush3.msra.mxu1 %v670_v9  ;;  %s3532_s24 = sld [smem:[#allocation9_spill]]  ;;  %s2947_s4 = smov 112   ;;  %v2949_v42 = vmov 1934713408   ;;  %v932_v44 = vunpack.c.0.s8 %v931_v40  ;;  %vm2152_vm4 = vcmask 195584  }
  0x22   : > { %v640_v1 = vsel %vm639_vm0, %v3112_v0, 0.0  ;;  %2682 = vmatprep.subr.mxu1 %v2943_v8  ;;  %v753_v24 = vld [vmem:[%s3498_s7] sm:$0xff]  ;;  %v963_v43 = vunpack.c.l.s4 %v2949_v42  ;;  %s2619_s28 = sshll.u32 %s3104_s27, 5  ;;  %s2951_s27 = smov 8  }
  0x23   : > { %641 = vadd.xlane.f32.xlu0 %v640_v1  ;;  %2683 = vmatpush3.msra.mxu1 %v669_v10  ;;  %v2584_v28 = vld [vmem:[%s3499_s8] ss:$0 sm:$0xff]  ;;  %v3204_v49 = vsub.s32 %v932_v44, %v934_v45 }
  0x24   : > { %2684 = vmatprep.subr.mxu1 %v2943_v8  ;;  %v2582_v31 = vld [vmem:[%s3533_s6] ss:$0 sm:$0xff]  ;;  %v964_v48 = vunpack.c.0.s8 %v963_v43 }
  0x25   : > { %2685 = vmatpush3.msra.mxu1 %v668_v11  ;;  %v837_v38 = vld [vmem:[%s3500_s9] sm:$0xff] }
  0x26   : > { %2689 = vmatprep.subr.mxu1 %v2943_v8  ;;  %v2580_v16 = vld [vmem:[%s3529_s23] ss:$0 sm:$0xff]  ;;  %s2945_s23 = smov 104   ;;  %v3206_v55 = vsub.s32 %v964_v48, %v934_v45 }
  0x27   : > { %s629_s20 = scalar_lea.vmem %s3532_s24, %s3531_s29  ;;  %s2946_s24 = smov 120  }
  0x28   : > { %v636_v25 = vld [vmem:[%s629_s20] sm:$0xff]  ;;  %s634_s29 = scalar_lea.vmem %s3534_s25, %s2619_s28  ;;  %s619_s28 = sand.u32 1, %s2933_s30  }
  0x29   : > { %s2575_s5 = sshll.u32 %s619_s28, 3  ;;  %s2475_s20 = scalar_lea.sflag [#allocation3], %s619_s28 }
  0xac   : > { %v642_v2 = vpop.xlane.xlu0 %641 }
  0xad   : > { %v644_v3 = vmul.f32 0.03125, %v642_v2 }
  0xaf   : > { %v645_v4 = vsub.f32 %v3112_v0, %v644_v3 }
  0xb1   : > { %v646_v5 = vmul.f32 %v645_v4, %v645_v4 }
  0xb3   : > { %v647_v6 = vsel %vm639_vm0, %v646_v5, 0.0 }
  0xb4   : > { %648 = vadd.xlane.f32.xlu0 %v647_v6 }
 0x13d   : > { %v649_v12 = vpop.xlane.xlu0 %648 }
 0x13e   : > { %v650_v13 = vmul.f32 0.03125, %v649_v12 }
 0x140   : > { %v651_v14 = vadd.f32 1e-05, %v650_v13 }
 0x142   : > { %2857 = vrsqrt.f32 %v651_v14 }
 0x14f   : > { %v2858_v15 = vpop.eup %2857 }
 0x150   : > { %v653_v17 = vmul.f32 %v2858_v15, %v645_v4 }
 0x152   : > { %v660_v19 = vmul.f32 %v2580_v16, %v653_v17 }
 0x154   : > { %v667_v20 = vadd.f32 %v2581_v18, %v660_v19 }
 0x156   : > { %2687 = vmatmul.mubr.msk.f32.vlgmr.msra.gmra.mxu1 %vm639_vm0, %v667_v20 }
 0x157   : > { %2690 = vmatpush3.msra.mxu1 %v756_v21  ;;  %2697 = vmatprep.mubr.msk.f32.mxu1 %vm2944_vm1, %v2943_v8 }
 0x158   : > { %2691 = vmatprep.subr.mxu1 %v2943_v8 }
 0x159   : > { %2692 = vmatpush3.msra.mxu1 %v755_v22 }
 0x15a   : > { %2693 = vmatprep.subr.mxu1 %v2943_v8 }
 0x15b   : > { %2694 = vmatpush3.msra.mxu1 %v754_v23 }
 0x15c   : > { %2695 = vmatprep.subr.mxu1 %v2943_v8 }
 0x15d   : > { %2696 = vmatpush3.msra.mxu1 %v753_v24 }
 0x15e   : > { %2698 = vmatmul.mubr.msk.f32.vlgmr.msra.gmra.mxu1 %vm639_vm0, %v636_v25  ;;  %2700 = vmatprep.subr.mxu1 %v2943_v8 }
 0x15f   : > { %2708 = vmatprep.mubr.msk.f32.mxu1 %vm2944_vm1, %v2943_v8  ;;  %2701 = vmatpush3.msra.mxu1 %v840_v33 }
 0x160   : > { %2702 = vmatprep.subr.mxu1 %v2943_v8 }
 0x161   : > { %2703 = vmatpush3.msra.mxu1 %v839_v35 }
 0x162   : > { %2704 = vmatprep.subr.mxu1 %v2943_v8 }
 0x163   : > { %2705 = vmatpush3.msra.mxu1 %v838_v36 }
 0x164   : > { %2706 = vmatprep.subr.mxu1 %v2943_v8 }
 0x165   : > { %2707 = vmatpush3.msra.mxu1 %v837_v38 }
 0x166   : > { %2711 = vmatprep.subr.mxu1 %v2943_v8  ;;  %2709 = vmatmul.mubr.msk.f32.vlgmr.msra.gmra.mxu1 %vm639_vm0, %v636_v25 }
 0x167   : > { %2713 = vmatprep.mubr.msk.f32.mxu1 %vm2944_vm1, %v2943_v8 }
 0x216   : > { %v748_v26 = vpop.f32.mrf.mxu1 }
 0x217   : > { %v749_v34 = vadd.f32 %v2582_v31, %v748_v26 }
 0x218   : > { %v2688_v27 = vpop.f32.mrf.mxu1 }
 0x219   : > { %v752_v37 = vmul.f32 0.35355338, %v749_v34 }
 0x21e   : > { %v833_v29 = vpop.f32.mrf.mxu1 }
 0x21f   : > { %v834_v30 = vadd.f32 %v2584_v28, %v833_v29 }
 0x220   : > { %v2699_v32 = vpop.f32.mrf.mxu1 }
 0x221   : > { %1071 = vrot.lane.b32.xlu0 %v834_v30, %s2945_s23  ;;  %1065 = vrot.lane.b32.xlu1 %v834_v30, %s2946_s24 }
 0x225   : > { %1068 = vrot.lane.b32.xlu1 %v834_v30, %s2947_s4 }
 0x229   : > { %919 = vrot.lane.b32.xlu1 %v752_v37, %s2946_s24 }
 0x22d   : > { %922 = vrot.lane.b32.xlu1 %v752_v37, %s2947_s4 }
 0x231   : > { %925 = vrot.lane.b32.xlu1 %v752_v37, %s2945_s23 }
 0x293   : > { %v1072_v46 = vpop.permute.xlu0 %1071  ;;  %v1066_v47 = vpop.permute.xlu1 %1065 }
 0x294   : > { %v1090_v50 = vcombine.low %v1066_v47, %v1072_v46  ;;  %v1091_v51 = vcombine.high %v1066_v47, %v1072_v46 }
 0x296   : > { %v1098_v56 = vrot.slane %v1090_v50, %v3204_v49  ;;  %v1105_v57 = vrot.slane %v1091_v51, %v3204_v49 }
 0x297   : > { %v1069_v52 = vpop.permute.xlu1 %1068 }
 0x298   : > { %v1074_v53 = vcombine.low %v834_v30, %v1069_v52  ;;  %v1075_v54 = vcombine.high %v834_v30, %v1069_v52 }
 0x29a   : > { %v1082_v58 = vrot.slane %v1074_v53, %v3204_v49  ;;  %v1089_v59 = vrot.slane %v1075_v54, %v3204_v49 }
 0x29b   : > { %v920_v60 = vpop.permute.xlu1 %919 }
 0x29c   : > { %v1106_v61 = vcombine.low %v1082_v58, %v1098_v56  ;;  %v1107_v62 = vcombine.high %v1082_v58, %v1098_v56  ;;  %v1122_v63 = vcombine.low %v1089_v59, %v1105_v57  ;;  %v1123_v1 = vcombine.high %v1089_v59, %v1105_v57 }
 0x29e   : > { %v1114_v2 = vrot.slane %v1106_v61, %v3206_v55  ;;  %v1121_v3 = vrot.slane %v1107_v62, %v3206_v55  ;;  %v1130_v4 = vrot.slane %v1122_v63, %v3206_v55  ;;  %v1137_v5 = vrot.slane %v1123_v1, %v3206_v55 }
 0x29f   : > { %v923_v6 = vpop.permute.xlu1 %922 }
 0x2a0   : > { %v1142_v7 = vcombine.low %v1114_v2, %v1121_v3  ;;  %v2590_v9 = vcombine.high %v1114_v2, %v1121_v3  ;;  %v1158_v10 = vcombine.low %v1130_v4, %v1137_v5  ;;  %v2591_v11 = vcombine.high %v1130_v4, %v1137_v5  ;;  %v914_v4 = vpop.f32.mrf.mxu1 }
 0x2a1   : > { %v928_v12 = vcombine.low %v752_v37, %v923_v6  ;;  %v929_v13 = vcombine.high %v752_v37, %v923_v6  ;;  %v1356_v6 = vld [vmem:[%s634_s29] sm:$0xff] }
 0x2a2   : > { %v1149_v14 = vrot.slane %v1142_v7, %v3204_v49  ;;  %v1157_v15 = vrot.slane %v2590_v9, %v3204_v49  ;;  %v1165_v16 = vrot.slane %v1158_v10, %v3204_v49  ;;  %v1173_v17 = vrot.slane %v2591_v11, %v3204_v49  ;;  %v2710_v5 = vpop.f32.mrf.mxu1  ;;  %v1358_v9 = vld [vmem:[%s634_s29 + $0x10] sm:$0xff] }
 0x2a3   : > { %v926_v18 = vpop.permute.xlu1 %925  ;;  %v936_v23 = vrot.slane %v928_v12, %v3204_v49  ;;  %v943_v24 = vrot.slane %v929_v13, %v3204_v49 }
 0x2a4   : > { %v1174_v19 = vcombine.low %v1149_v14, %v1157_v15  ;;  %v1190_v20 = vcombine.low %v1165_v16, %v1173_v17  ;;  %v944_v21 = vcombine.low %v920_v60, %v926_v18  ;;  %v945_v22 = vcombine.high %v920_v60, %v926_v18 }
 0x2a5   : > { %v1175_v25 = vcombine.high %v1149_v14, %v1157_v15  ;;  %v1191_v26 = vcombine.high %v1165_v16, %v1173_v17  ;;  %v1357_v14 = vld [vmem:[%s634_s29 + $0x8] sm:$0xff] }
 0x2a6   : > { %v952_v27 = vrot.slane %v944_v21, %v3204_v49  ;;  %v959_v28 = vrot.slane %v945_v22, %v3204_v49  ;;  %v1182_v29 = vrot.slane %v1174_v19, %v3206_v55  ;;  %v1198_v30 = vrot.slane %v1190_v20, %v3206_v55  ;;  %v1359_v20 = vld [vmem:[%s634_s29 + $0x18] sm:$0xff]  ;;  %s2950_s29 = smov 16  }
 0x2a7   : > { %v1189_v31 = vrot.slane %v1175_v25, %v3206_v55  ;;  %v1205_v32 = vrot.slane %v1191_v26, %v3206_v55 }
 0x2a8   : > { %v960_v33 = vcombine.low %v936_v23, %v952_v27  ;;  %v961_v34 = vcombine.high %v936_v23, %v952_v27  ;;  %v976_v35 = vcombine.low %v943_v24, %v959_v28  ;;  %v977_v36 = vcombine.high %v943_v24, %v959_v28  ;;  %v2586_v27 = vld [vmem:[%s3501_s10] ss:$0 sm:$0xff] }
 0x2a9   : > { %v1206_v37 = vcombine.low %v1182_v29, %v1198_v30  ;;  %v1208_v38 = vcombine.low %v1189_v31, %v1205_v32  ;;  %v1207_v63 = vcombine.high %v1182_v29, %v1198_v30  ;;  %v1209_v2 = vcombine.high %v1189_v31, %v1205_v32 }
 0x2aa   : > { %v968_v39 = vrot.slane %v960_v33, %v3206_v55  ;;  %v975_v40 = vrot.slane %v961_v34, %v3206_v55  ;;  %v984_v41 = vrot.slane %v976_v35, %v3206_v55  ;;  %v991_v42 = vrot.slane %v977_v36, %v3206_v55 }
 0x2ab   : > { %2712 = vmatpush3.xpose.msk.msra.mxu1 %vm1360_vm2, %v1206_v37  ;;  %2722 = vmatpush3.xpose.msk.msra.mxu0 %vm1360_vm2, %v1208_v38  ;;  %v915_v28 = vadd.f32 %v2586_v27, %v914_v4 }
 0x2ac   : > { %v996_v43 = vcombine.low %v968_v39, %v975_v40  ;;  %v2588_v44 = vcombine.high %v968_v39, %v975_v40  ;;  %v1012_v45 = vcombine.low %v984_v41, %v991_v42  ;;  %v2589_v46 = vcombine.high %v984_v41, %v991_v42  ;;  %2716 = vmatprep.subr.mxu1 %v2943_v8 }
 0x2ad   : > { %2731 = vmatprep.subr.mxu0 %v2943_v8 }
 0x2ae   : > { %v1003_v47 = vrot.slane %v996_v43, %v3204_v49  ;;  %v1011_v48 = vrot.slane %v2588_v44, %v3204_v49  ;;  %v1019_v50 = vrot.slane %v1012_v45, %v3204_v49  ;;  %v1027_v51 = vrot.slane %v2589_v46, %v3204_v49 }
 0x2b0   : > { %v1028_v52 = vcombine.low %v1003_v47, %v1011_v48  ;;  %v1044_v53 = vcombine.low %v1019_v50, %v1027_v51  ;;  %v1029_v54 = vcombine.high %v1003_v47, %v1011_v48  ;;  %v1045_v56 = vcombine.high %v1019_v50, %v1027_v51 }
 0x2b2   : > { %v1036_v57 = vrot.slane %v1028_v52, %v3206_v55  ;;  %v1052_v58 = vrot.slane %v1044_v53, %v3206_v55  ;;  %v1043_v59 = vrot.slane %v1029_v54, %v3206_v55  ;;  %v1059_v60 = vrot.slane %v1045_v56, %v3206_v55 }
 0x2b4   : > { %v1060_v61 = vcombine.low %v1036_v57, %v1052_v58  ;;  %v1062_v62 = vcombine.low %v1043_v59, %v1059_v60  ;;  %v1061_v1 = vcombine.high %v1036_v57, %v1052_v58  ;;  %v1063_v3 = vcombine.high %v1043_v59, %v1059_v60 }
 0x2b6   : > { %2714 = vmatmul.mubr.msk.f32.vlgmr.msra.gmra.mxu1 %vm1360_vm2, %v1060_v61  ;;  %2724 = vmatmul.mubr.msk.f32.vlgmr.msra.gmra.mxu0 %vm1360_vm2, %v1062_v62 }
 0x2b7   : > { %2717 = vmatpush3.xpose.msk.msra.mxu1 %vm1360_vm2, %v1207_v63  ;;  %2718 = vmatprep.mubr.msk.f32.mxu1 %vm2944_vm1, %v2943_v8 }
 0x2b8   : > { %2726 = vmatprep.subr.mxu1 %v2943_v8  ;;  %2733 = vmatprep.mubr.msk.f32.mxu0 %vm2944_vm1, %v2943_v8 }
 0x2ba   : > { %2719 = vmatmul.mubr.msk.f32.vlgmr.msra.gmra.mxu1 %vm1360_vm2, %v1061_v1 }
 0x2bb   : > { %2727 = vmatpush3.xpose.msk.msra.mxu1 %vm1360_vm2, %v1209_v2  ;;  %2728 = vmatprep.mubr.msk.f32.mxu1 %vm2944_vm1, %v2943_v8 }
 0x2bc   : > { %2736 = vmatprep.subr.mxu1 %v2943_v8 }
 0x2be   : > { %2729 = vmatmul.mubr.msk.f32.vlgmr.msra.gmra.mxu1 %vm1360_vm2, %v1063_v3 }
 0x2bf   : > { %2738 = vmatprep.mubr.msk.f32.mxu1 %vm2944_vm1, %v2943_v8 }
 0x376   : > { %v1433_v7 = vpop.f32.mrf.mxu1  ;;  %v1585_v10 = vpop.f32.mrf.mxu0 }
 0x377   : > { %v1434_v11 = vadd.f32 %v1433_v7, %v1356_v6  ;;  %v1586_v15 = vadd.f32 %v1585_v10, %v1358_v9 }
 0x378   : > { %v2715_v12 = vpop.f32.mrf.mxu1  ;;  %v2725_v13 = vpop.f32.mrf.mxu0 }
 0x379   : > { %v1665_v16 = vsel %vm1360_vm2, %v1434_v11, -inf  ;;  %v1671_v21 = vsel %vm1360_vm2, %v1586_v15, -inf }
 0x37a   : > { %1666 = vmax.xlane.f32.xlu1 %v1665_v16  ;;  %v1509_v17 = vpop.f32.mrf.mxu1 }
 0x37b   : > { %v1510_v18 = vadd.f32 %v1509_v17, %v1357_v14 }
 0x37c   : > { %v2720_v19 = vpop.f32.mrf.mxu1 }
 0x37d   : > { %v1668_v22 = vsel %vm1360_vm2, %v1510_v18, -inf }
 0x37e   : > { %1672 = vmax.xlane.f32.xlu1 %v1671_v21  ;;  %1669 = vmax.xlane.f32.xlu0 %v1668_v22  ;;  %v1661_v23 = vpop.f32.mrf.mxu1 }
 0x37f   : > { %v1662_v24 = vadd.f32 %v1661_v23, %v1359_v20 }
 0x380   : > { %v2730_v25 = vpop.f32.mrf.mxu1 }
 0x381   : > { %v1674_v26 = vsel %vm1360_vm2, %v1662_v24, -inf }
 0x382   : > { %1675 = vmax.xlane.f32.xlu1 %v1674_v26 }
 0x393   : > { %1214 = vrot.lane.b32.xlu1 %v915_v28, %s2947_s4 }
 0x403   : > { %v1667_v29 = vpop.xlane.xlu1 %1666 }
 0x404   : > { %v1677_v30 = vsub.f32 %v1434_v11, %v1667_v29 }
 0x406   : > { %v1681_v31 = vmul.f32 1.442695, %v1677_v30 }
 0x407   : > { %v1673_v32 = vpop.xlane.xlu1 %1672  ;;  %v1670_v33 = vpop.xlane.xlu0 %1669 }
 0x408   : > { %2859 = vpow2.f32 %v1681_v31  ;;  %v1679_v34 = vsub.f32 %v1586_v15, %v1673_v32  ;;  %v1678_v35 = vsub.f32 %v1510_v18, %v1670_v33 }
 0x40a   : > { %v1685_v36 = vmul.f32 1.442695, %v1679_v34  ;;  %v1683_v37 = vmul.f32 1.442695, %v1678_v35 }
 0x40b   : > { %v1676_v38 = vpop.xlane.xlu1 %1675 }
 0x40c   : > { %2861 = vpow2.f32 %v1685_v36  ;;  %v1680_v39 = vsub.f32 %v1662_v24, %v1676_v38 }
 0x40d   : > { %2863 = vpow2.f32 %v1683_v37 }
 0x40e   : > { %v1687_v40 = vmul.f32 1.442695, %v1680_v39 }
 0x40f   : > { %v1215_v50 = vpop.permute.xlu1 %1214 }
 0x410   : > { %2865 = vpow2.f32 %v1687_v40  ;;  %v1220_v56 = vcombine.low %v915_v28, %v1215_v50  ;;  %v1221_v57 = vcombine.high %v915_v28, %v1215_v50  ;;  %v2157_v40 = vld [vmem:[%s3502_s11 + $0x18] sm:$0xff] }
 0x412   : > { %v1228_v62 = vrot.slane %v1220_v56, %v3204_v49  ;;  %v1235_v63 = vrot.slane %v1221_v57, %v3204_v49 }
 0x415   : > { %v2860_v41 = vpop.eup %2859 }
 0x416   : > { %v1689_v42 = vsel %vm1360_vm2, %v2860_v41, 0.0 }
 0x417   : > { %1690 = vadd.xlane.f32.xlu0 %v1689_v42 }
 0x419   : > { %v3273_v43 = vpop.eup %2861 }
 0x41a   : > { %v2864_v44 = vpop.eup %2863  ;;  %v1695_v45 = vsel %vm1360_vm2, %v3273_v43, 0.0 }
 0x41b   : > { %1696 = vadd.xlane.f32.xlu0 %v1695_v45  ;;  %v1692_v46 = vsel %vm1360_vm2, %v2864_v44, 0.0 }
 0x41c   : > { %1693 = vadd.xlane.f32.xlu1 %v1692_v46 }
 0x41d   : > { %v3278_v47 = vpop.eup %2865 }
 0x41e   : > { %v1698_v48 = vsel %vm1360_vm2, %v3278_v47, 0.0 }
 0x420   : > { %1699 = vadd.xlane.f32.xlu1 %v1698_v48 }
 0x431   : > { %1217 = vrot.lane.b32.xlu1 %v915_v28, %s2945_s23  ;;  %1211 = vrot.lane.b32.xlu0 %v915_v28, %s2946_s24 }
 0x4a0   : > { %v1691_v51 = vpop.xlane.xlu0 %1690 }
 0x4a1   : > { %2867 = vrcp.f32 %v1691_v51 }
 0x4a4   : > { %v1697_v53 = vpop.xlane.xlu0 %1696 }
 0x4a5   : > { %v1694_v52 = vpop.xlane.xlu1 %1693 }
 0x4a6   : > { %2869 = vrcp.f32 %v1694_v52 }
 0x4a7   : > { %2871 = vrcp.f32 %v1697_v53 }
 0x4a8   : > { %v1212_v58 = vpop.permute.xlu0 %1211 }
 0x4a9   : > { %v1700_v54 = vpop.xlane.xlu1 %1699 }
 0x4aa   : > { %2873 = vrcp.f32 %v1700_v54 }
 0x4ad   : > { %v1218_v59 = vpop.permute.xlu1 %1217 }
 0x4ae   : > { %v1236_v60 = vcombine.low %v1212_v58, %v1218_v59  ;;  %v1237_v61 = vcombine.high %v1212_v58, %v1218_v59  ;;  %v2868_v24 = vpop.eup %2867 }
 0x4af   : > { %v1702_v33 = vmul.f32 %v2868_v24, %v2860_v41 }
 0x4b0   : > { %v1244_v1 = vrot.slane %v1236_v60, %v3204_v49  ;;  %v1251_v2 = vrot.slane %v1237_v61, %v3204_v49 }
 0x4b2   : > { %v1252_v3 = vcombine.low %v1228_v62, %v1244_v1  ;;  %v1253_v4 = vcombine.high %v1228_v62, %v1244_v1  ;;  %v1268_v5 = vcombine.low %v1235_v63, %v1251_v2  ;;  %v1269_v6 = vcombine.high %v1235_v63, %v1251_v2  ;;  %v2156_v63 = vld [vmem:[%s3502_s11 + $0x10] sm:$0xff]  ;;  %v2155_v1 = vld [vmem:[%s3502_s11 + $0x8] sm:$0xff] }
 0x4b3   : > { %v2870_v25 = vpop.eup %2869 }
 0x4b4   : > { %v1260_v7 = vrot.slane %v1252_v3, %v3206_v55  ;;  %v1267_v9 = vrot.slane %v1253_v4, %v3206_v55  ;;  %v1276_v10 = vrot.slane %v1268_v5, %v3206_v55  ;;  %v1283_v11 = vrot.slane %v1269_v6, %v3206_v55  ;;  %v2872_v30 = vpop.eup %2871 }
 0x4b5   : > { %v1704_v34 = vmul.f32 %v2870_v25, %v2864_v44  ;;  %v1706_v38 = vmul.f32 %v2872_v30, %v3273_v43 }
 0x4b6   : > { %v1288_v12 = vcombine.low %v1260_v7, %v1267_v9  ;;  %v2592_v13 = vcombine.high %v1260_v7, %v1267_v9  ;;  %v1304_v14 = vcombine.low %v1276_v10, %v1283_v11  ;;  %v2593_v15 = vcombine.high %v1276_v10, %v1283_v11  ;;  %v2154_v11 = vld [vmem:[%s3502_s11] sm:$0xff] }
 0x4b7   : > { %v2874_v35 = vpop.eup %2873 }
 0x4b8   : > { %v1295_v16 = vrot.slane %v1288_v12, %v3204_v49  ;;  %v1303_v17 = vrot.slane %v2592_v13, %v3204_v49  ;;  %v1311_v18 = vrot.slane %v1304_v14, %v3204_v49  ;;  %v1319_v19 = vrot.slane %v2593_v15, %v3204_v49 }
 0x4b9   : > { %v1708_v39 = vmul.f32 %v2874_v35, %v3278_v47 }
 0x4ba   : > { %v1320_v20 = vcombine.low %v1295_v16, %v1303_v17  ;;  %v1336_v21 = vcombine.low %v1311_v18, %v1319_v19  ;;  %v1321_v22 = vcombine.high %v1295_v16, %v1303_v17  ;;  %v1337_v23 = vcombine.high %v1311_v18, %v1319_v19 }
 0x4bc   : > { %v1328_v26 = vrot.slane %v1320_v20, %v3206_v55  ;;  %v1344_v27 = vrot.slane %v1336_v21, %v3206_v55  ;;  %v1335_v28 = vrot.slane %v1321_v22, %v3206_v55  ;;  %v1351_v29 = vrot.slane %v1337_v23, %v3206_v55 }
 0x4be   : > { %v1352_v31 = vcombine.low %v1328_v26, %v1344_v27  ;;  %v1353_v32 = vcombine.high %v1328_v26, %v1344_v27  ;;  %v1354_v36 = vcombine.low %v1335_v28, %v1351_v29  ;;  %v1355_v37 = vcombine.high %v1335_v28, %v1351_v29 }
 0x4c0   : > { %2732 = vmatpush3.msra.mxu0 %v1352_v31  ;;  %2737 = vmatpush3.msra.mxu1 %v1353_v32 }
 0x4c1   : > { %2734 = vmatmul.mubr.msk.f32.vlgmr.msra.gmra.mxu0 %vm1360_vm2, %v1702_v33  ;;  %2739 = vmatmul.mubr.msk.f32.vlgmr.msra.gmra.mxu1 %vm1360_vm2, %v1704_v34 }
 0x4c2   : > { %2741 = vmatprep.subr.mxu0 %v2943_v8  ;;  %2746 = vmatprep.subr.mxu1 %v2943_v8 }
 0x4c3   : > { %2742 = vmatpush3.msra.mxu0 %v1354_v36  ;;  %2747 = vmatpush3.msra.mxu1 %v1355_v37 }
 0x4c4   : > { %2743 = vmatprep.mubr.msk.f32.mxu0 %vm2944_vm1, %v2943_v8  ;;  %2748 = vmatprep.mubr.msk.f32.mxu1 %vm2944_vm1, %v2943_v8 }
 0x4c5   : > { %2744 = vmatmul.mubr.msk.f32.vlgmr.msra.gmra.mxu0 %vm1360_vm2, %v1706_v38  ;;  %2749 = vmatmul.mubr.msk.f32.vlgmr.msra.gmra.mxu1 %vm1360_vm2, %v1708_v39 }
 0x4c6   : > { %2751 = vmatprep.subr.mxu0 %v2943_v8  ;;  %2759 = vmatprep.mubr.msk.f32.mxu0 %vm2944_vm1, %v2943_v8 }
 0x4c7   : > { %2762 = vmatprep.subr.mxu1 %v2943_v8  ;;  %2770 = vmatprep.mubr.msk.f32.mxu1 %vm2944_vm1, %v2943_v8 }
 0x4c8   : > { %2752 = vmatpush3.msra.mxu0 %v2157_v40 }
 0x4c9   : > { %2753 = vmatprep.subr.mxu0 %v2943_v8 }
 0x4ca   : > { %2754 = vmatpush3.msra.mxu0 %v2156_v63  ;;  %v2388_v63 = vld [vmem:[%s3508_s17 + $0x48] sm:$0xff] }
 0x4cb   : > { %2755 = vmatprep.subr.mxu0 %v2943_v8 }
 0x4cc   : > { %2756 = vmatpush3.msra.mxu0 %v2155_v1  ;;  %v2387_v1 = vld [vmem:[%s3508_s17 + $0x40] sm:$0xff] }
 0x4cd   : > { %2757 = vmatprep.subr.mxu0 %v2943_v8 }
 0x4ce   : > { %2758 = vmatpush3.msra.mxu0 %v2154_v11  ;;  %v2612_v11 = vld [vmem:[%s3507_s16] ss:$0 sm:$0xff] }
 0x4cf   : > { %2773 = vmatprep.subr.mxu0 %v2943_v8 }
 0x581   : > { %v1778_v41 = vpop.f32.mrf.mxu0  ;;  %v1851_v42 = vpop.f32.mrf.mxu1 }
 0x583   : > { %v2735_v43 = vpop.f32.mrf.mxu0  ;;  %v2740_v44 = vpop.f32.mrf.mxu1 }
 0x584   : > { %v2271_v43 = vld [vmem:[%s3506_s15 + $0x18] sm:$0xff]  ;;  %v2269_v44 = vld [vmem:[%s3506_s15 + $0x8] sm:$0xff] }
 0x585   : > { %v1924_v45 = vpop.f32.mrf.mxu0  ;;  %v1997_v46 = vpop.f32.mrf.mxu1  ;;  %2763 = vmatpush3.msra.mxu1 %v2271_v43 }
 0x586   : > { %v2001_v47 = vcombine.low %v1778_v41, %v1924_v45  ;;  %v2002_v48 = vcombine.high %v1778_v41, %v1924_v45  ;;  %v2017_v50 = vcombine.low %v1851_v42, %v1997_v46  ;;  %v2018_v51 = vcombine.high %v1851_v42, %v1997_v46  ;;  %2764 = vmatprep.subr.mxu1 %v2943_v8  ;;  %v2268_v45 = vld [vmem:[%s3506_s15] sm:$0xff] }
 0x587   : > { %v2745_v52 = vpop.f32.mrf.mxu0  ;;  %v2750_v53 = vpop.f32.mrf.mxu1 }
 0x588   : > { %v2009_v54 = vrot.slane %v2001_v47, %v3204_v49  ;;  %v2016_v56 = vrot.slane %v2002_v48, %v3204_v49  ;;  %v2025_v57 = vrot.slane %v2017_v50, %v3204_v49  ;;  %v2032_v58 = vrot.slane %v2018_v51, %v3204_v49  ;;  %v2610_v51 = vld [vmem:[%s3504_s13] ss:$0 sm:$0xff] }
 0x589   : > { %v2611_v53 = vld [vmem:[%s3505_s14] ss:$0 sm:$0xff] }
 0x58a   : > { %v2033_v59 = vcombine.low %v2009_v54, %v2025_v57  ;;  %v2034_v60 = vcombine.high %v2009_v54, %v2025_v57  ;;  %v2049_v61 = vcombine.low %v2016_v56, %v2032_v58  ;;  %v2050_v62 = vcombine.high %v2016_v56, %v2032_v58  ;;  %v2394_v57 = vld [vmem:[%s3508_s17 + $0x78] sm:$0xff]  ;;  %v2393_v58 = vld [vmem:[%s3508_s17 + $0x70] sm:$0xff] }
 0x58c   : > { %v2041_v2 = vrot.slane %v2033_v59, %v3206_v55  ;;  %v2048_v3 = vrot.slane %v2034_v60, %v3206_v55  ;;  %v2057_v4 = vrot.slane %v2049_v61, %v3206_v55  ;;  %v2064_v5 = vrot.slane %v2050_v62, %v3206_v55  ;;  %v2392_v59 = vld [vmem:[%s3508_s17 + $0x68] sm:$0xff]  ;;  %v2391_v60 = vld [vmem:[%s3508_s17 + $0x60] sm:$0xff]  ;;  %v2390_v61 = vld [vmem:[%s3508_s17 + $0x58] sm:$0xff] }
 0x58d   : > { %v2389_v62 = vld [vmem:[%s3508_s17 + $0x50] sm:$0xff] }
 0x58e   : > { %v2069_v6 = vcombine.low %v2041_v2, %v2048_v3  ;;  %v2606_v7 = vcombine.high %v2041_v2, %v2048_v3  ;;  %v2085_v9 = vcombine.low %v2057_v4, %v2064_v5  ;;  %v2607_v10 = vcombine.high %v2057_v4, %v2064_v5  ;;  %v2386_v2 = vld [vmem:[%s3508_s17 + $0x38] sm:$0xff]  ;;  %v2385_v3 = vld [vmem:[%s3508_s17 + $0x30] sm:$0xff]  ;;  %v2384_v4 = vld [vmem:[%s3508_s17 + $0x28] sm:$0xff] }
 0x58f   : > { %v2383_v5 = vld [vmem:[%s3508_s17 + $0x20] sm:$0xff] }
 0x590   : > { %v2076_v12 = vrot.slane %v2069_v6, %v3204_v49  ;;  %v2084_v13 = vrot.slane %v2606_v7, %v3204_v49  ;;  %v2092_v14 = vrot.slane %v2085_v9, %v3204_v49  ;;  %v2100_v15 = vrot.slane %v2607_v10, %v3204_v49  ;;  %v2382_v6 = vld [vmem:[%s3508_s17 + $0x18] sm:$0xff]  ;;  %v2381_v7 = vld [vmem:[%s3508_s17 + $0x10] sm:$0xff]  ;;  %v2380_v9 = vld [vmem:[%s3508_s17 + $0x8] sm:$0xff] }
 0x591   : > { %v2379_v10 = vld [vmem:[%s3508_s17] sm:$0xff] }
 0x592   : > { %v2102_v16 = vcombine.high %v2076_v12, %v2084_v13  ;;  %v2118_v17 = vcombine.high %v2092_v14, %v2100_v15  ;;  %v2101_v18 = vcombine.low %v2076_v12, %v2084_v13  ;;  %v2117_v19 = vcombine.low %v2092_v14, %v2100_v15 }
 0x594   : > { %v2116_v20 = vrot.slane %v2102_v16, %v3206_v55  ;;  %v2132_v21 = vrot.slane %v2118_v17, %v3206_v55  ;;  %v2109_v22 = vrot.slane %v2101_v18, %v3206_v55  ;;  %v2125_v23 = vrot.slane %v2117_v19, %v3206_v55  ;;  %v2608_v55 = vld [vmem:[%s3503_s12] ss:$0 sm:$0xff] }
 0x596   : > { %v2135_v24 = vcombine.low %v2116_v20, %v2132_v21  ;;  %v2134_v25 = vcombine.high %v2109_v22, %v2125_v23  ;;  %v2133_v26 = vcombine.low %v2109_v22, %v2125_v23  ;;  %v2136_v49 = vcombine.high %v2116_v20, %v2132_v21 }
 0x598   : > { %2142 = vrot.lane.b32.xlu1 %v2135_v24, %s2950_s29  ;;  %2138 = vrot.lane.b32.xlu0 %v2134_v25, %s2951_s27  ;;  %s2616_s29 = sshll.u32 %s3075_s1, 7  ;;  %s621_s27 = scalar_lea.vmem [#allocation2], %s2575_s5 }
 0x599   : > { %s2486_s4 = scalar_lea.hbm %s3510_s19, %s2616_s29  ;;  %s2953_s1 = smov [#allocation2]  }
 0x59a   : > { %s2885_s5 = sshll.u32 %s2953_s1, 4  ;;  %s2886_s5 = int_to_ptr.vmem [resolvable:$false] %s2885_s5 }
 0x59b   : > { %s2887_s2 = scalar_lea.vmem %s2886_s5, 256 }
 0x59c   : > { %2146 = vrot.lane.b32.xlu0 %v2136_v49, %s2952_s22  ;;  %s2488_s22 = sshll.u32 %s621_s27, 4  ;;  %s2489_s22 = int_to_ptr.vmem [resolvable:$true] %s2488_s22 }
 0x59d   : > { %s2881_s6 = scalar_lea.vmem %s2489_s22, 128  ;;  %p2888_p0 = scmp.lt.s32.totalorder %s2489_s22, %s2886_s5 }
 0x59e   : > { %p2882_p11 = scmp.ne.s32.totalorder %s2489_s22, %s2881_s6  ;;  %p2889_p1 = scmp.lt.s32.totalorder %s2887_s2, %s2881_s6 }
 0x5a0   : > { %p2883_p12 = pnand %p2882_p11, %p3092_p5  ;;  %p2890_p2 = por %p2889_p1, %p2888_p0 }
 0x5a2   : > { %p2884_p13 = pneg %p2883_p12 }
 0x5a4   : > { %p2891_p3 = pnand %p2890_p2, %p2884_p13 }
 0x60a   : > { %v2139_v27 = vpop.permute.xlu0 %2138  ;;  %v2143_v28 = vpop.permute.xlu1 %2142 }
 0x60b   : > { %v2149_v29 = vsel %vm1360_vm2, %v2133_v26, %v2139_v27 }
 0x60c   : > { %v2151_v31 = vsel %vm2150_vm3, %v2149_v29, %v2143_v28 }
 0x60e   : > { %v2147_v30 = vpop.permute.xlu0 %2146 }
 0x60f   : > { %v2153_v32 = vsel %vm2152_vm4, %v2151_v31, %v2147_v30 }
 0x610   : > { %2760 = vmatmul.mubr.msk.f32.vlgmr.msra.gmra.mxu0 %vm639_vm0, %v2153_v32 }
 0x611   : > { %2805 = vmatprep.mubr.msk.f32.mxu0 %vm2944_vm1, %v2943_v8  ;;  %2774 = vmatpush3.msra.mxu0 %v2394_v57 }
 0x612   : > { %2775 = vmatprep.subr.mxu0 %v2943_v8 }
 0x613   : > { %2776 = vmatpush3.msra.mxu0 %v2393_v58 }
 0x614   : > { %2777 = vmatprep.subr.mxu0 %v2943_v8 }
 0x615   : > { %2778 = vmatpush3.msra.mxu0 %v2392_v59 }
 0x616   : > { %2779 = vmatprep.subr.mxu0 %v2943_v8 }
 0x617   : > { %2780 = vmatpush3.msra.mxu0 %v2391_v60 }
 0x618   : > { %2781 = vmatprep.subr.mxu0 %v2943_v8 }
 0x619   : > { %2782 = vmatpush3.msra.mxu0 %v2390_v61 }
 0x61a   : > { %2783 = vmatprep.subr.mxu0 %v2943_v8 }
 0x61b   : > { %2784 = vmatpush3.msra.mxu0 %v2389_v62 }
 0x61c   : > { %2785 = vmatprep.subr.mxu0 %v2943_v8 }
 0x61d   : > { %2786 = vmatpush3.msra.mxu0 %v2388_v63 }
 0x61e   : > { %2787 = vmatprep.subr.mxu0 %v2943_v8 }
 0x61f   : > { %2788 = vmatpush3.msra.mxu0 %v2387_v1 }
 0x620   : > { %2789 = vmatprep.subr.mxu0 %v2943_v8 }
 0x621   : > { %2790 = vmatpush3.msra.mxu0 %v2386_v2 }
 0x622   : > { %2791 = vmatprep.subr.mxu0 %v2943_v8 }
 0x623   : > { %2792 = vmatpush3.msra.mxu0 %v2385_v3 }
 0x624   : > { %2793 = vmatprep.subr.mxu0 %v2943_v8 }
 0x625   : > { %2794 = vmatpush3.msra.mxu0 %v2384_v4 }
 0x626   : > { %2795 = vmatprep.subr.mxu0 %v2943_v8 }
 0x627   : > { %2796 = vmatpush3.msra.mxu0 %v2383_v5 }
 0x628   : > { %2797 = vmatprep.subr.mxu0 %v2943_v8 }
 0x629   : > { %2798 = vmatpush3.msra.mxu0 %v2382_v6 }
 0x62a   : > { %2799 = vmatprep.subr.mxu0 %v2943_v8 }
 0x62b   : > { %2800 = vmatpush3.msra.mxu0 %v2381_v7 }
 0x62c   : > { %2801 = vmatprep.subr.mxu0 %v2943_v8 }
 0x62d   : > { %2802 = vmatpush3.msra.mxu0 %v2380_v9 }
 0x62e   : > { %2803 = vmatprep.subr.mxu0 %v2943_v8 }
 0x62f   : > { %2804 = vmatpush3.msra.mxu0 %v2379_v10 }
 0x6d0   : > { %v2234_v33 = vpop.f32.mrf.mxu0 }
 0x6d1   : > { %v2235_v34 = vadd.f32 %v2608_v55, %v2234_v33 }
 0x6d2   : > { %v2761_v35 = vpop.f32.mrf.mxu0 }
 0x6d3   : > { %v3358_v36 = vadd.f32 %v2235_v34, %v3112_v0  ;;  %v2270_v0 = vld [vmem:[%s3506_s15 + $0x10] sm:$0xff] }
 0x6d4   : > { %2765 = vmatpush3.msra.mxu1 %v2270_v0 }
 0x6d5   : > { %v2241_v37 = vsel %vm639_vm0, %v3358_v36, 0.0  ;;  %2766 = vmatprep.subr.mxu1 %v2943_v8 }
 0x6d6   : > { %2242 = vadd.xlane.f32.xlu1 %v2241_v37  ;;  %2767 = vmatpush3.msra.mxu1 %v2269_v44 }
 0x6d7   : > { %2768 = vmatprep.subr.mxu1 %v2943_v8 }
 0x6d8   : > { %2769 = vmatpush3.msra.mxu1 %v2268_v45 }
 0x75f   : > { %v2243_v38 = vpop.xlane.xlu1 %2242 }
 0x760   : > { %v2244_v39 = vmul.f32 0.03125, %v2243_v38  ;;  %v2614_v38 = vld [vmem:[%s3509_s18] ss:$0 sm:$0xff] }
 0x762   : > { %v2245_v40 = vsub.f32 %v3358_v36, %v2244_v39 }
 0x764   : > { %v2246_v41 = vmul.f32 %v2245_v40, %v2245_v40 }
 0x766   : > { %v2247_v42 = vsel %vm639_vm0, %v2246_v41, 0.0 }
 0x767   : > { %2248 = vadd.xlane.f32.xlu0 %v2247_v42 }
 0x7f0   : > { %v2249_v46 = vpop.xlane.xlu0 %2248 }
 0x7f1   : > { %v2250_v47 = vmul.f32 0.03125, %v2249_v46 }
 0x7f3   : > { %v2251_v48 = vadd.f32 1e-05, %v2250_v47 }
 0x7f5   : > { %2875 = vrsqrt.f32 %v2251_v48 }
 0x802   : > { %v2876_v50 = vpop.eup %2875 }
 0x803   : > { %v2253_v52 = vmul.f32 %v2876_v50, %v2245_v40 }
 0x805   : > { %v2260_v54 = vmul.f32 %v2610_v51, %v2253_v52 }
 0x807   : > { %v2267_v56 = vadd.f32 %v2611_v53, %v2260_v54 }
 0x809   : > { %2771 = vmatmul.mubr.msk.f32.vlgmr.msra.gmra.mxu1 %vm639_vm0, %v2267_v56 }
 0x8c9   : > { %v2348_v12 = vpop.f32.mrf.mxu1 }
 0x8ca   : > { %v2349_v13 = vadd.f32 %v2612_v11, %v2348_v12 }
 0x8cb   : > { %v2772_v14 = vpop.f32.mrf.mxu1 }
 0x8cc   : > { %v2353_v15 = vmul.f32 0.70710677, %v2349_v13  ;;  %v2352_v34 = vmul.f32 0.5, %v2349_v13 }
 0x8ce   : > { %v2354_v16 = vand.u32 2147483647, %v2353_v15  ;;  %vm2374_vm5 = vcmp.lt.f32.partialorder %v2353_v15, 0.0 }
 0x8d0   : > { %v2355_v17 = vmul.f32 0.3275911, %v2354_v16  ;;  %v2368_v19 = vmul.f32 %v2354_v16, %v2354_v16 }
 0x8d2   : > { %v2356_v18 = vadd.f32 1.0, %v2355_v17  ;;  %v2369_v20 = vsub.f32 0.0, %v2368_v19 }
 0x8d4   : > { %2877 = vrcp.f32 %v2356_v18  ;;  %v2370_v23 = vmul.f32 1.442695, %v2369_v20 }
 0x8d6   : > { %2879 = vpow2.f32 %v2370_v23 }
 0x8e1   : > { %v2878_v21 = vpop.eup %2877 }
 0x8e2   : > { %v2359_v22 = vmul.f32 1.0614054, %v2878_v21 }
 0x8e3   : > { %v2880_v30 = vpop.eup %2879 }
 0x8e4   : > { %v2360_v24 = vadd.f32 -1.4531521, %v2359_v22 }
 0x8e6   : > { %v2361_v8 = vmul.f32 %v2878_v21, %v2360_v24 }
 0x8e8   : > { %v2362_v25 = vadd.f32 1.4214138, %v2361_v8 }
 0x8ea   : > { %v2363_v26 = vmul.f32 %v2878_v21, %v2362_v25 }
 0x8ec   : > { %v2364_v49 = vadd.f32 -0.28449672, %v2363_v26 }
 0x8ee   : > { %v2365_v27 = vmul.f32 %v2878_v21, %v2364_v49 }
 0x8f0   : > { %v2366_v28 = vadd.f32 0.2548296, %v2365_v27 }
 0x8f2   : > { %v2367_v29 = vmul.f32 %v2878_v21, %v2366_v28 }
 0x8f4   : > { %v2372_v31 = vmul.f32 %v2880_v30, %v2367_v29 }
 0x8f6   : > { %v2373_v32 = vsub.f32 1.0, %v2372_v31 }
 0x8f8   : > { %v2375_v55 = vsub.f32 0.0, %v2373_v32 }
 0x8fa   : > { %v2376_v33 = vsel %vm2374_vm5, %v2375_v55, %v2373_v32 }
 0x8fb   : > { %v2377_v35 = vadd.f32 1.0, %v2376_v33 }
 0x8fd   : > { %v2378_v37 = vmul.f32 %v2377_v35, %v2352_v34 }
 0x8ff   : > { %2806 = vmatmul.mubr.f32.vlgmr.msra.gmra.mxu0 %v2378_v37 }
 0x9bf   : > { %v2468_v39 = vpop.f32.mrf.mxu0 }
 0x9c0   : > { %v2469_v40 = vadd.f32 %v2614_v38, %v2468_v39 }
 0x9c1   : > { %v2807_v41 = vpop.f32.mrf.mxu0 }
 0x9c2   : > { %v2472_v42 = vadd.f32 %v2469_v40, %v3358_v36 }
 0x9c4   : > { %2473 = vst.msk [vmem:[%s621_s27] sm:$0xff] %vm639_vm0, %v2472_v42 }
 0x9c5   : > { %2894 = shalt.err (!%p2891_p3)
}
 0x9c6   : > { %s2895_s25 = scalar_lea.hbm %s2486_s4, 128  ;;  %s2899_s27 = scalar_lea.hbm %s3510_s19, 256 }
 0x9c7   : > { %p2896_p4 = scmp.ne.s32.totalorder %s2486_s4, %s2895_s25  ;;  %p2900_p9 = scmp.lt.s32.totalorder %s2486_s4, %s3510_s19 }
 0x9c8   : > { %p2901_p10 = scmp.lt.s32.totalorder %s2899_s27, %s2895_s25 }
 0x9c9   : > { %p2897_p7 = pnand %p2896_p4, %p3092_p5 }
 0x9ca   : > { %p2902_p11 = por %p2901_p10, %p2900_p9 }
 0x9cb   : > { %p2898_p8 = pneg %p2897_p7 }
 0x9cd   : > { %p2903_p12 = pnand %p2902_p11, %p2898_p8 }
 0x9cf   : > { %2906 = shalt.err (!%p2903_p12)
}
 0x9d0   : > { %2808 = dma.vmem_to_hbm [thread:$0]  (%p3092_p5), %s2489_s22, 128, %s2486_s4, %s2475_s20  }
 0x9d1 PF: > { %p2814_p13 = scmp.ge.s32.totalorder %s2941_s21, 2  ;;  %s2500_s6 = sand.u32 1, %s2929_s0  }
 0x9d2   : > { %s2501_s1 = scalar_lea.sflag [#allocation3], %s2500_s6 }
 0x9d3   : > { %p2811_p0 = pnand %p2814_p13, %p3096_p6 }
 0x9d5   : > { %p2812_p1 = pneg %p2811_p0 }
 0x9d7   : > { %2924 = dma.done.wait (%p2812_p1), %s2501_s1, 128  }
 0x9d8   : > { %2926 = vsyncadd (%p2812_p1), %s2501_s1, 4294967168  ;;  %s3535_s21 = sld [smem:[#allocation6_spill]]  ;;  %s3538_s0 = smov %s2933_s30 }
 0x9d9   : > { %s3536_s5 = sld [smem:[#allocation5_spill]] }
 0x9da   : > { %s3537_s20 = sld [smem:[#allocation7_spill]] }
 0x9de   : > { %p29_p2 = scmp.ge.s32.totalorder %s3535_s21, 4  }
 0x9df   : > { %s3539_s30 = smov %s3536_s5 }
 0x9e0   :  { %31 = sbr.rel (!%p29_p2) target bundleno = 11 (0xb), region = 137 }
 0x9e5   :  { %2506 = vsyncpa [#allocation3], 1 }
 0x9e6   :  { %2508 = vsyncpa [#allocation3 + $0x1], 1 }

</bundles_post_ra>
